<compile_context>
chip_gen: v6e
topology: v6e:2x2x1
jax: 0.10.0
libtpu: 0.0.40
codegen_flags: <defaults>
</compile_context>

<pallas_src>
import jax
import jax.numpy as jnp
from jax.experimental import pallas as pl
from jax.experimental.pallas import tpu as pltpu


# ---------------------------------------------------------------------------
# Fused GCN kernel (5x SAGEConv-lstm + ReLU, max-pool readout, fc1/relu/fc2/relu)
# ---------------------------------------------------------------------------
def make_gcn_kernel(num_layers, K, N, G):
    npg = N // G

    def kernel(*refs):
        idx = 0
        x_ref = refs[idx]; idx += 1
        sel_ref = refs[idx]; idx += 1
        layers = []
        for _ in range(num_layers):
            layers.append(refs[idx:idx + 6]); idx += 6
        w1_ref, b1_ref, w2_ref, b2_ref = refs[idx:idx + 4]; idx += 4
        out_ref = refs[idx]

        x = x_ref[...]          # [N, D0]
        sel = sel_ref[...]      # [K*N, N] one-hot neighbor selection (time-major)

        for (wx_ref, wh_ref, b_ref, wself_ref, wneigh_ref, bias_ref) in layers:
            wx = wx_ref[...]    # [D, 4D]  (gate order i,f,g,o)
            wh = wh_ref[...]    # [D, 4D]
            D = wx.shape[0]

            # Hoisted input projection (+ folded biases), then neighbor gather
            # as a one-hot matmul -> time-major [K*N, 4D].
            xp = jnp.dot(x, wx, preferred_element_type=jnp.float32) + b_ref[...]
            seq_p = jnp.dot(sel, xp, preferred_element_type=jnp.float32)

            h = jnp.zeros((N, D), jnp.float32)
            c = jnp.zeros((N, D), jnp.float32)
            for t in range(K):  # static unroll of the LSTM recurrence
                gates = seq_p[t * N:(t + 1) * N] + jnp.dot(
                    h, wh, preferred_element_type=jnp.float32)      # [N, 4D]
                i = jax.nn.sigmoid(gates[:, 0 * D:1 * D])
                f = jax.nn.sigmoid(gates[:, 1 * D:2 * D])
                g = jnp.tanh(gates[:, 2 * D:3 * D])
                o = jax.nn.sigmoid(gates[:, 3 * D:4 * D])
                c = f * c + i * g
                h = o * jnp.tanh(c)

            # rst = fc_self(x) + fc_neigh(lstm_h) + bias, then F.relu
            x = jnp.maximum(
                jnp.dot(x, wself_ref[...], preferred_element_type=jnp.float32)
                + jnp.dot(h, wneigh_ref[...], preferred_element_type=jnp.float32)
                + bias_ref[...], 0.0)

        # MaxPooling readout (nodes contiguous per graph) + fc1 -> relu -> fc2 -> relu
        pooled = jnp.concatenate(
            [jnp.max(x[g * npg:(g + 1) * npg], axis=0, keepdims=True)
             for g in range(G)], axis=0)                            # [G, Dlast]
        y = jnp.maximum(
            jnp.dot(pooled, w1_ref[...], preferred_element_type=jnp.float32)
            + b1_ref[...], 0.0)
        out_ref[...] = jnp.maximum(
            jnp.dot(y, w2_ref[...], preferred_element_type=jnp.float32)
            + b2_ref[...], 0.0)

    return kernel


def gcn_forward(x, nbr_idx, layer_params, w1, b1, w2, b2, num_graphs):
    """x: [N, D0] f32, nbr_idx: [N, K] int32 -> [num_graphs, 1] f32."""
    N = x.shape[0]
    K = nbr_idx.shape[1]
    # One-hot neighbor-selection matrix, time-major: row t*N+n picks x[nbr_idx[n,t]].
    sel = jax.nn.one_hot(jnp.transpose(nbr_idx).reshape(-1), N, dtype=jnp.float32)

    args = [x, sel]
    for p in layer_params:
        args += [p["w_x"], p["w_h"], p["b"], p["w_self"], p["w_neigh"], p["bias"]]
    args += [w1, b1, w2, b2]

    kernel = make_gcn_kernel(len(layer_params), K, N, num_graphs)
    # TODO(synk): for large N, add a node-tile grid (dimension_semantics=("parallel",))
    # and bf16 matmul operands on v6e/v7x; pointless at N=16.
    return pl.pallas_call(
        kernel,
        out_shape=jax.ShapeDtypeStruct((num_graphs, 1), jnp.float32),
        in_specs=[pl.BlockSpec(memory_space=pltpu.MemorySpace.VMEM)] * len(args),
        out_specs=pl.BlockSpec(memory_space=pltpu.MemorySpace.VMEM),
    )(*args)


# ---------------------------------------------------------------------------
# Parameter init (deterministic, PyTorch-like uniform fan-in scaling).
# ---------------------------------------------------------------------------
def _uniform(key, shape, scale):
    return jax.random.uniform(key, shape, jnp.float32, -scale, scale)


def init_sage_params(key, din, dout):
    ks = jax.random.split(key, 6)
    s = 1.0 / jnp.sqrt(jnp.float32(din))
    return {
        "w_x": _uniform(ks[0], (din, 4 * din), s),      # [D,4D], gate order i,f,g,o
        "w_h": _uniform(ks[1], (din, 4 * din), s),      # [D,4D]
        "b": _uniform(ks[2], (1, 4 * din), s),          # b_ih + b_hh folded
        "w_self": _uniform(ks[3], (din, dout), s),
        "w_neigh": _uniform(ks[4], (din, dout), s),
        "bias": _uniform(ks[5], (1, dout), s),
    }


if __name__ == "__main__":
    key = jax.random.PRNGKey(0)

    in_feats, h_feats = 16, 32
    num_graphs, nodes_per_graph, K = 2, 8, 4
    N = num_graphs * nodes_per_graph

    # Deterministic fixed-degree graph: node i's neighbors are the next K nodes
    # (cyclically) inside its own graph.
    local = jnp.arange(nodes_per_graph)
    nbr_local = (local[:, None] + jnp.arange(1, K + 1)[None, :]) % nodes_per_graph
    nbr_idx = jnp.concatenate(
        [nbr_local + g * nodes_per_graph for g in range(num_graphs)], axis=0
    ).astype(jnp.int32)                                           # [N, K]

    # Node input features (g.ndata['layer'].float()).
    key, kx = jax.random.split(key)
    x = jax.random.normal(kx, (N, in_feats), jnp.float32)

    # 5 SAGEConv(lstm) layers: 16->32->16->8->4->2
    dims = [(in_feats, h_feats),
            (h_feats, h_feats // 2),
            (h_feats // 2, h_feats // 4),
            (h_feats // 4, h_feats // 8),
            (h_feats // 8, h_feats // 16)]
    layer_params = []
    for din, dout in dims:
        key, kp = jax.random.split(key)
        layer_params.append(init_sage_params(kp, din, dout))

    # fc1: h//16 -> h//32, fc2: h//32 -> 1
    d5, dfc1 = h_feats // 16, h_feats // 32
    key, k1, k2, k3, k4 = jax.random.split(key, 5)
    w1 = _uniform(k1, (d5, dfc1), 1.0 / jnp.sqrt(jnp.float32(d5)))
    b1 = _uniform(k2, (1, dfc1), 1.0 / jnp.sqrt(jnp.float32(d5)))
    w2 = _uniform(k3, (dfc1, 1), 1.0 / jnp.sqrt(jnp.float32(dfc1)))
    b2 = _uniform(k4, (1, 1), 1.0 / jnp.sqrt(jnp.float32(dfc1)))

    fwd = jax.jit(gcn_forward, static_argnums=(7,))
    out = fwd(x, nbr_idx, layer_params, w1, b1, w2, b2, num_graphs)
    out = jax.block_until_ready(out)
    assert out.shape == (num_graphs, 1) and out.dtype == jnp.float32
    print("KERNEL_OK")
</pallas_src>

<mosaic_0001>
module attributes {stable_mosaic.version = 11 : i64} {
  func.func @kernel(%arg0: memref<16x16xf32, #tpu.memory_space<vmem>>, %arg1: memref<64x16xf32, #tpu.memory_space<vmem>>, %arg2: memref<16x64xf32, #tpu.memory_space<vmem>>, %arg3: memref<16x64xf32, #tpu.memory_space<vmem>>, %arg4: memref<1x64xf32, #tpu.memory_space<vmem>>, %arg5: memref<16x32xf32, #tpu.memory_space<vmem>>, %arg6: memref<16x32xf32, #tpu.memory_space<vmem>>, %arg7: memref<1x32xf32, #tpu.memory_space<vmem>>, %arg8: memref<32x128xf32, #tpu.memory_space<vmem>>, %arg9: memref<32x128xf32, #tpu.memory_space<vmem>>, %arg10: memref<1x128xf32, #tpu.memory_space<vmem>>, %arg11: memref<32x16xf32, #tpu.memory_space<vmem>>, %arg12: memref<32x16xf32, #tpu.memory_space<vmem>>, %arg13: memref<1x16xf32, #tpu.memory_space<vmem>>, %arg14: memref<16x64xf32, #tpu.memory_space<vmem>>, %arg15: memref<16x64xf32, #tpu.memory_space<vmem>>, %arg16: memref<1x64xf32, #tpu.memory_space<vmem>>, %arg17: memref<16x8xf32, #tpu.memory_space<vmem>>, %arg18: memref<16x8xf32, #tpu.memory_space<vmem>>, %arg19: memref<1x8xf32, #tpu.memory_space<vmem>>, %arg20: memref<8x32xf32, #tpu.memory_space<vmem>>, %arg21: memref<8x32xf32, #tpu.memory_space<vmem>>, %arg22: memref<1x32xf32, #tpu.memory_space<vmem>>, %arg23: memref<8x4xf32, #tpu.memory_space<vmem>>, %arg24: memref<8x4xf32, #tpu.memory_space<vmem>>, %arg25: memref<1x4xf32, #tpu.memory_space<vmem>>, %arg26: memref<4x16xf32, #tpu.memory_space<vmem>>, %arg27: memref<4x16xf32, #tpu.memory_space<vmem>>, %arg28: memref<1x16xf32, #tpu.memory_space<vmem>>, %arg29: memref<4x2xf32, #tpu.memory_space<vmem>>, %arg30: memref<4x2xf32, #tpu.memory_space<vmem>>, %arg31: memref<1x2xf32, #tpu.memory_space<vmem>>, %arg32: memref<2x1xf32, #tpu.memory_space<vmem>>, %arg33: memref<1x1xf32, #tpu.memory_space<vmem>>, %arg34: memref<1x1xf32, #tpu.memory_space<vmem>>, %arg35: memref<1x1xf32, #tpu.memory_space<vmem>>, %arg36: memref<2x1xf32, #tpu.memory_space<vmem>>) attributes {dimension_semantics = [], scalar_prefetch = 0 : i64, scratch_operands = 0 : i64, tpu.core_type = #tpu.core_type<tc>} {
    %c0 = arith.constant 0 : index
    %c0_0 = arith.constant 0 : index
    %0 = vector.load %arg0[%c0, %c0_0] : memref<16x16xf32, #tpu.memory_space<vmem>>, vector<16x16xf32>
    %c0_1 = arith.constant 0 : index
    %c0_2 = arith.constant 0 : index
    %1 = vector.load %arg1[%c0_1, %c0_2] : memref<64x16xf32, #tpu.memory_space<vmem>>, vector<64x16xf32>
    %c0_3 = arith.constant 0 : index
    %c0_4 = arith.constant 0 : index
    %2 = vector.load %arg2[%c0_3, %c0_4] : memref<16x64xf32, #tpu.memory_space<vmem>>, vector<16x64xf32>
    %c0_5 = arith.constant 0 : index
    %c0_6 = arith.constant 0 : index
    %3 = vector.load %arg3[%c0_5, %c0_6] : memref<16x64xf32, #tpu.memory_space<vmem>>, vector<16x64xf32>
    %cst = arith.constant dense<0.000000e+00> : vector<16x64xf32>
    %4 = tpu.matmul %0, %2, %cst {dimension_numbers = #tpu.dot_dimension_numbers<[1], [0], [0], [1], [0, 0, 1, 1], [], []>} : vector<16x16xf32>, vector<16x64xf32>, vector<16x64xf32> -> vector<16x64xf32>
    %c0_7 = arith.constant 0 : index
    %c0_8 = arith.constant 0 : index
    %5 = vector.load %arg4[%c0_7, %c0_8] : memref<1x64xf32, #tpu.memory_space<vmem>>, vector<1x64xf32>
    %6 = vector.broadcast %5 : vector<1x64xf32> to vector<16x64xf32>
    %7 = arith.addf %4, %6 : vector<16x64xf32>
    %cst_9 = arith.constant dense<0.000000e+00> : vector<64x64xf32>
    %8 = tpu.matmul %1, %7, %cst_9 {dimension_numbers = #tpu.dot_dimension_numbers<[1], [0], [0], [1], [0, 0, 1, 1], [], []>} : vector<64x16xf32>, vector<16x64xf32>, vector<64x64xf32> -> vector<64x64xf32>
    %cst_10 = arith.constant 0.000000e+00 : f32
    %9 = vector.broadcast %cst_10 : f32 to vector<16x16xf32>
    %cst_11 = arith.constant 0.000000e+00 : f32
    %10 = vector.broadcast %cst_11 : f32 to vector<16x16xf32>
    %11 = vector.extract_strided_slice %8 {offsets = [0, 0], sizes = [16, 64], strides = [1, 1]} : vector<64x64xf32> to vector<16x64xf32>
    %cst_12 = arith.constant dense<0.000000e+00> : vector<16x64xf32>
    %12 = tpu.matmul %9, %3, %cst_12 {dimension_numbers = #tpu.dot_dimension_numbers<[1], [0], [0], [1], [0, 0, 1, 1], [], []>} : vector<16x16xf32>, vector<16x64xf32>, vector<16x64xf32> -> vector<16x64xf32>
    %13 = arith.addf %11, %12 : vector<16x64xf32>
    %14 = vector.extract_strided_slice %13 {offsets = [0, 0], sizes = [16, 16], strides = [1, 1]} : vector<16x64xf32> to vector<16x16xf32>
    %15 = arith.negf %14 : vector<16x16xf32>
    %16 = math.exp %15 : vector<16x16xf32>
    %cst_13 = arith.constant 1.000000e+00 : f32
    %17 = vector.broadcast %cst_13 : f32 to vector<16x16xf32>
    %18 = arith.addf %17, %16 : vector<16x16xf32>
    %19 = arith.divf %17, %18 : vector<16x16xf32>
    %20 = vector.extract_strided_slice %13 {offsets = [0, 16], sizes = [16, 16], strides = [1, 1]} : vector<16x64xf32> to vector<16x16xf32>
    %21 = arith.negf %20 : vector<16x16xf32>
    %22 = math.exp %21 : vector<16x16xf32>
    %cst_14 = arith.constant 1.000000e+00 : f32
    %23 = vector.broadcast %cst_14 : f32 to vector<16x16xf32>
    %24 = arith.addf %23, %22 : vector<16x16xf32>
    %25 = arith.divf %23, %24 : vector<16x16xf32>
    %26 = vector.extract_strided_slice %13 {offsets = [0, 32], sizes = [16, 16], strides = [1, 1]} : vector<16x64xf32> to vector<16x16xf32>
    %27 = math.tanh %26 : vector<16x16xf32>
    %28 = vector.extract_strided_slice %13 {offsets = [0, 48], sizes = [16, 16], strides = [1, 1]} : vector<16x64xf32> to vector<16x16xf32>
    %29 = arith.negf %28 : vector<16x16xf32>
    %30 = math.exp %29 : vector<16x16xf32>
    %cst_15 = arith.constant 1.000000e+00 : f32
    %31 = vector.broadcast %cst_15 : f32 to vector<16x16xf32>
    %32 = arith.addf %31, %30 : vector<16x16xf32>
    %33 = arith.divf %31, %32 : vector<16x16xf32>
    %34 = arith.mulf %25, %10 : vector<16x16xf32>
    %35 = arith.mulf %19, %27 : vector<16x16xf32>
    %36 = arith.addf %34, %35 : vector<16x16xf32>
    %37 = math.tanh %36 : vector<16x16xf32>
    %38 = arith.mulf %33, %37 : vector<16x16xf32>
    %39 = vector.extract_strided_slice %8 {offsets = [16, 0], sizes = [16, 64], strides = [1, 1]} : vector<64x64xf32> to vector<16x64xf32>
    %cst_16 = arith.constant dense<0.000000e+00> : vector<16x64xf32>
    %40 = tpu.matmul %38, %3, %cst_16 {dimension_numbers = #tpu.dot_dimension_numbers<[1], [0], [0], [1], [0, 0, 1, 1], [], []>} : vector<16x16xf32>, vector<16x64xf32>, vector<16x64xf32> -> vector<16x64xf32>
    %41 = arith.addf %39, %40 : vector<16x64xf32>
    %42 = vector.extract_strided_slice %41 {offsets = [0, 0], sizes = [16, 16], strides = [1, 1]} : vector<16x64xf32> to vector<16x16xf32>
    %43 = arith.negf %42 : vector<16x16xf32>
    %44 = math.exp %43 : vector<16x16xf32>
    %cst_17 = arith.constant 1.000000e+00 : f32
    %45 = vector.broadcast %cst_17 : f32 to vector<16x16xf32>
    %46 = arith.addf %45, %44 : vector<16x16xf32>
    %47 = arith.divf %45, %46 : vector<16x16xf32>
    %48 = vector.extract_strided_slice %41 {offsets = [0, 16], sizes = [16, 16], strides = [1, 1]} : vector<16x64xf32> to vector<16x16xf32>
    %49 = arith.negf %48 : vector<16x16xf32>
    %50 = math.exp %49 : vector<16x16xf32>
    %cst_18 = arith.constant 1.000000e+00 : f32
    %51 = vector.broadcast %cst_18 : f32 to vector<16x16xf32>
    %52 = arith.addf %51, %50 : vector<16x16xf32>
    %53 = arith.divf %51, %52 : vector<16x16xf32>
    %54 = vector.extract_strided_slice %41 {offsets = [0, 32], sizes = [16, 16], strides = [1, 1]} : vector<16x64xf32> to vector<16x16xf32>
    %55 = math.tanh %54 : vector<16x16xf32>
    %56 = vector.extract_strided_slice %41 {offsets = [0, 48], sizes = [16, 16], strides = [1, 1]} : vector<16x64xf32> to vector<16x16xf32>
    %57 = arith.negf %56 : vector<16x16xf32>
    %58 = math.exp %57 : vector<16x16xf32>
    %cst_19 = arith.constant 1.000000e+00 : f32
    %59 = vector.broadcast %cst_19 : f32 to vector<16x16xf32>
    %60 = arith.addf %59, %58 : vector<16x16xf32>
    %61 = arith.divf %59, %60 : vector<16x16xf32>
    %62 = arith.mulf %53, %36 : vector<16x16xf32>
    %63 = arith.mulf %47, %55 : vector<16x16xf32>
    %64 = arith.addf %62, %63 : vector<16x16xf32>
    %65 = math.tanh %64 : vector<16x16xf32>
    %66 = arith.mulf %61, %65 : vector<16x16xf32>
    %67 = vector.extract_strided_slice %8 {offsets = [32, 0], sizes = [16, 64], strides = [1, 1]} : vector<64x64xf32> to vector<16x64xf32>
    %cst_20 = arith.constant dense<0.000000e+00> : vector<16x64xf32>
    %68 = tpu.matmul %66, %3, %cst_20 {dimension_numbers = #tpu.dot_dimension_numbers<[1], [0], [0], [1], [0, 0, 1, 1], [], []>} : vector<16x16xf32>, vector<16x64xf32>, vector<16x64xf32> -> vector<16x64xf32>
    %69 = arith.addf %67, %68 : vector<16x64xf32>
    %70 = vector.extract_strided_slice %69 {offsets = [0, 0], sizes = [16, 16], strides = [1, 1]} : vector<16x64xf32> to vector<16x16xf32>
    %71 = arith.negf %70 : vector<16x16xf32>
    %72 = math.exp %71 : vector<16x16xf32>
    %cst_21 = arith.constant 1.000000e+00 : f32
    %73 = vector.broadcast %cst_21 : f32 to vector<16x16xf32>
    %74 = arith.addf %73, %72 : vector<16x16xf32>
    %75 = arith.divf %73, %74 : vector<16x16xf32>
    %76 = vector.extract_strided_slice %69 {offsets = [0, 16], sizes = [16, 16], strides = [1, 1]} : vector<16x64xf32> to vector<16x16xf32>
    %77 = arith.negf %76 : vector<16x16xf32>
    %78 = math.exp %77 : vector<16x16xf32>
    %cst_22 = arith.constant 1.000000e+00 : f32
    %79 = vector.broadcast %cst_22 : f32 to vector<16x16xf32>
    %80 = arith.addf %79, %78 : vector<16x16xf32>
    %81 = arith.divf %79, %80 : vector<16x16xf32>
    %82 = vector.extract_strided_slice %69 {offsets = [0, 32], sizes = [16, 16], strides = [1, 1]} : vector<16x64xf32> to vector<16x16xf32>
    %83 = math.tanh %82 : vector<16x16xf32>
    %84 = vector.extract_strided_slice %69 {offsets = [0, 48], sizes = [16, 16], strides = [1, 1]} : vector<16x64xf32> to vector<16x16xf32>
    %85 = arith.negf %84 : vector<16x16xf32>
    %86 = math.exp %85 : vector<16x16xf32>
    %cst_23 = arith.constant 1.000000e+00 : f32
    %87 = vector.broadcast %cst_23 : f32 to vector<16x16xf32>
    %88 = arith.addf %87, %86 : vector<16x16xf32>
    %89 = arith.divf %87, %88 : vector<16x16xf32>
    %90 = arith.mulf %81, %64 : vector<16x16xf32>
    %91 = arith.mulf %75, %83 : vector<16x16xf32>
    %92 = arith.addf %90, %91 : vector<16x16xf32>
    %93 = math.tanh %92 : vector<16x16xf32>
    %94 = arith.mulf %89, %93 : vector<16x16xf32>
    %95 = vector.extract_strided_slice %8 {offsets = [48, 0], sizes = [16, 64], strides = [1, 1]} : vector<64x64xf32> to vector<16x64xf32>
    %cst_24 = arith.constant dense<0.000000e+00> : vector<16x64xf32>
    %96 = tpu.matmul %94, %3, %cst_24 {dimension_numbers = #tpu.dot_dimension_numbers<[1], [0], [0], [1], [0, 0, 1, 1], [], []>} : vector<16x16xf32>, vector<16x64xf32>, vector<16x64xf32> -> vector<16x64xf32>
    %97 = arith.addf %95, %96 : vector<16x64xf32>
    %98 = vector.extract_strided_slice %97 {offsets = [0, 0], sizes = [16, 16], strides = [1, 1]} : vector<16x64xf32> to vector<16x16xf32>
    %99 = arith.negf %98 : vector<16x16xf32>
    %100 = math.exp %99 : vector<16x16xf32>
    %cst_25 = arith.constant 1.000000e+00 : f32
    %101 = vector.broadcast %cst_25 : f32 to vector<16x16xf32>
    %102 = arith.addf %101, %100 : vector<16x16xf32>
    %103 = arith.divf %101, %102 : vector<16x16xf32>
    %104 = vector.extract_strided_slice %97 {offsets = [0, 16], sizes = [16, 16], strides = [1, 1]} : vector<16x64xf32> to vector<16x16xf32>
    %105 = arith.negf %104 : vector<16x16xf32>
    %106 = math.exp %105 : vector<16x16xf32>
    %cst_26 = arith.constant 1.000000e+00 : f32
    %107 = vector.broadcast %cst_26 : f32 to vector<16x16xf32>
    %108 = arith.addf %107, %106 : vector<16x16xf32>
    %109 = arith.divf %107, %108 : vector<16x16xf32>
    %110 = vector.extract_strided_slice %97 {offsets = [0, 32], sizes = [16, 16], strides = [1, 1]} : vector<16x64xf32> to vector<16x16xf32>
    %111 = math.tanh %110 : vector<16x16xf32>
    %112 = vector.extract_strided_slice %97 {offsets = [0, 48], sizes = [16, 16], strides = [1, 1]} : vector<16x64xf32> to vector<16x16xf32>
    %113 = arith.negf %112 : vector<16x16xf32>
    %114 = math.exp %113 : vector<16x16xf32>
    %cst_27 = arith.constant 1.000000e+00 : f32
    %115 = vector.broadcast %cst_27 : f32 to vector<16x16xf32>
    %116 = arith.addf %115, %114 : vector<16x16xf32>
    %117 = arith.divf %115, %116 : vector<16x16xf32>
    %118 = arith.mulf %109, %92 : vector<16x16xf32>
    %119 = arith.mulf %103, %111 : vector<16x16xf32>
    %120 = arith.addf %118, %119 : vector<16x16xf32>
    %121 = math.tanh %120 : vector<16x16xf32>
    %122 = arith.mulf %117, %121 : vector<16x16xf32>
    %c0_28 = arith.constant 0 : index
    %c0_29 = arith.constant 0 : index
    %123 = vector.load %arg5[%c0_28, %c0_29] : memref<16x32xf32, #tpu.memory_space<vmem>>, vector<16x32xf32>
    %cst_30 = arith.constant dense<0.000000e+00> : vector<16x32xf32>
    %124 = tpu.matmul %0, %123, %cst_30 {dimension_numbers = #tpu.dot_dimension_numbers<[1], [0], [0], [1], [0, 0, 1, 1], [], []>} : vector<16x16xf32>, vector<16x32xf32>, vector<16x32xf32> -> vector<16x32xf32>
    %c0_31 = arith.constant 0 : index
    %c0_32 = arith.constant 0 : index
    %125 = vector.load %arg6[%c0_31, %c0_32] : memref<16x32xf32, #tpu.memory_space<vmem>>, vector<16x32xf32>
    %cst_33 = arith.constant dense<0.000000e+00> : vector<16x32xf32>
    %126 = tpu.matmul %122, %125, %cst_33 {dimension_numbers = #tpu.dot_dimension_numbers<[1], [0], [0], [1], [0, 0, 1, 1], [], []>} : vector<16x16xf32>, vector<16x32xf32>, vector<16x32xf32> -> vector<16x32xf32>
    %127 = arith.addf %124, %126 : vector<16x32xf32>
    %c0_34 = arith.constant 0 : index
    %c0_35 = arith.constant 0 : index
    %128 = vector.load %arg7[%c0_34, %c0_35] : memref<1x32xf32, #tpu.memory_space<vmem>>, vector<1x32xf32>
    %129 = vector.broadcast %128 : vector<1x32xf32> to vector<16x32xf32>
    %130 = arith.addf %127, %129 : vector<16x32xf32>
    %cst_36 = arith.constant 0.000000e+00 : f32
    %131 = vector.broadcast %cst_36 : f32 to vector<16x32xf32>
    %132 = arith.maximumf %130, %131 : vector<16x32xf32>
    %c0_37 = arith.constant 0 : index
    %c0_38 = arith.constant 0 : index
    %133 = vector.load %arg8[%c0_37, %c0_38] : memref<32x128xf32, #tpu.memory_space<vmem>>, vector<32x128xf32>
    %c0_39 = arith.constant 0 : index
    %c0_40 = arith.constant 0 : index
    %134 = vector.load %arg9[%c0_39, %c0_40] : memref<32x128xf32, #tpu.memory_space<vmem>>, vector<32x128xf32>
    %cst_41 = arith.constant dense<0.000000e+00> : vector<16x128xf32>
    %135 = tpu.matmul %132, %133, %cst_41 {dimension_numbers = #tpu.dot_dimension_numbers<[1], [0], [0], [1], [0, 0, 1, 1], [], []>} : vector<16x32xf32>, vector<32x128xf32>, vector<16x128xf32> -> vector<16x128xf32>
    %c0_42 = arith.constant 0 : index
    %c0_43 = arith.constant 0 : index
    %136 = vector.load %arg10[%c0_42, %c0_43] : memref<1x128xf32, #tpu.memory_space<vmem>>, vector<1x128xf32>
    %137 = vector.broadcast %136 : vector<1x128xf32> to vector<16x128xf32>
    %138 = arith.addf %135, %137 : vector<16x128xf32>
    %cst_44 = arith.constant dense<0.000000e+00> : vector<64x128xf32>
    %139 = tpu.matmul %1, %138, %cst_44 {dimension_numbers = #tpu.dot_dimension_numbers<[1], [0], [0], [1], [0, 0, 1, 1], [], []>} : vector<64x16xf32>, vector<16x128xf32>, vector<64x128xf32> -> vector<64x128xf32>
    %cst_45 = arith.constant 0.000000e+00 : f32
    %140 = vector.broadcast %cst_45 : f32 to vector<16x32xf32>
    %cst_46 = arith.constant 0.000000e+00 : f32
    %141 = vector.broadcast %cst_46 : f32 to vector<16x32xf32>
    %142 = vector.extract_strided_slice %139 {offsets = [0, 0], sizes = [16, 128], strides = [1, 1]} : vector<64x128xf32> to vector<16x128xf32>
    %cst_47 = arith.constant dense<0.000000e+00> : vector<16x128xf32>
    %143 = tpu.matmul %140, %134, %cst_47 {dimension_numbers = #tpu.dot_dimension_numbers<[1], [0], [0], [1], [0, 0, 1, 1], [], []>} : vector<16x32xf32>, vector<32x128xf32>, vector<16x128xf32> -> vector<16x128xf32>
    %144 = arith.addf %142, %143 : vector<16x128xf32>
    %145 = vector.extract_strided_slice %144 {offsets = [0, 0], sizes = [16, 32], strides = [1, 1]} : vector<16x128xf32> to vector<16x32xf32>
    %146 = arith.negf %145 : vector<16x32xf32>
    %147 = math.exp %146 : vector<16x32xf32>
    %cst_48 = arith.constant 1.000000e+00 : f32
    %148 = vector.broadcast %cst_48 : f32 to vector<16x32xf32>
    %149 = arith.addf %148, %147 : vector<16x32xf32>
    %150 = arith.divf %148, %149 : vector<16x32xf32>
    %151 = vector.extract_strided_slice %144 {offsets = [0, 32], sizes = [16, 32], strides = [1, 1]} : vector<16x128xf32> to vector<16x32xf32>
    %152 = arith.negf %151 : vector<16x32xf32>
    %153 = math.exp %152 : vector<16x32xf32>
    %cst_49 = arith.constant 1.000000e+00 : f32
    %154 = vector.broadcast %cst_49 : f32 to vector<16x32xf32>
    %155 = arith.addf %154, %153 : vector<16x32xf32>
    %156 = arith.divf %154, %155 : vector<16x32xf32>
    %157 = vector.extract_strided_slice %144 {offsets = [0, 64], sizes = [16, 32], strides = [1, 1]} : vector<16x128xf32> to vector<16x32xf32>
    %158 = math.tanh %157 : vector<16x32xf32>
    %159 = vector.extract_strided_slice %144 {offsets = [0, 96], sizes = [16, 32], strides = [1, 1]} : vector<16x128xf32> to vector<16x32xf32>
    %160 = arith.negf %159 : vector<16x32xf32>
    %161 = math.exp %160 : vector<16x32xf32>
    %cst_50 = arith.constant 1.000000e+00 : f32
    %162 = vector.broadcast %cst_50 : f32 to vector<16x32xf32>
    %163 = arith.addf %162, %161 : vector<16x32xf32>
    %164 = arith.divf %162, %163 : vector<16x32xf32>
    %165 = arith.mulf %156, %141 : vector<16x32xf32>
    %166 = arith.mulf %150, %158 : vector<16x32xf32>
    %167 = arith.addf %165, %166 : vector<16x32xf32>
    %168 = math.tanh %167 : vector<16x32xf32>
    %169 = arith.mulf %164, %168 : vector<16x32xf32>
    %170 = vector.extract_strided_slice %139 {offsets = [16, 0], sizes = [16, 128], strides = [1, 1]} : vector<64x128xf32> to vector<16x128xf32>
    %cst_51 = arith.constant dense<0.000000e+00> : vector<16x128xf32>
    %171 = tpu.matmul %169, %134, %cst_51 {dimension_numbers = #tpu.dot_dimension_numbers<[1], [0], [0], [1], [0, 0, 1, 1], [], []>} : vector<16x32xf32>, vector<32x128xf32>, vector<16x128xf32> -> vector<16x128xf32>
    %172 = arith.addf %170, %171 : vector<16x128xf32>
    %173 = vector.extract_strided_slice %172 {offsets = [0, 0], sizes = [16, 32], strides = [1, 1]} : vector<16x128xf32> to vector<16x32xf32>
    %174 = arith.negf %173 : vector<16x32xf32>
    %175 = math.exp %174 : vector<16x32xf32>
    %cst_52 = arith.constant 1.000000e+00 : f32
    %176 = vector.broadcast %cst_52 : f32 to vector<16x32xf32>
    %177 = arith.addf %176, %175 : vector<16x32xf32>
    %178 = arith.divf %176, %177 : vector<16x32xf32>
    %179 = vector.extract_strided_slice %172 {offsets = [0, 32], sizes = [16, 32], strides = [1, 1]} : vector<16x128xf32> to vector<16x32xf32>
    %180 = arith.negf %179 : vector<16x32xf32>
    %181 = math.exp %180 : vector<16x32xf32>
    %cst_53 = arith.constant 1.000000e+00 : f32
    %182 = vector.broadcast %cst_53 : f32 to vector<16x32xf32>
    %183 = arith.addf %182, %181 : vector<16x32xf32>
    %184 = arith.divf %182, %183 : vector<16x32xf32>
    %185 = vector.extract_strided_slice %172 {offsets = [0, 64], sizes = [16, 32], strides = [1, 1]} : vector<16x128xf32> to vector<16x32xf32>
    %186 = math.tanh %185 : vector<16x32xf32>
    %187 = vector.extract_strided_slice %172 {offsets = [0, 96], sizes = [16, 32], strides = [1, 1]} : vector<16x128xf32> to vector<16x32xf32>
    %188 = arith.negf %187 : vector<16x32xf32>
    %189 = math.exp %188 : vector<16x32xf32>
    %cst_54 = arith.constant 1.000000e+00 : f32
    %190 = vector.broadcast %cst_54 : f32 to vector<16x32xf32>
    %191 = arith.addf %190, %189 : vector<16x32xf32>
    %192 = arith.divf %190, %191 : vector<16x32xf32>
    %193 = arith.mulf %184, %167 : vector<16x32xf32>
    %194 = arith.mulf %178, %186 : vector<16x32xf32>
    %195 = arith.addf %193, %194 : vector<16x32xf32>
    %196 = math.tanh %195 : vector<16x32xf32>
    %197 = arith.mulf %192, %196 : vector<16x32xf32>
    %198 = vector.extract_strided_slice %139 {offsets = [32, 0], sizes = [16, 128], strides = [1, 1]} : vector<64x128xf32> to vector<16x128xf32>
    %cst_55 = arith.constant dense<0.000000e+00> : vector<16x128xf32>
    %199 = tpu.matmul %197, %134, %cst_55 {dimension_numbers = #tpu.dot_dimension_numbers<[1], [0], [0], [1], [0, 0, 1, 1], [], []>} : vector<16x32xf32>, vector<32x128xf32>, vector<16x128xf32> -> vector<16x128xf32>
    %200 = arith.addf %198, %199 : vector<16x128xf32>
    %201 = vector.extract_strided_slice %200 {offsets = [0, 0], sizes = [16, 32], strides = [1, 1]} : vector<16x128xf32> to vector<16x32xf32>
    %202 = arith.negf %201 : vector<16x32xf32>
    %203 = math.exp %202 : vector<16x32xf32>
    %cst_56 = arith.constant 1.000000e+00 : f32
    %204 = vector.broadcast %cst_56 : f32 to vector<16x32xf32>
    %205 = arith.addf %204, %203 : vector<16x32xf32>
    %206 = arith.divf %204, %205 : vector<16x32xf32>
    %207 = vector.extract_strided_slice %200 {offsets = [0, 32], sizes = [16, 32], strides = [1, 1]} : vector<16x128xf32> to vector<16x32xf32>
    %208 = arith.negf %207 : vector<16x32xf32>
    %209 = math.exp %208 : vector<16x32xf32>
    %cst_57 = arith.constant 1.000000e+00 : f32
    %210 = vector.broadcast %cst_57 : f32 to vector<16x32xf32>
    %211 = arith.addf %210, %209 : vector<16x32xf32>
    %212 = arith.divf %210, %211 : vector<16x32xf32>
    %213 = vector.extract_strided_slice %200 {offsets = [0, 64], sizes = [16, 32], strides = [1, 1]} : vector<16x128xf32> to vector<16x32xf32>
    %214 = math.tanh %213 : vector<16x32xf32>
    %215 = vector.extract_strided_slice %200 {offsets = [0, 96], sizes = [16, 32], strides = [1, 1]} : vector<16x128xf32> to vector<16x32xf32>
    %216 = arith.negf %215 : vector<16x32xf32>
    %217 = math.exp %216 : vector<16x32xf32>
    %cst_58 = arith.constant 1.000000e+00 : f32
    %218 = vector.broadcast %cst_58 : f32 to vector<16x32xf32>
    %219 = arith.addf %218, %217 : vector<16x32xf32>
    %220 = arith.divf %218, %219 : vector<16x32xf32>
    %221 = arith.mulf %212, %195 : vector<16x32xf32>
    %222 = arith.mulf %206, %214 : vector<16x32xf32>
    %223 = arith.addf %221, %222 : vector<16x32xf32>
    %224 = math.tanh %223 : vector<16x32xf32>
    %225 = arith.mulf %220, %224 : vector<16x32xf32>
    %226 = vector.extract_strided_slice %139 {offsets = [48, 0], sizes = [16, 128], strides = [1, 1]} : vector<64x128xf32> to vector<16x128xf32>
    %cst_59 = arith.constant dense<0.000000e+00> : vector<16x128xf32>
    %227 = tpu.matmul %225, %134, %cst_59 {dimension_numbers = #tpu.dot_dimension_numbers<[1], [0], [0], [1], [0, 0, 1, 1], [], []>} : vector<16x32xf32>, vector<32x128xf32>, vector<16x128xf32> -> vector<16x128xf32>
    %228 = arith.addf %226, %227 : vector<16x128xf32>
    %229 = vector.extract_strided_slice %228 {offsets = [0, 0], sizes = [16, 32], strides = [1, 1]} : vector<16x128xf32> to vector<16x32xf32>
    %230 = arith.negf %229 : vector<16x32xf32>
    %231 = math.exp %230 : vector<16x32xf32>
    %cst_60 = arith.constant 1.000000e+00 : f32
    %232 = vector.broadcast %cst_60 : f32 to vector<16x32xf32>
    %233 = arith.addf %232, %231 : vector<16x32xf32>
    %234 = arith.divf %232, %233 : vector<16x32xf32>
    %235 = vector.extract_strided_slice %228 {offsets = [0, 32], sizes = [16, 32], strides = [1, 1]} : vector<16x128xf32> to vector<16x32xf32>
    %236 = arith.negf %235 : vector<16x32xf32>
    %237 = math.exp %236 : vector<16x32xf32>
    %cst_61 = arith.constant 1.000000e+00 : f32
    %238 = vector.broadcast %cst_61 : f32 to vector<16x32xf32>
    %239 = arith.addf %238, %237 : vector<16x32xf32>
    %240 = arith.divf %238, %239 : vector<16x32xf32>
    %241 = vector.extract_strided_slice %228 {offsets = [0, 64], sizes = [16, 32], strides = [1, 1]} : vector<16x128xf32> to vector<16x32xf32>
    %242 = math.tanh %241 : vector<16x32xf32>
    %243 = vector.extract_strided_slice %228 {offsets = [0, 96], sizes = [16, 32], strides = [1, 1]} : vector<16x128xf32> to vector<16x32xf32>
    %244 = arith.negf %243 : vector<16x32xf32>
    %245 = math.exp %244 : vector<16x32xf32>
    %cst_62 = arith.constant 1.000000e+00 : f32
    %246 = vector.broadcast %cst_62 : f32 to vector<16x32xf32>
    %247 = arith.addf %246, %245 : vector<16x32xf32>
    %248 = arith.divf %246, %247 : vector<16x32xf32>
    %249 = arith.mulf %240, %223 : vector<16x32xf32>
    %250 = arith.mulf %234, %242 : vector<16x32xf32>
    %251 = arith.addf %249, %250 : vector<16x32xf32>
    %252 = math.tanh %251 : vector<16x32xf32>
    %253 = arith.mulf %248, %252 : vector<16x32xf32>
    %c0_63 = arith.constant 0 : index
    %c0_64 = arith.constant 0 : index
    %254 = vector.load %arg11[%c0_63, %c0_64] : memref<32x16xf32, #tpu.memory_space<vmem>>, vector<32x16xf32>
    %cst_65 = arith.constant dense<0.000000e+00> : vector<16x16xf32>
    %255 = tpu.matmul %132, %254, %cst_65 {dimension_numbers = #tpu.dot_dimension_numbers<[1], [0], [0], [1], [0, 0, 1, 1], [], []>} : vector<16x32xf32>, vector<32x16xf32>, vector<16x16xf32> -> vector<16x16xf32>
    %c0_66 = arith.constant 0 : index
    %c0_67 = arith.constant 0 : index
    %256 = vector.load %arg12[%c0_66, %c0_67] : memref<32x16xf32, #tpu.memory_space<vmem>>, vector<32x16xf32>
    %cst_68 = arith.constant dense<0.000000e+00> : vector<16x16xf32>
    %257 = tpu.matmul %253, %256, %cst_68 {dimension_numbers = #tpu.dot_dimension_numbers<[1], [0], [0], [1], [0, 0, 1, 1], [], []>} : vector<16x32xf32>, vector<32x16xf32>, vector<16x16xf32> -> vector<16x16xf32>
    %258 = arith.addf %255, %257 : vector<16x16xf32>
    %c0_69 = arith.constant 0 : index
    %c0_70 = arith.constant 0 : index
    %259 = vector.load %arg13[%c0_69, %c0_70] : memref<1x16xf32, #tpu.memory_space<vmem>>, vector<1x16xf32>
    %260 = vector.broadcast %259 : vector<1x16xf32> to vector<16x16xf32>
    %261 = arith.addf %258, %260 : vector<16x16xf32>
    %cst_71 = arith.constant 0.000000e+00 : f32
    %262 = vector.broadcast %cst_71 : f32 to vector<16x16xf32>
    %263 = arith.maximumf %261, %262 : vector<16x16xf32>
    %c0_72 = arith.constant 0 : index
    %c0_73 = arith.constant 0 : index
    %264 = vector.load %arg14[%c0_72, %c0_73] : memref<16x64xf32, #tpu.memory_space<vmem>>, vector<16x64xf32>
    %c0_74 = arith.constant 0 : index
    %c0_75 = arith.constant 0 : index
    %265 = vector.load %arg15[%c0_74, %c0_75] : memref<16x64xf32, #tpu.memory_space<vmem>>, vector<16x64xf32>
    %cst_76 = arith.constant dense<0.000000e+00> : vector<16x64xf32>
    %266 = tpu.matmul %263, %264, %cst_76 {dimension_numbers = #tpu.dot_dimension_numbers<[1], [0], [0], [1], [0, 0, 1, 1], [], []>} : vector<16x16xf32>, vector<16x64xf32>, vector<16x64xf32> -> vector<16x64xf32>
    %c0_77 = arith.constant 0 : index
    %c0_78 = arith.constant 0 : index
    %267 = vector.load %arg16[%c0_77, %c0_78] : memref<1x64xf32, #tpu.memory_space<vmem>>, vector<1x64xf32>
    %268 = vector.broadcast %267 : vector<1x64xf32> to vector<16x64xf32>
    %269 = arith.addf %266, %268 : vector<16x64xf32>
    %cst_79 = arith.constant dense<0.000000e+00> : vector<64x64xf32>
    %270 = tpu.matmul %1, %269, %cst_79 {dimension_numbers = #tpu.dot_dimension_numbers<[1], [0], [0], [1], [0, 0, 1, 1], [], []>} : vector<64x16xf32>, vector<16x64xf32>, vector<64x64xf32> -> vector<64x64xf32>
    %cst_80 = arith.constant 0.000000e+00 : f32
    %271 = vector.broadcast %cst_80 : f32 to vector<16x16xf32>
    %cst_81 = arith.constant 0.000000e+00 : f32
    %272 = vector.broadcast %cst_81 : f32 to vector<16x16xf32>
    %273 = vector.extract_strided_slice %270 {offsets = [0, 0], sizes = [16, 64], strides = [1, 1]} : vector<64x64xf32> to vector<16x64xf32>
    %cst_82 = arith.constant dense<0.000000e+00> : vector<16x64xf32>
    %274 = tpu.matmul %271, %265, %cst_82 {dimension_numbers = #tpu.dot_dimension_numbers<[1], [0], [0], [1], [0, 0, 1, 1], [], []>} : vector<16x16xf32>, vector<16x64xf32>, vector<16x64xf32> -> vector<16x64xf32>
    %275 = arith.addf %273, %274 : vector<16x64xf32>
    %276 = vector.extract_strided_slice %275 {offsets = [0, 0], sizes = [16, 16], strides = [1, 1]} : vector<16x64xf32> to vector<16x16xf32>
    %277 = arith.negf %276 : vector<16x16xf32>
    %278 = math.exp %277 : vector<16x16xf32>
    %cst_83 = arith.constant 1.000000e+00 : f32
    %279 = vector.broadcast %cst_83 : f32 to vector<16x16xf32>
    %280 = arith.addf %279, %278 : vector<16x16xf32>
    %281 = arith.divf %279, %280 : vector<16x16xf32>
    %282 = vector.extract_strided_slice %275 {offsets = [0, 16], sizes = [16, 16], strides = [1, 1]} : vector<16x64xf32> to vector<16x16xf32>
    %283 = arith.negf %282 : vector<16x16xf32>
    %284 = math.exp %283 : vector<16x16xf32>
    %cst_84 = arith.constant 1.000000e+00 : f32
    %285 = vector.broadcast %cst_84 : f32 to vector<16x16xf32>
    %286 = arith.addf %285, %284 : vector<16x16xf32>
    %287 = arith.divf %285, %286 : vector<16x16xf32>
    %288 = vector.extract_strided_slice %275 {offsets = [0, 32], sizes = [16, 16], strides = [1, 1]} : vector<16x64xf32> to vector<16x16xf32>
    %289 = math.tanh %288 : vector<16x16xf32>
    %290 = vector.extract_strided_slice %275 {offsets = [0, 48], sizes = [16, 16], strides = [1, 1]} : vector<16x64xf32> to vector<16x16xf32>
    %291 = arith.negf %290 : vector<16x16xf32>
    %292 = math.exp %291 : vector<16x16xf32>
    %cst_85 = arith.constant 1.000000e+00 : f32
    %293 = vector.broadcast %cst_85 : f32 to vector<16x16xf32>
    %294 = arith.addf %293, %292 : vector<16x16xf32>
    %295 = arith.divf %293, %294 : vector<16x16xf32>
    %296 = arith.mulf %287, %272 : vector<16x16xf32>
    %297 = arith.mulf %281, %289 : vector<16x16xf32>
    %298 = arith.addf %296, %297 : vector<16x16xf32>
    %299 = math.tanh %298 : vector<16x16xf32>
    %300 = arith.mulf %295, %299 : vector<16x16xf32>
    %301 = vector.extract_strided_slice %270 {offsets = [16, 0], sizes = [16, 64], strides = [1, 1]} : vector<64x64xf32> to vector<16x64xf32>
    %cst_86 = arith.constant dense<0.000000e+00> : vector<16x64xf32>
    %302 = tpu.matmul %300, %265, %cst_86 {dimension_numbers = #tpu.dot_dimension_numbers<[1], [0], [0], [1], [0, 0, 1, 1], [], []>} : vector<16x16xf32>, vector<16x64xf32>, vector<16x64xf32> -> vector<16x64xf32>
    %303 = arith.addf %301, %302 : vector<16x64xf32>
    %304 = vector.extract_strided_slice %303 {offsets = [0, 0], sizes = [16, 16], strides = [1, 1]} : vector<16x64xf32> to vector<16x16xf32>
    %305 = arith.negf %304 : vector<16x16xf32>
    %306 = math.exp %305 : vector<16x16xf32>
    %cst_87 = arith.constant 1.000000e+00 : f32
    %307 = vector.broadcast %cst_87 : f32 to vector<16x16xf32>
    %308 = arith.addf %307, %306 : vector<16x16xf32>
    %309 = arith.divf %307, %308 : vector<16x16xf32>
    %310 = vector.extract_strided_slice %303 {offsets = [0, 16], sizes = [16, 16], strides = [1, 1]} : vector<16x64xf32> to vector<16x16xf32>
    %311 = arith.negf %310 : vector<16x16xf32>
    %312 = math.exp %311 : vector<16x16xf32>
    %cst_88 = arith.constant 1.000000e+00 : f32
    %313 = vector.broadcast %cst_88 : f32 to vector<16x16xf32>
    %314 = arith.addf %313, %312 : vector<16x16xf32>
    %315 = arith.divf %313, %314 : vector<16x16xf32>
    %316 = vector.extract_strided_slice %303 {offsets = [0, 32], sizes = [16, 16], strides = [1, 1]} : vector<16x64xf32> to vector<16x16xf32>
    %317 = math.tanh %316 : vector<16x16xf32>
    %318 = vector.extract_strided_slice %303 {offsets = [0, 48], sizes = [16, 16], strides = [1, 1]} : vector<16x64xf32> to vector<16x16xf32>
    %319 = arith.negf %318 : vector<16x16xf32>
    %320 = math.exp %319 : vector<16x16xf32>
    %cst_89 = arith.constant 1.000000e+00 : f32
    %321 = vector.broadcast %cst_89 : f32 to vector<16x16xf32>
    %322 = arith.addf %321, %320 : vector<16x16xf32>
    %323 = arith.divf %321, %322 : vector<16x16xf32>
    %324 = arith.mulf %315, %298 : vector<16x16xf32>
    %325 = arith.mulf %309, %317 : vector<16x16xf32>
    %326 = arith.addf %324, %325 : vector<16x16xf32>
    %327 = math.tanh %326 : vector<16x16xf32>
    %328 = arith.mulf %323, %327 : vector<16x16xf32>
    %329 = vector.extract_strided_slice %270 {offsets = [32, 0], sizes = [16, 64], strides = [1, 1]} : vector<64x64xf32> to vector<16x64xf32>
    %cst_90 = arith.constant dense<0.000000e+00> : vector<16x64xf32>
    %330 = tpu.matmul %328, %265, %cst_90 {dimension_numbers = #tpu.dot_dimension_numbers<[1], [0], [0], [1], [0, 0, 1, 1], [], []>} : vector<16x16xf32>, vector<16x64xf32>, vector<16x64xf32> -> vector<16x64xf32>
    %331 = arith.addf %329, %330 : vector<16x64xf32>
    %332 = vector.extract_strided_slice %331 {offsets = [0, 0], sizes = [16, 16], strides = [1, 1]} : vector<16x64xf32> to vector<16x16xf32>
    %333 = arith.negf %332 : vector<16x16xf32>
    %334 = math.exp %333 : vector<16x16xf32>
    %cst_91 = arith.constant 1.000000e+00 : f32
    %335 = vector.broadcast %cst_91 : f32 to vector<16x16xf32>
    %336 = arith.addf %335, %334 : vector<16x16xf32>
    %337 = arith.divf %335, %336 : vector<16x16xf32>
    %338 = vector.extract_strided_slice %331 {offsets = [0, 16], sizes = [16, 16], strides = [1, 1]} : vector<16x64xf32> to vector<16x16xf32>
    %339 = arith.negf %338 : vector<16x16xf32>
    %340 = math.exp %339 : vector<16x16xf32>
    %cst_92 = arith.constant 1.000000e+00 : f32
    %341 = vector.broadcast %cst_92 : f32 to vector<16x16xf32>
    %342 = arith.addf %341, %340 : vector<16x16xf32>
    %343 = arith.divf %341, %342 : vector<16x16xf32>
    %344 = vector.extract_strided_slice %331 {offsets = [0, 32], sizes = [16, 16], strides = [1, 1]} : vector<16x64xf32> to vector<16x16xf32>
    %345 = math.tanh %344 : vector<16x16xf32>
    %346 = vector.extract_strided_slice %331 {offsets = [0, 48], sizes = [16, 16], strides = [1, 1]} : vector<16x64xf32> to vector<16x16xf32>
    %347 = arith.negf %346 : vector<16x16xf32>
    %348 = math.exp %347 : vector<16x16xf32>
    %cst_93 = arith.constant 1.000000e+00 : f32
    %349 = vector.broadcast %cst_93 : f32 to vector<16x16xf32>
    %350 = arith.addf %349, %348 : vector<16x16xf32>
    %351 = arith.divf %349, %350 : vector<16x16xf32>
    %352 = arith.mulf %343, %326 : vector<16x16xf32>
    %353 = arith.mulf %337, %345 : vector<16x16xf32>
    %354 = arith.addf %352, %353 : vector<16x16xf32>
    %355 = math.tanh %354 : vector<16x16xf32>
    %356 = arith.mulf %351, %355 : vector<16x16xf32>
    %357 = vector.extract_strided_slice %270 {offsets = [48, 0], sizes = [16, 64], strides = [1, 1]} : vector<64x64xf32> to vector<16x64xf32>
    %cst_94 = arith.constant dense<0.000000e+00> : vector<16x64xf32>
    %358 = tpu.matmul %356, %265, %cst_94 {dimension_numbers = #tpu.dot_dimension_numbers<[1], [0], [0], [1], [0, 0, 1, 1], [], []>} : vector<16x16xf32>, vector<16x64xf32>, vector<16x64xf32> -> vector<16x64xf32>
    %359 = arith.addf %357, %358 : vector<16x64xf32>
    %360 = vector.extract_strided_slice %359 {offsets = [0, 0], sizes = [16, 16], strides = [1, 1]} : vector<16x64xf32> to vector<16x16xf32>
    %361 = arith.negf %360 : vector<16x16xf32>
    %362 = math.exp %361 : vector<16x16xf32>
    %cst_95 = arith.constant 1.000000e+00 : f32
    %363 = vector.broadcast %cst_95 : f32 to vector<16x16xf32>
    %364 = arith.addf %363, %362 : vector<16x16xf32>
    %365 = arith.divf %363, %364 : vector<16x16xf32>
    %366 = vector.extract_strided_slice %359 {offsets = [0, 16], sizes = [16, 16], strides = [1, 1]} : vector<16x64xf32> to vector<16x16xf32>
    %367 = arith.negf %366 : vector<16x16xf32>
    %368 = math.exp %367 : vector<16x16xf32>
    %cst_96 = arith.constant 1.000000e+00 : f32
    %369 = vector.broadcast %cst_96 : f32 to vector<16x16xf32>
    %370 = arith.addf %369, %368 : vector<16x16xf32>
    %371 = arith.divf %369, %370 : vector<16x16xf32>
    %372 = vector.extract_strided_slice %359 {offsets = [0, 32], sizes = [16, 16], strides = [1, 1]} : vector<16x64xf32> to vector<16x16xf32>
    %373 = math.tanh %372 : vector<16x16xf32>
    %374 = vector.extract_strided_slice %359 {offsets = [0, 48], sizes = [16, 16], strides = [1, 1]} : vector<16x64xf32> to vector<16x16xf32>
    %375 = arith.negf %374 : vector<16x16xf32>
    %376 = math.exp %375 : vector<16x16xf32>
    %cst_97 = arith.constant 1.000000e+00 : f32
    %377 = vector.broadcast %cst_97 : f32 to vector<16x16xf32>
    %378 = arith.addf %377, %376 : vector<16x16xf32>
    %379 = arith.divf %377, %378 : vector<16x16xf32>
    %380 = arith.mulf %371, %354 : vector<16x16xf32>
    %381 = arith.mulf %365, %373 : vector<16x16xf32>
    %382 = arith.addf %380, %381 : vector<16x16xf32>
    %383 = math.tanh %382 : vector<16x16xf32>
    %384 = arith.mulf %379, %383 : vector<16x16xf32>
    %c0_98 = arith.constant 0 : index
    %c0_99 = arith.constant 0 : index
    %385 = vector.load %arg17[%c0_98, %c0_99] : memref<16x8xf32, #tpu.memory_space<vmem>>, vector<16x8xf32>
    %cst_100 = arith.constant dense<0.000000e+00> : vector<16x8xf32>
    %386 = tpu.matmul %263, %385, %cst_100 {dimension_numbers = #tpu.dot_dimension_numbers<[1], [0], [0], [1], [0, 0, 1, 1], [], []>} : vector<16x16xf32>, vector<16x8xf32>, vector<16x8xf32> -> vector<16x8xf32>
    %c0_101 = arith.constant 0 : index
    %c0_102 = arith.constant 0 : index
    %387 = vector.load %arg18[%c0_101, %c0_102] : memref<16x8xf32, #tpu.memory_space<vmem>>, vector<16x8xf32>
    %cst_103 = arith.constant dense<0.000000e+00> : vector<16x8xf32>
    %388 = tpu.matmul %384, %387, %cst_103 {dimension_numbers = #tpu.dot_dimension_numbers<[1], [0], [0], [1], [0, 0, 1, 1], [], []>} : vector<16x16xf32>, vector<16x8xf32>, vector<16x8xf32> -> vector<16x8xf32>
    %389 = arith.addf %386, %388 : vector<16x8xf32>
    %c0_104 = arith.constant 0 : index
    %c0_105 = arith.constant 0 : index
    %390 = vector.load %arg19[%c0_104, %c0_105] : memref<1x8xf32, #tpu.memory_space<vmem>>, vector<1x8xf32>
    %391 = vector.broadcast %390 : vector<1x8xf32> to vector<16x8xf32>
    %392 = arith.addf %389, %391 : vector<16x8xf32>
    %cst_106 = arith.constant 0.000000e+00 : f32
    %393 = vector.broadcast %cst_106 : f32 to vector<16x8xf32>
    %394 = arith.maximumf %392, %393 : vector<16x8xf32>
    %c0_107 = arith.constant 0 : index
    %c0_108 = arith.constant 0 : index
    %395 = vector.load %arg20[%c0_107, %c0_108] : memref<8x32xf32, #tpu.memory_space<vmem>>, vector<8x32xf32>
    %c0_109 = arith.constant 0 : index
    %c0_110 = arith.constant 0 : index
    %396 = vector.load %arg21[%c0_109, %c0_110] : memref<8x32xf32, #tpu.memory_space<vmem>>, vector<8x32xf32>
    %cst_111 = arith.constant dense<0.000000e+00> : vector<16x32xf32>
    %397 = tpu.matmul %394, %395, %cst_111 {dimension_numbers = #tpu.dot_dimension_numbers<[1], [0], [0], [1], [0, 0, 1, 1], [], []>} : vector<16x8xf32>, vector<8x32xf32>, vector<16x32xf32> -> vector<16x32xf32>
    %c0_112 = arith.constant 0 : index
    %c0_113 = arith.constant 0 : index
    %398 = vector.load %arg22[%c0_112, %c0_113] : memref<1x32xf32, #tpu.memory_space<vmem>>, vector<1x32xf32>
    %399 = vector.broadcast %398 : vector<1x32xf32> to vector<16x32xf32>
    %400 = arith.addf %397, %399 : vector<16x32xf32>
    %cst_114 = arith.constant dense<0.000000e+00> : vector<64x32xf32>
    %401 = tpu.matmul %1, %400, %cst_114 {dimension_numbers = #tpu.dot_dimension_numbers<[1], [0], [0], [1], [0, 0, 1, 1], [], []>} : vector<64x16xf32>, vector<16x32xf32>, vector<64x32xf32> -> vector<64x32xf32>
    %cst_115 = arith.constant 0.000000e+00 : f32
    %402 = vector.broadcast %cst_115 : f32 to vector<16x8xf32>
    %cst_116 = arith.constant 0.000000e+00 : f32
    %403 = vector.broadcast %cst_116 : f32 to vector<16x8xf32>
    %404 = vector.extract_strided_slice %401 {offsets = [0, 0], sizes = [16, 32], strides = [1, 1]} : vector<64x32xf32> to vector<16x32xf32>
    %cst_117 = arith.constant dense<0.000000e+00> : vector<16x32xf32>
    %405 = tpu.matmul %402, %396, %cst_117 {dimension_numbers = #tpu.dot_dimension_numbers<[1], [0], [0], [1], [0, 0, 1, 1], [], []>} : vector<16x8xf32>, vector<8x32xf32>, vector<16x32xf32> -> vector<16x32xf32>
    %406 = arith.addf %404, %405 : vector<16x32xf32>
    %407 = vector.extract_strided_slice %406 {offsets = [0, 0], sizes = [16, 8], strides = [1, 1]} : vector<16x32xf32> to vector<16x8xf32>
    %408 = arith.negf %407 : vector<16x8xf32>
    %409 = math.exp %408 : vector<16x8xf32>
    %cst_118 = arith.constant 1.000000e+00 : f32
    %410 = vector.broadcast %cst_118 : f32 to vector<16x8xf32>
    %411 = arith.addf %410, %409 : vector<16x8xf32>
    %412 = arith.divf %410, %411 : vector<16x8xf32>
    %413 = vector.extract_strided_slice %406 {offsets = [0, 8], sizes = [16, 8], strides = [1, 1]} : vector<16x32xf32> to vector<16x8xf32>
    %414 = arith.negf %413 : vector<16x8xf32>
    %415 = math.exp %414 : vector<16x8xf32>
    %cst_119 = arith.constant 1.000000e+00 : f32
    %416 = vector.broadcast %cst_119 : f32 to vector<16x8xf32>
    %417 = arith.addf %416, %415 : vector<16x8xf32>
    %418 = arith.divf %416, %417 : vector<16x8xf32>
    %419 = vector.extract_strided_slice %406 {offsets = [0, 16], sizes = [16, 8], strides = [1, 1]} : vector<16x32xf32> to vector<16x8xf32>
    %420 = math.tanh %419 : vector<16x8xf32>
    %421 = vector.extract_strided_slice %406 {offsets = [0, 24], sizes = [16, 8], strides = [1, 1]} : vector<16x32xf32> to vector<16x8xf32>
    %422 = arith.negf %421 : vector<16x8xf32>
    %423 = math.exp %422 : vector<16x8xf32>
    %cst_120 = arith.constant 1.000000e+00 : f32
    %424 = vector.broadcast %cst_120 : f32 to vector<16x8xf32>
    %425 = arith.addf %424, %423 : vector<16x8xf32>
    %426 = arith.divf %424, %425 : vector<16x8xf32>
    %427 = arith.mulf %418, %403 : vector<16x8xf32>
    %428 = arith.mulf %412, %420 : vector<16x8xf32>
    %429 = arith.addf %427, %428 : vector<16x8xf32>
    %430 = math.tanh %429 : vector<16x8xf32>
    %431 = arith.mulf %426, %430 : vector<16x8xf32>
    %432 = vector.extract_strided_slice %401 {offsets = [16, 0], sizes = [16, 32], strides = [1, 1]} : vector<64x32xf32> to vector<16x32xf32>
    %cst_121 = arith.constant dense<0.000000e+00> : vector<16x32xf32>
    %433 = tpu.matmul %431, %396, %cst_121 {dimension_numbers = #tpu.dot_dimension_numbers<[1], [0], [0], [1], [0, 0, 1, 1], [], []>} : vector<16x8xf32>, vector<8x32xf32>, vector<16x32xf32> -> vector<16x32xf32>
    %434 = arith.addf %432, %433 : vector<16x32xf32>
    %435 = vector.extract_strided_slice %434 {offsets = [0, 0], sizes = [16, 8], strides = [1, 1]} : vector<16x32xf32> to vector<16x8xf32>
    %436 = arith.negf %435 : vector<16x8xf32>
    %437 = math.exp %436 : vector<16x8xf32>
    %cst_122 = arith.constant 1.000000e+00 : f32
    %438 = vector.broadcast %cst_122 : f32 to vector<16x8xf32>
    %439 = arith.addf %438, %437 : vector<16x8xf32>
    %440 = arith.divf %438, %439 : vector<16x8xf32>
    %441 = vector.extract_strided_slice %434 {offsets = [0, 8], sizes = [16, 8], strides = [1, 1]} : vector<16x32xf32> to vector<16x8xf32>
    %442 = arith.negf %441 : vector<16x8xf32>
    %443 = math.exp %442 : vector<16x8xf32>
    %cst_123 = arith.constant 1.000000e+00 : f32
    %444 = vector.broadcast %cst_123 : f32 to vector<16x8xf32>
    %445 = arith.addf %444, %443 : vector<16x8xf32>
    %446 = arith.divf %444, %445 : vector<16x8xf32>
    %447 = vector.extract_strided_slice %434 {offsets = [0, 16], sizes = [16, 8], strides = [1, 1]} : vector<16x32xf32> to vector<16x8xf32>
    %448 = math.tanh %447 : vector<16x8xf32>
    %449 = vector.extract_strided_slice %434 {offsets = [0, 24], sizes = [16, 8], strides = [1, 1]} : vector<16x32xf32> to vector<16x8xf32>
    %450 = arith.negf %449 : vector<16x8xf32>
    %451 = math.exp %450 : vector<16x8xf32>
    %cst_124 = arith.constant 1.000000e+00 : f32
    %452 = vector.broadcast %cst_124 : f32 to vector<16x8xf32>
    %453 = arith.addf %452, %451 : vector<16x8xf32>
    %454 = arith.divf %452, %453 : vector<16x8xf32>
    %455 = arith.mulf %446, %429 : vector<16x8xf32>
    %456 = arith.mulf %440, %448 : vector<16x8xf32>
    %457 = arith.addf %455, %456 : vector<16x8xf32>
    %458 = math.tanh %457 : vector<16x8xf32>
    %459 = arith.mulf %454, %458 : vector<16x8xf32>
    %460 = vector.extract_strided_slice %401 {offsets = [32, 0], sizes = [16, 32], strides = [1, 1]} : vector<64x32xf32> to vector<16x32xf32>
    %cst_125 = arith.constant dense<0.000000e+00> : vector<16x32xf32>
    %461 = tpu.matmul %459, %396, %cst_125 {dimension_numbers = #tpu.dot_dimension_numbers<[1], [0], [0], [1], [0, 0, 1, 1], [], []>} : vector<16x8xf32>, vector<8x32xf32>, vector<16x32xf32> -> vector<16x32xf32>
    %462 = arith.addf %460, %461 : vector<16x32xf32>
    %463 = vector.extract_strided_slice %462 {offsets = [0, 0], sizes = [16, 8], strides = [1, 1]} : vector<16x32xf32> to vector<16x8xf32>
    %464 = arith.negf %463 : vector<16x8xf32>
    %465 = math.exp %464 : vector<16x8xf32>
    %cst_126 = arith.constant 1.000000e+00 : f32
    %466 = vector.broadcast %cst_126 : f32 to vector<16x8xf32>
    %467 = arith.addf %466, %465 : vector<16x8xf32>
    %468 = arith.divf %466, %467 : vector<16x8xf32>
    %469 = vector.extract_strided_slice %462 {offsets = [0, 8], sizes = [16, 8], strides = [1, 1]} : vector<16x32xf32> to vector<16x8xf32>
    %470 = arith.negf %469 : vector<16x8xf32>
    %471 = math.exp %470 : vector<16x8xf32>
    %cst_127 = arith.constant 1.000000e+00 : f32
    %472 = vector.broadcast %cst_127 : f32 to vector<16x8xf32>
    %473 = arith.addf %472, %471 : vector<16x8xf32>
    %474 = arith.divf %472, %473 : vector<16x8xf32>
    %475 = vector.extract_strided_slice %462 {offsets = [0, 16], sizes = [16, 8], strides = [1, 1]} : vector<16x32xf32> to vector<16x8xf32>
    %476 = math.tanh %475 : vector<16x8xf32>
    %477 = vector.extract_strided_slice %462 {offsets = [0, 24], sizes = [16, 8], strides = [1, 1]} : vector<16x32xf32> to vector<16x8xf32>
    %478 = arith.negf %477 : vector<16x8xf32>
    %479 = math.exp %478 : vector<16x8xf32>
    %cst_128 = arith.constant 1.000000e+00 : f32
    %480 = vector.broadcast %cst_128 : f32 to vector<16x8xf32>
    %481 = arith.addf %480, %479 : vector<16x8xf32>
    %482 = arith.divf %480, %481 : vector<16x8xf32>
    %483 = arith.mulf %474, %457 : vector<16x8xf32>
    %484 = arith.mulf %468, %476 : vector<16x8xf32>
    %485 = arith.addf %483, %484 : vector<16x8xf32>
    %486 = math.tanh %485 : vector<16x8xf32>
    %487 = arith.mulf %482, %486 : vector<16x8xf32>
    %488 = vector.extract_strided_slice %401 {offsets = [48, 0], sizes = [16, 32], strides = [1, 1]} : vector<64x32xf32> to vector<16x32xf32>
    %cst_129 = arith.constant dense<0.000000e+00> : vector<16x32xf32>
    %489 = tpu.matmul %487, %396, %cst_129 {dimension_numbers = #tpu.dot_dimension_numbers<[1], [0], [0], [1], [0, 0, 1, 1], [], []>} : vector<16x8xf32>, vector<8x32xf32>, vector<16x32xf32> -> vector<16x32xf32>
    %490 = arith.addf %488, %489 : vector<16x32xf32>
    %491 = vector.extract_strided_slice %490 {offsets = [0, 0], sizes = [16, 8], strides = [1, 1]} : vector<16x32xf32> to vector<16x8xf32>
    %492 = arith.negf %491 : vector<16x8xf32>
    %493 = math.exp %492 : vector<16x8xf32>
    %cst_130 = arith.constant 1.000000e+00 : f32
    %494 = vector.broadcast %cst_130 : f32 to vector<16x8xf32>
    %495 = arith.addf %494, %493 : vector<16x8xf32>
    %496 = arith.divf %494, %495 : vector<16x8xf32>
    %497 = vector.extract_strided_slice %490 {offsets = [0, 8], sizes = [16, 8], strides = [1, 1]} : vector<16x32xf32> to vector<16x8xf32>
    %498 = arith.negf %497 : vector<16x8xf32>
    %499 = math.exp %498 : vector<16x8xf32>
    %cst_131 = arith.constant 1.000000e+00 : f32
    %500 = vector.broadcast %cst_131 : f32 to vector<16x8xf32>
    %501 = arith.addf %500, %499 : vector<16x8xf32>
    %502 = arith.divf %500, %501 : vector<16x8xf32>
    %503 = vector.extract_strided_slice %490 {offsets = [0, 16], sizes = [16, 8], strides = [1, 1]} : vector<16x32xf32> to vector<16x8xf32>
    %504 = math.tanh %503 : vector<16x8xf32>
    %505 = vector.extract_strided_slice %490 {offsets = [0, 24], sizes = [16, 8], strides = [1, 1]} : vector<16x32xf32> to vector<16x8xf32>
    %506 = arith.negf %505 : vector<16x8xf32>
    %507 = math.exp %506 : vector<16x8xf32>
    %cst_132 = arith.constant 1.000000e+00 : f32
    %508 = vector.broadcast %cst_132 : f32 to vector<16x8xf32>
    %509 = arith.addf %508, %507 : vector<16x8xf32>
    %510 = arith.divf %508, %509 : vector<16x8xf32>
    %511 = arith.mulf %502, %485 : vector<16x8xf32>
    %512 = arith.mulf %496, %504 : vector<16x8xf32>
    %513 = arith.addf %511, %512 : vector<16x8xf32>
    %514 = math.tanh %513 : vector<16x8xf32>
    %515 = arith.mulf %510, %514 : vector<16x8xf32>
    %c0_133 = arith.constant 0 : index
    %c0_134 = arith.constant 0 : index
    %516 = vector.load %arg23[%c0_133, %c0_134] : memref<8x4xf32, #tpu.memory_space<vmem>>, vector<8x4xf32>
    %cst_135 = arith.constant dense<0.000000e+00> : vector<16x4xf32>
    %517 = tpu.matmul %394, %516, %cst_135 {dimension_numbers = #tpu.dot_dimension_numbers<[1], [0], [0], [1], [0, 0, 1, 1], [], []>} : vector<16x8xf32>, vector<8x4xf32>, vector<16x4xf32> -> vector<16x4xf32>
    %c0_136 = arith.constant 0 : index
    %c0_137 = arith.constant 0 : index
    %518 = vector.load %arg24[%c0_136, %c0_137] : memref<8x4xf32, #tpu.memory_space<vmem>>, vector<8x4xf32>
    %cst_138 = arith.constant dense<0.000000e+00> : vector<16x4xf32>
    %519 = tpu.matmul %515, %518, %cst_138 {dimension_numbers = #tpu.dot_dimension_numbers<[1], [0], [0], [1], [0, 0, 1, 1], [], []>} : vector<16x8xf32>, vector<8x4xf32>, vector<16x4xf32> -> vector<16x4xf32>
    %520 = arith.addf %517, %519 : vector<16x4xf32>
    %c0_139 = arith.constant 0 : index
    %c0_140 = arith.constant 0 : index
    %521 = vector.load %arg25[%c0_139, %c0_140] : memref<1x4xf32, #tpu.memory_space<vmem>>, vector<1x4xf32>
    %522 = vector.broadcast %521 : vector<1x4xf32> to vector<16x4xf32>
    %523 = arith.addf %520, %522 : vector<16x4xf32>
    %cst_141 = arith.constant 0.000000e+00 : f32
    %524 = vector.broadcast %cst_141 : f32 to vector<16x4xf32>
    %525 = arith.maximumf %523, %524 : vector<16x4xf32>
    %c0_142 = arith.constant 0 : index
    %c0_143 = arith.constant 0 : index
    %526 = vector.load %arg26[%c0_142, %c0_143] : memref<4x16xf32, #tpu.memory_space<vmem>>, vector<4x16xf32>
    %c0_144 = arith.constant 0 : index
    %c0_145 = arith.constant 0 : index
    %527 = vector.load %arg27[%c0_144, %c0_145] : memref<4x16xf32, #tpu.memory_space<vmem>>, vector<4x16xf32>
    %cst_146 = arith.constant dense<0.000000e+00> : vector<16x16xf32>
    %528 = tpu.matmul %525, %526, %cst_146 {dimension_numbers = #tpu.dot_dimension_numbers<[1], [0], [0], [1], [0, 0, 1, 1], [], []>} : vector<16x4xf32>, vector<4x16xf32>, vector<16x16xf32> -> vector<16x16xf32>
    %c0_147 = arith.constant 0 : index
    %c0_148 = arith.constant 0 : index
    %529 = vector.load %arg28[%c0_147, %c0_148] : memref<1x16xf32, #tpu.memory_space<vmem>>, vector<1x16xf32>
    %530 = vector.broadcast %529 : vector<1x16xf32> to vector<16x16xf32>
    %531 = arith.addf %528, %530 : vector<16x16xf32>
    %cst_149 = arith.constant dense<0.000000e+00> : vector<64x16xf32>
    %532 = tpu.matmul %1, %531, %cst_149 {dimension_numbers = #tpu.dot_dimension_numbers<[1], [0], [0], [1], [0, 0, 1, 1], [], []>} : vector<64x16xf32>, vector<16x16xf32>, vector<64x16xf32> -> vector<64x16xf32>
    %cst_150 = arith.constant 0.000000e+00 : f32
    %533 = vector.broadcast %cst_150 : f32 to vector<16x4xf32>
    %cst_151 = arith.constant 0.000000e+00 : f32
    %534 = vector.broadcast %cst_151 : f32 to vector<16x4xf32>
    %535 = vector.extract_strided_slice %532 {offsets = [0, 0], sizes = [16, 16], strides = [1, 1]} : vector<64x16xf32> to vector<16x16xf32>
    %cst_152 = arith.constant dense<0.000000e+00> : vector<16x16xf32>
    %536 = tpu.matmul %533, %527, %cst_152 {dimension_numbers = #tpu.dot_dimension_numbers<[1], [0], [0], [1], [0, 0, 1, 1], [], []>} : vector<16x4xf32>, vector<4x16xf32>, vector<16x16xf32> -> vector<16x16xf32>
    %537 = arith.addf %535, %536 : vector<16x16xf32>
    %538 = vector.extract_strided_slice %537 {offsets = [0, 0], sizes = [16, 4], strides = [1, 1]} : vector<16x16xf32> to vector<16x4xf32>
    %539 = arith.negf %538 : vector<16x4xf32>
    %540 = math.exp %539 : vector<16x4xf32>
    %cst_153 = arith.constant 1.000000e+00 : f32
    %541 = vector.broadcast %cst_153 : f32 to vector<16x4xf32>
    %542 = arith.addf %541, %540 : vector<16x4xf32>
    %543 = arith.divf %541, %542 : vector<16x4xf32>
    %544 = vector.extract_strided_slice %537 {offsets = [0, 4], sizes = [16, 4], strides = [1, 1]} : vector<16x16xf32> to vector<16x4xf32>
    %545 = arith.negf %544 : vector<16x4xf32>
    %546 = math.exp %545 : vector<16x4xf32>
    %cst_154 = arith.constant 1.000000e+00 : f32
    %547 = vector.broadcast %cst_154 : f32 to vector<16x4xf32>
    %548 = arith.addf %547, %546 : vector<16x4xf32>
    %549 = arith.divf %547, %548 : vector<16x4xf32>
    %550 = vector.extract_strided_slice %537 {offsets = [0, 8], sizes = [16, 4], strides = [1, 1]} : vector<16x16xf32> to vector<16x4xf32>
    %551 = math.tanh %550 : vector<16x4xf32>
    %552 = vector.extract_strided_slice %537 {offsets = [0, 12], sizes = [16, 4], strides = [1, 1]} : vector<16x16xf32> to vector<16x4xf32>
    %553 = arith.negf %552 : vector<16x4xf32>
    %554 = math.exp %553 : vector<16x4xf32>
    %cst_155 = arith.constant 1.000000e+00 : f32
    %555 = vector.broadcast %cst_155 : f32 to vector<16x4xf32>
    %556 = arith.addf %555, %554 : vector<16x4xf32>
    %557 = arith.divf %555, %556 : vector<16x4xf32>
    %558 = arith.mulf %549, %534 : vector<16x4xf32>
    %559 = arith.mulf %543, %551 : vector<16x4xf32>
    %560 = arith.addf %558, %559 : vector<16x4xf32>
    %561 = math.tanh %560 : vector<16x4xf32>
    %562 = arith.mulf %557, %561 : vector<16x4xf32>
    %563 = vector.extract_strided_slice %532 {offsets = [16, 0], sizes = [16, 16], strides = [1, 1]} : vector<64x16xf32> to vector<16x16xf32>
    %cst_156 = arith.constant dense<0.000000e+00> : vector<16x16xf32>
    %564 = tpu.matmul %562, %527, %cst_156 {dimension_numbers = #tpu.dot_dimension_numbers<[1], [0], [0], [1], [0, 0, 1, 1], [], []>} : vector<16x4xf32>, vector<4x16xf32>, vector<16x16xf32> -> vector<16x16xf32>
    %565 = arith.addf %563, %564 : vector<16x16xf32>
    %566 = vector.extract_strided_slice %565 {offsets = [0, 0], sizes = [16, 4], strides = [1, 1]} : vector<16x16xf32> to vector<16x4xf32>
    %567 = arith.negf %566 : vector<16x4xf32>
    %568 = math.exp %567 : vector<16x4xf32>
    %cst_157 = arith.constant 1.000000e+00 : f32
    %569 = vector.broadcast %cst_157 : f32 to vector<16x4xf32>
    %570 = arith.addf %569, %568 : vector<16x4xf32>
    %571 = arith.divf %569, %570 : vector<16x4xf32>
    %572 = vector.extract_strided_slice %565 {offsets = [0, 4], sizes = [16, 4], strides = [1, 1]} : vector<16x16xf32> to vector<16x4xf32>
    %573 = arith.negf %572 : vector<16x4xf32>
    %574 = math.exp %573 : vector<16x4xf32>
    %cst_158 = arith.constant 1.000000e+00 : f32
    %575 = vector.broadcast %cst_158 : f32 to vector<16x4xf32>
    %576 = arith.addf %575, %574 : vector<16x4xf32>
    %577 = arith.divf %575, %576 : vector<16x4xf32>
    %578 = vector.extract_strided_slice %565 {offsets = [0, 8], sizes = [16, 4], strides = [1, 1]} : vector<16x16xf32> to vector<16x4xf32>
    %579 = math.tanh %578 : vector<16x4xf32>
    %580 = vector.extract_strided_slice %565 {offsets = [0, 12], sizes = [16, 4], strides = [1, 1]} : vector<16x16xf32> to vector<16x4xf32>
    %581 = arith.negf %580 : vector<16x4xf32>
    %582 = math.exp %581 : vector<16x4xf32>
    %cst_159 = arith.constant 1.000000e+00 : f32
    %583 = vector.broadcast %cst_159 : f32 to vector<16x4xf32>
    %584 = arith.addf %583, %582 : vector<16x4xf32>
    %585 = arith.divf %583, %584 : vector<16x4xf32>
    %586 = arith.mulf %577, %560 : vector<16x4xf32>
    %587 = arith.mulf %571, %579 : vector<16x4xf32>
    %588 = arith.addf %586, %587 : vector<16x4xf32>
    %589 = math.tanh %588 : vector<16x4xf32>
    %590 = arith.mulf %585, %589 : vector<16x4xf32>
    %591 = vector.extract_strided_slice %532 {offsets = [32, 0], sizes = [16, 16], strides = [1, 1]} : vector<64x16xf32> to vector<16x16xf32>
    %cst_160 = arith.constant dense<0.000000e+00> : vector<16x16xf32>
    %592 = tpu.matmul %590, %527, %cst_160 {dimension_numbers = #tpu.dot_dimension_numbers<[1], [0], [0], [1], [0, 0, 1, 1], [], []>} : vector<16x4xf32>, vector<4x16xf32>, vector<16x16xf32> -> vector<16x16xf32>
    %593 = arith.addf %591, %592 : vector<16x16xf32>
    %594 = vector.extract_strided_slice %593 {offsets = [0, 0], sizes = [16, 4], strides = [1, 1]} : vector<16x16xf32> to vector<16x4xf32>
    %595 = arith.negf %594 : vector<16x4xf32>
    %596 = math.exp %595 : vector<16x4xf32>
    %cst_161 = arith.constant 1.000000e+00 : f32
    %597 = vector.broadcast %cst_161 : f32 to vector<16x4xf32>
    %598 = arith.addf %597, %596 : vector<16x4xf32>
    %599 = arith.divf %597, %598 : vector<16x4xf32>
    %600 = vector.extract_strided_slice %593 {offsets = [0, 4], sizes = [16, 4], strides = [1, 1]} : vector<16x16xf32> to vector<16x4xf32>
    %601 = arith.negf %600 : vector<16x4xf32>
    %602 = math.exp %601 : vector<16x4xf32>
    %cst_162 = arith.constant 1.000000e+00 : f32
    %603 = vector.broadcast %cst_162 : f32 to vector<16x4xf32>
    %604 = arith.addf %603, %602 : vector<16x4xf32>
    %605 = arith.divf %603, %604 : vector<16x4xf32>
    %606 = vector.extract_strided_slice %593 {offsets = [0, 8], sizes = [16, 4], strides = [1, 1]} : vector<16x16xf32> to vector<16x4xf32>
    %607 = math.tanh %606 : vector<16x4xf32>
    %608 = vector.extract_strided_slice %593 {offsets = [0, 12], sizes = [16, 4], strides = [1, 1]} : vector<16x16xf32> to vector<16x4xf32>
    %609 = arith.negf %608 : vector<16x4xf32>
    %610 = math.exp %609 : vector<16x4xf32>
    %cst_163 = arith.constant 1.000000e+00 : f32
    %611 = vector.broadcast %cst_163 : f32 to vector<16x4xf32>
    %612 = arith.addf %611, %610 : vector<16x4xf32>
    %613 = arith.divf %611, %612 : vector<16x4xf32>
    %614 = arith.mulf %605, %588 : vector<16x4xf32>
    %615 = arith.mulf %599, %607 : vector<16x4xf32>
    %616 = arith.addf %614, %615 : vector<16x4xf32>
    %617 = math.tanh %616 : vector<16x4xf32>
    %618 = arith.mulf %613, %617 : vector<16x4xf32>
    %619 = vector.extract_strided_slice %532 {offsets = [48, 0], sizes = [16, 16], strides = [1, 1]} : vector<64x16xf32> to vector<16x16xf32>
    %cst_164 = arith.constant dense<0.000000e+00> : vector<16x16xf32>
    %620 = tpu.matmul %618, %527, %cst_164 {dimension_numbers = #tpu.dot_dimension_numbers<[1], [0], [0], [1], [0, 0, 1, 1], [], []>} : vector<16x4xf32>, vector<4x16xf32>, vector<16x16xf32> -> vector<16x16xf32>
    %621 = arith.addf %619, %620 : vector<16x16xf32>
    %622 = vector.extract_strided_slice %621 {offsets = [0, 0], sizes = [16, 4], strides = [1, 1]} : vector<16x16xf32> to vector<16x4xf32>
    %623 = arith.negf %622 : vector<16x4xf32>
    %624 = math.exp %623 : vector<16x4xf32>
    %cst_165 = arith.constant 1.000000e+00 : f32
    %625 = vector.broadcast %cst_165 : f32 to vector<16x4xf32>
    %626 = arith.addf %625, %624 : vector<16x4xf32>
    %627 = arith.divf %625, %626 : vector<16x4xf32>
    %628 = vector.extract_strided_slice %621 {offsets = [0, 4], sizes = [16, 4], strides = [1, 1]} : vector<16x16xf32> to vector<16x4xf32>
    %629 = arith.negf %628 : vector<16x4xf32>
    %630 = math.exp %629 : vector<16x4xf32>
    %cst_166 = arith.constant 1.000000e+00 : f32
    %631 = vector.broadcast %cst_166 : f32 to vector<16x4xf32>
    %632 = arith.addf %631, %630 : vector<16x4xf32>
    %633 = arith.divf %631, %632 : vector<16x4xf32>
    %634 = vector.extract_strided_slice %621 {offsets = [0, 8], sizes = [16, 4], strides = [1, 1]} : vector<16x16xf32> to vector<16x4xf32>
    %635 = math.tanh %634 : vector<16x4xf32>
    %636 = vector.extract_strided_slice %621 {offsets = [0, 12], sizes = [16, 4], strides = [1, 1]} : vector<16x16xf32> to vector<16x4xf32>
    %637 = arith.negf %636 : vector<16x4xf32>
    %638 = math.exp %637 : vector<16x4xf32>
    %cst_167 = arith.constant 1.000000e+00 : f32
    %639 = vector.broadcast %cst_167 : f32 to vector<16x4xf32>
    %640 = arith.addf %639, %638 : vector<16x4xf32>
    %641 = arith.divf %639, %640 : vector<16x4xf32>
    %642 = arith.mulf %633, %616 : vector<16x4xf32>
    %643 = arith.mulf %627, %635 : vector<16x4xf32>
    %644 = arith.addf %642, %643 : vector<16x4xf32>
    %645 = math.tanh %644 : vector<16x4xf32>
    %646 = arith.mulf %641, %645 : vector<16x4xf32>
    %c0_168 = arith.constant 0 : index
    %c0_169 = arith.constant 0 : index
    %647 = vector.load %arg29[%c0_168, %c0_169] : memref<4x2xf32, #tpu.memory_space<vmem>>, vector<4x2xf32>
    %cst_170 = arith.constant dense<0.000000e+00> : vector<16x2xf32>
    %648 = tpu.matmul %525, %647, %cst_170 {dimension_numbers = #tpu.dot_dimension_numbers<[1], [0], [0], [1], [0, 0, 1, 1], [], []>} : vector<16x4xf32>, vector<4x2xf32>, vector<16x2xf32> -> vector<16x2xf32>
    %c0_171 = arith.constant 0 : index
    %c0_172 = arith.constant 0 : index
    %649 = vector.load %arg30[%c0_171, %c0_172] : memref<4x2xf32, #tpu.memory_space<vmem>>, vector<4x2xf32>
    %cst_173 = arith.constant dense<0.000000e+00> : vector<16x2xf32>
    %650 = tpu.matmul %646, %649, %cst_173 {dimension_numbers = #tpu.dot_dimension_numbers<[1], [0], [0], [1], [0, 0, 1, 1], [], []>} : vector<16x4xf32>, vector<4x2xf32>, vector<16x2xf32> -> vector<16x2xf32>
    %651 = arith.addf %648, %650 : vector<16x2xf32>
    %c0_174 = arith.constant 0 : index
    %c0_175 = arith.constant 0 : index
    %652 = vector.load %arg31[%c0_174, %c0_175] : memref<1x2xf32, #tpu.memory_space<vmem>>, vector<1x2xf32>
    %653 = vector.broadcast %652 : vector<1x2xf32> to vector<16x2xf32>
    %654 = arith.addf %651, %653 : vector<16x2xf32>
    %cst_176 = arith.constant 0.000000e+00 : f32
    %655 = vector.broadcast %cst_176 : f32 to vector<16x2xf32>
    %656 = arith.maximumf %654, %655 : vector<16x2xf32>
    %657 = vector.extract_strided_slice %656 {offsets = [0, 0], sizes = [8, 2], strides = [1, 1]} : vector<16x2xf32> to vector<8x2xf32>
    %cst_177 = arith.constant dense<0xFF800000> : vector<2xf32>
    %658 = vector.multi_reduction <maximumf>, %657, %cst_177 [0] : vector<8x2xf32> to vector<2xf32>
    %659 = vector.shape_cast %658 : vector<2xf32> to vector<1x2xf32>
    %660 = vector.extract_strided_slice %656 {offsets = [8, 0], sizes = [8, 2], strides = [1, 1]} : vector<16x2xf32> to vector<8x2xf32>
    %cst_178 = arith.constant dense<0xFF800000> : vector<2xf32>
    %661 = vector.multi_reduction <maximumf>, %660, %cst_178 [0] : vector<8x2xf32> to vector<2xf32>
    %662 = vector.shape_cast %661 : vector<2xf32> to vector<1x2xf32>
    %663 = tpu.concatenate %659, %662 in 0 : vector<1x2xf32>, vector<1x2xf32> -> vector<2x2xf32>
    %c0_179 = arith.constant 0 : index
    %c0_180 = arith.constant 0 : index
    %664 = vector.load %arg32[%c0_179, %c0_180] : memref<2x1xf32, #tpu.memory_space<vmem>>, vector<2x1xf32>
    %cst_181 = arith.constant dense<0.000000e+00> : vector<2x1xf32>
    %665 = tpu.matmul %663, %664, %cst_181 {dimension_numbers = #tpu.dot_dimension_numbers<[1], [0], [0], [1], [0, 0, 1, 1], [], []>} : vector<2x2xf32>, vector<2x1xf32>, vector<2x1xf32> -> vector<2x1xf32>
    %c0_182 = arith.constant 0 : index
    %c0_183 = arith.constant 0 : index
    %666 = vector.load %arg33[%c0_182, %c0_183] : memref<1x1xf32, #tpu.memory_space<vmem>>, vector<1x1xf32>
    %667 = vector.broadcast %666 : vector<1x1xf32> to vector<2x1xf32>
    %668 = arith.addf %665, %667 : vector<2x1xf32>
    %cst_184 = arith.constant 0.000000e+00 : f32
    %669 = vector.broadcast %cst_184 : f32 to vector<2x1xf32>
    %670 = arith.maximumf %668, %669 : vector<2x1xf32>
    %c0_185 = arith.constant 0 : index
    %c0_186 = arith.constant 0 : index
    %671 = vector.load %arg34[%c0_185, %c0_186] : memref<1x1xf32, #tpu.memory_space<vmem>>, vector<1x1xf32>
    %cst_187 = arith.constant dense<0.000000e+00> : vector<2x1xf32>
    %672 = tpu.matmul %670, %671, %cst_187 {dimension_numbers = #tpu.dot_dimension_numbers<[1], [0], [0], [1], [0, 0, 1, 1], [], []>} : vector<2x1xf32>, vector<1x1xf32>, vector<2x1xf32> -> vector<2x1xf32>
    %c0_188 = arith.constant 0 : index
    %c0_189 = arith.constant 0 : index
    %673 = vector.load %arg35[%c0_188, %c0_189] : memref<1x1xf32, #tpu.memory_space<vmem>>, vector<1x1xf32>
    %674 = vector.broadcast %673 : vector<1x1xf32> to vector<2x1xf32>
    %675 = arith.addf %672, %674 : vector<2x1xf32>
    %cst_190 = arith.constant 0.000000e+00 : f32
    %676 = vector.broadcast %cst_190 : f32 to vector<2x1xf32>
    %677 = arith.maximumf %675, %676 : vector<2x1xf32>
    %c0_191 = arith.constant 0 : index
    %c0_192 = arith.constant 0 : index
    %678 = vector.load %arg36[%c0_191, %c0_192] : memref<2x1xf32, #tpu.memory_space<vmem>>, vector<2x1xf32>
    tpu.vector_store %arg36[%c0_191, %c0_192], %677 {strides = array<i32>} : memref<2x1xf32, #tpu.memory_space<vmem>>, vector<2x1xf32>,
    return
  }
}

</mosaic_0001>

<bundles_post_ra>
// kernel: eq.1
= control target key start
LH: loop header
LB: loop body
LE: loop exit
PB: predicated region body
PF: predicated region fallthrough
CT: control target
= control target key end

     0   :  { %vm8_vm0 = vcmask 130048   ;;  %s40_s8 = smov 16   ;;  %s41_s9 = smov 32   ;;  %vm14_vm1 = vcmask 523648   ;;  %vm20_vm2 = vcmask 392448   ;;  %vm26_vm3 = vcmask 261248   ;;  %s58_s0 = inlined_call_operand.vmem [shape: s32[4,16], index: 0, kind: input, shape index: {}]   ;;  %s59_s1 = inlined_call_operand.vmem [shape: s32[64], index: 1, kind: output, shape index: {}]  }
   0x1   :  { %v5_v0 = vld [vmem:[%s58_s0] sm:$0xf]  ;;  %s39_s0 = smov 48  }
   0x2   :  { %6 = vst [vmem:[#allocation1] sm:$0xf] %v5_v0 }
   0x9   :  { %v11_v1 = vld [vmem:[#allocation1 + $0x3] sm:$0x1]   ;;  %v23_v2 = vld [vmem:[#allocation1 + $0x1] sm:$0x1]   ;;  %v7_v3 = vld [vmem:[#allocation1] sm:$0x1]  }
   0xa   :  { %12 = vrot.lane.b32.xlu0 %v11_v1, %s39_s0  ;;  %24 = vrot.lane.b32.xlu1 %v23_v2, %s40_s8  ;;  %v17_v4 = vld [vmem:[#allocation1 + $0x2] sm:$0x1]   ;;  %9 = vst.msk [vmem:[#allocation0] sm:$0x1] %vm8_vm0, %v7_v3  }
   0xe   :  { %18 = vrot.lane.b32.xlu0 %v17_v4, %s41_s9 }
  0x7c   :  { %v13_v5 = vpop.permute.xlu0 %12   ;;  %v25_v6 = vpop.permute.xlu1 %24  }
  0x7d   :  { %15 = vst.msk [vmem:[#allocation0] sm:$0x1] %vm14_vm1, %v13_v5  }
  0x80   :  { %v19_v7 = vpop.permute.xlu0 %18  }
  0x81   :  { %21 = vst.msk [vmem:[#allocation0] sm:$0x1] %vm20_vm2, %v19_v7  }
  0x82   :  { %27 = vst.msk [vmem:[#allocation0] sm:$0x1] %vm26_vm3, %v25_v6  }
  0x89   :  { %v32_v8 = vld [vmem:[#allocation0] sm:$0x1] }
  0x8a   :  { %35 = vst [vmem:[%s59_s1] sm:$0x1] %v32_v8 }

// kernel: gcn_forward.1
= control target key start
LH: loop header
LB: loop body
LE: loop exit
PB: predicated region body
PF: predicated region fallthrough
CT: control target
= control target key end

     0   :  { %s6027_s3 = smov 2   ;;  %vm177_vm0 = vcmask 130048   ;;  %s6028_s10 = smov 3   ;;  %v6030_v6 = vmov 0.0   ;;  %vm1111_vm1 = vcmask 261120   ;;  %vm2920_vm2 = vcmask 64512   ;;  %s6755_s0 = inlined_call_operand.smem [shape: u32[37], index: -1, kind: input, shape index: {}] }
   0x1   :  { %s4922_s6 = sld [smem:[%s6755_s0 + %s6027_s3]]   ;;  %s6029_s14 = smov 1   ;;  %vm3828_vm3 = vcmask 1043456   ;;  %vm3821_vm4 = vcmask 31744   ;;  %vm4754_vm5 = vcmask 1041408   ;;  %vm6066_vm6 = vmmov 0  }
   0x2   :  { %s1_s9 = sld [smem:[%s6755_s0]]   ;;  %s6031_s18 = smov 4   ;;  %vm4726_vm7 = vcmask 15360   ;;  %vm4741_vm8 = vcmask 1040384   ;;  %vm4837_vm9 = vcmask 7168   ;;  %vm4915_vm10 = vcmask 1024  }
   0x3   :  { %s4923_s13 = sld [smem:[%s6755_s0 + %s6028_s10]]   ;;  %s6032_s22 = smov 96  }
   0x4   :  { %s6097_s17 = sld [smem:[%s6755_s0 + %s6029_s14]]   ;;  %s6033_s23 = smov 16  }
   0x5   :  { %s4924_s21 = sld [smem:[%s6755_s0 + %s6031_s18]]   ;;  %s6034_s24 = smov 32  }
   0x6   :  { %s6035_s25 = smov 80   ;;  %s6036_s26 = smov 6  }
   0x7   :  { %v167_v0 = vld [vmem:[%s4922_s6 + $0x8] sm:$0xff]  ;;  %v166_v1 = vld [vmem:[%s4922_s6] sm:$0xff]  ;;  %s4926_s29 = sld [smem:[%s6755_s0 + %s6036_s26]]   ;;  %s6037_s30 = smov 5  }
   0x8   :  { %5314 = vmatprep.subr.mxu0 %v167_v0  ;;  %v6083_v2 = vld [vmem:[%s1_s9] sm:$0xff]  ;;  %v6087_v3 = vld [vmem:[%s1_s9 + $0x8] sm:$0xff]  ;;  %s4925_s3 = sld [smem:[%s6755_s0 + %s6037_s30]]   ;;  %s6038_s4 = smov 8  }
   0x9   :  { %5315 = vmatpush3.msra.mxu0 %v167_v0  ;;  %5318 = vmatprep.mubr.msk.f32.mxu0 %vm177_vm0, %v6083_v2  ;;  %v6099_v4 = vld [vmem:[%s4923_s13 + $0x8] sm:$0xff]  ;;  %v6103_v5 = vld [vmem:[%s4923_s13] sm:$0xff]  ;;  %s4928_s7 = sld [smem:[%s6755_s0 + %s6038_s4]]   ;;  %s6039_s8 = smov 9  }
   0xa   :  { %5316 = vmatprep.subr.mxu0 %v166_v1  ;;  %v6110_v7 = vld [vmem:[%s6097_s17] sm:$0xff]  ;;  %v6124_v13 = vld [vmem:[%s6097_s17 + $0x8] sm:$0xff]  ;;  %v6138_v42 = vld [vmem:[%s6097_s17 + $0x10] sm:$0xff]  ;;  %s4929_s11 = sld [smem:[%s6755_s0 + %s6039_s8]]   ;;  %s6040_s12 = smov 7  }
   0xb   :  { %5317 = vmatpush3.msra.mxu0 %v166_v1  ;;  %5325 = vmatprep.mubr.msk.f32.mxu1 %vm177_vm0, %v6110_v7  ;;  %v4957_v8 = vld [vmem:[%s4924_s21] ss:$0 sm:$0xff]  ;;  %v6141_v43 = vld [vmem:[%s6097_s17 + $0x18] sm:$0xff]  ;;  %s4927_s15 = sld [smem:[%s6755_s0 + %s6040_s12]]   ;;  %s6041_s16 = smov 10  }
   0xc   :  { %5319 = vmatmul.mubr.msk.f32.vlgmr.msra.gmra.mxu0 %vm177_vm0, %v6087_v3  ;;  %5337 = vmatprep.subr.mxu0 %v6099_v4  ;;  %s4930_s21 = sld [smem:[%s6755_s0 + %s6041_s16]]   ;;  %s6042_s26 = smov 64  }
   0xd   :  { %5338 = vmatpush3.msra.mxu0 %v6099_v4  ;;  %5341 = vmatprep.mubr.f32.mxu0 %v6030_v6  ;;  %s6043_s27 = smov 11   ;;  %s6044_s1 = smov 12  }
   0xe   :  { %5339 = vmatprep.subr.mxu0 %v6103_v5  ;;  %s4931_s30 = sld [smem:[%s6755_s0 + %s6043_s27]]   ;;  %s6045_s6 = smov 14  }
   0xf   :  { %5340 = vmatpush3.msra.mxu0 %v6103_v5  ;;  %s4932_s5 = sld [smem:[%s6755_s0 + %s6044_s1]]   ;;  %s6046_s10 = smov 13  }
  0x10   :  { %5342 = vmatmul.mubr.f32.vlgmr.msra.gmra.mxu0 %v6030_v6  ;;  %5344 = vmatprep.subr.mxu0 %v6099_v4  ;;  %s4934_s9 = sld [smem:[%s6755_s0 + %s6045_s6]]   ;;  %s6047_s14 = smov 15  }
  0x11   :  { %5345 = vmatpush3.msra.mxu0 %v6099_v4  ;;  %s4933_s13 = sld [smem:[%s6755_s0 + %s6046_s10]]   ;;  %s6048_s27 = smov 17  }
  0x12   :  { %5346 = vmatprep.subr.mxu0 %v6103_v5  ;;  %s4935_s19 = sld [smem:[%s6755_s0 + %s6047_s14]]   ;;  %s6053_s16 = smov 22  }
  0x13   :  { %5347 = vmatpush3.msra.mxu0 %v6103_v5  ;;  %s6056_s28 = smov 23   ;;  %s6057_s1 = smov 24  }
  0x14   :  { %5351 = vmatprep.subr.mxu0 %v6099_v4  ;;  %s6058_s6 = smov 26  }
  0xcc   :  { %v5320_v9 = vpop.f32.mrf.mxu0 }
  0xcd   :  { %v256_v10 = vadd.f32 %v5320_v9, %v4957_v8 }
  0xce   :  { %v250_v11 = vpop.f32.mrf.mxu0 }
  0xcf   :  { %v251_v12 = vadd.f32 %v4957_v8, %v250_v11  ;;  %5321 = vmatprep.subr.mxu1 %v256_v10 }
  0xd0   :  { %5322 = vmatpush3.msra.mxu1 %v256_v10  ;;  %v5343_v14 = vpop.f32.mrf.mxu0 }
  0xd1   :  { %5323 = vmatprep.subr.mxu1 %v251_v12 }
  0xd2   :  { %5324 = vmatpush3.msra.mxu1 %v251_v12  ;;  %v457_v16 = vpop.f32.mrf.mxu0 }
  0xd3   :  { %5326 = vmatmul.mubr.msk.f32.vlgmr.msra.gmra.mxu1 %vm177_vm0, %v6124_v13 }
  0xd4   :  { %5328 = vmatprep.mubr.msk.f32.mxu1 %vm177_vm0, %v6138_v42 }
  0xd7   :  { %5329 = vmatmul.mubr.msk.f32.gmra.mxu1 %vm177_vm0, %v6141_v43 }
 0x193   :  { %v5327_v15 = vpop.f32.mrf.mxu1 }
 0x194   :  { %v467_v19 = vadd.f32 %v5343_v14, %v5327_v15 }
 0x195   :  { %v349_v17 = vpop.f32.mrf.mxu1 }
 0x196   :  { %v466_v18 = vadd.f32 %v457_v16, %v349_v17  ;;  %v4969_v23 = vmul.f32 -1.442695, %v467_v19 }
 0x197   :  { %v5330_v50 = vpop.f32.mrf.mxu1 }
 0x198   :  { %5694 = vtanh.f32 %v466_v18  ;;  %v4968_v22 = vmul.f32 -1.442695, %v466_v18 }
 0x199   :  { %5696 = vtanh.f32 %v467_v19  ;;  %v359_v53 = vpop.f32.mrf.mxu1 }
 0x19a   :  { %5698 = vpow2.f32 %v4968_v22  ;;  %v6166_v22 = vld [vmem:[%s6097_s17 + $0x28] sm:$0xff] }
 0x19b   :  { %5700 = vpow2.f32 %v4969_v23 }
 0x1a5   :  { %v5695_v20 = vpop.eup %5694 }
 0x1a6   :  { %486 = vrot.lane.b32.xlu0 %v5695_v20, %s6032_s22  ;;  %v5697_v21 = vpop.eup %5696 }
 0x1a7   :  { %v5699_v24 = vpop.eup %5698 }
 0x1a8   :  { %v474_v25 = vadd.f32 1.0, %v5699_v24  ;;  %v5701_v26 = vpop.eup %5700 }
 0x1a9   :  { %v475_v27 = vadd.f32 1.0, %v5701_v26 }
 0x1aa   :  { %488 = vrot.lane.b32.xlu0 %v5697_v21, %s6032_s22  ;;  %5702 = vrcp.f32 %v474_v25  ;;  %v6163_v21 = vld [vmem:[%s6097_s17 + $0x20] sm:$0xff] }
 0x1ab   :  { %5704 = vrcp.f32 %v475_v27  ;;  %5331 = vmatprep.mubr.msk.f32.mxu1 %vm177_vm0, %v6163_v21 }
 0x1ac   :  { %5332 = vmatmul.mubr.msk.f32.gmra.mxu1 %vm177_vm0, %v6166_v22 }
 0x1b7   :  { %v5703_v28 = vpop.eup %5702 }
 0x1b8   :  { %v5705_v31 = vpop.eup %5704  ;;  %v482_v34 = vmul.f32 0.0, %v5703_v28 }
 0x1b9   :  { %v483_v37 = vmul.f32 0.0, %v5705_v31 }
 0x218   :  { %v487_v29 = vpop.permute.xlu0 %486 }
 0x219   :  { %v492_v30 = vmul.f32 %v5703_v28, %v487_v29 }
 0x21b   :  { %496 = vrot.lane.b32.xlu1 %v492_v30, %s6033_s23 }
 0x21c   :  { %v489_v32 = vpop.permute.xlu0 %488 }
 0x21d   :  { %v493_v33 = vmul.f32 %v5705_v31, %v489_v32 }
 0x21f   :  { %498 = vrot.lane.b32.xlu1 %v493_v33, %s6033_s23 }
 0x26c   :  { %v5333_v29 = vpop.f32.mrf.mxu1 }
 0x26e   :  { %v369_v32 = vpop.f32.mrf.mxu1 }
 0x28d   :  { %v497_v35 = vpop.permute.xlu1 %496 }
 0x28e   :  { %v6132_v36 = vadd.f32 %v497_v35, %v482_v34 }
 0x290   :  { %5706 = vtanh.f32 %v6132_v36 }
 0x291   :  { %v499_v38 = vpop.permute.xlu1 %498 }
 0x292   :  { %v503_v39 = vadd.f32 %v499_v38, %v483_v37 }
 0x294   :  { %5708 = vtanh.f32 %v503_v39 }
 0x29d   :  { %v5707_v40 = vpop.eup %5706 }
 0x29e   :  { %508 = vrot.lane.b32.xlu0 %v5707_v40, %s6034_s24 }
 0x2a1   :  { %v5709_v41 = vpop.eup %5708 }
 0x2a2   :  { %510 = vrot.lane.b32.xlu1 %v5709_v41, %s6034_s24 }
 0x310   :  { %v509_v44 = vpop.permute.xlu0 %508 }
 0x311   :  { %v514_v45 = vmul.f32 %v5703_v28, %v509_v44 }
 0x313   :  { %518 = vrot.lane.b32.xlu0 %v514_v45, %s6035_s25 }
 0x314   :  { %v511_v46 = vpop.permute.xlu1 %510 }
 0x315   :  { %v515_v47 = vmul.f32 %v5705_v31, %v511_v46 }
 0x317   :  { %520 = vrot.lane.b32.xlu1 %v515_v47, %s6035_s25 }
 0x385   :  { %v519_v48 = vpop.permute.xlu0 %518 }
 0x386   :  { %5348 = vmatprep.mubr.msk.f32.mxu0 %vm177_vm0, %v519_v48 }
 0x389   :  { %v521_v49 = vpop.permute.xlu1 %520 }
 0x38a   :  { %5349 = vmatmul.mubr.msk.f32.vlgmr.msra.gmra.mxu0 %vm177_vm0, %v521_v49 }
 0x38b   :  { %5352 = vmatpush3.msra.mxu0 %v6099_v4 }
 0x38c   :  { %5353 = vmatprep.subr.mxu0 %v6103_v5 }
 0x38d   :  { %5354 = vmatpush3.msra.mxu0 %v6103_v5 }
 0x38e   :  { %5358 = vmatprep.subr.mxu0 %v6099_v4 }
 0x44a   :  { %v5350_v51 = vpop.f32.mrf.mxu0 }
 0x44b   :  { %v602_v52 = vadd.f32 %v5350_v51, %v5330_v50 }
 0x44c   :  { %v592_v54 = vpop.f32.mrf.mxu0 }
 0x44d   :  { %5710 = vtanh.f32 %v602_v52  ;;  %v601_v55 = vadd.f32 %v592_v54, %v359_v53  ;;  %v4973_v58 = vmul.f32 -1.442695, %v602_v52 }
 0x44f   :  { %5712 = vtanh.f32 %v601_v55  ;;  %v4972_v59 = vmul.f32 -1.442695, %v601_v55 }
 0x450   :  { %5714 = vpow2.f32 %v4973_v58  ;;  %v6189_v58 = vld [vmem:[%s6097_s17 + $0x38] sm:$0xff] }
 0x451   :  { %5716 = vpow2.f32 %v4972_v59 }
 0x45a   :  { %v5711_v56 = vpop.eup %5710 }
 0x45b   :  { %623 = vrot.lane.b32.xlu1 %v5711_v56, %s6032_s22 }
 0x45c   :  { %v5713_v57 = vpop.eup %5712 }
 0x45d   :  { %621 = vrot.lane.b32.xlu0 %v5713_v57, %s6032_s22  ;;  %v5715_v60 = vpop.eup %5714  ;;  %v6186_v57 = vld [vmem:[%s6097_s17 + $0x30] sm:$0xff] }
 0x45e   :  { %v5717_v61 = vpop.eup %5716  ;;  %v610_v62 = vadd.f32 1.0, %v5715_v60  ;;  %5334 = vmatprep.mubr.msk.f32.mxu1 %vm177_vm0, %v6186_v57 }
 0x45f   :  { %v609_v63 = vadd.f32 1.0, %v5717_v61  ;;  %5335 = vmatmul.mubr.msk.f32.gmra.mxu1 %vm177_vm0, %v6189_v58 }
 0x460   :  { %5718 = vrcp.f32 %v610_v62 }
 0x461   :  { %5720 = vrcp.f32 %v609_v63 }
 0x46d   :  { %v5719_v0 = vpop.eup %5718 }
 0x46e   :  { %v5721_v9 = vpop.eup %5720  ;;  %v618_v12 = vmul.f32 %v5719_v0, %v503_v39 }
 0x46f   :  { %v617_v16 = vmul.f32 %v5721_v9, %v6132_v36 }
 0x4cd   :  { %v624_v1 = vpop.permute.xlu1 %623 }
 0x4ce   :  { %v628_v8 = vmul.f32 %v5719_v0, %v624_v1 }
 0x4cf   :  { %v622_v10 = vpop.permute.xlu0 %621 }
 0x4d0   :  { %633 = vrot.lane.b32.xlu1 %v628_v8, %s6033_s23  ;;  %v627_v11 = vmul.f32 %v5721_v9, %v622_v10 }
 0x4d2   :  { %631 = vrot.lane.b32.xlu0 %v627_v11, %s6033_s23 }
 0x51f   :  { %v5336_v1 = vpop.f32.mrf.mxu1 }
 0x521   :  { %v379_v10 = vpop.f32.mrf.mxu1 }
 0x542   :  { %v634_v14 = vpop.permute.xlu1 %633 }
 0x543   :  { %v638_v15 = vadd.f32 %v634_v14, %v618_v12 }
 0x544   :  { %v632_v17 = vpop.permute.xlu0 %631 }
 0x545   :  { %5722 = vtanh.f32 %v638_v15  ;;  %v637_v18 = vadd.f32 %v632_v17, %v617_v16 }
 0x547   :  { %5724 = vtanh.f32 %v637_v18 }
 0x552   :  { %v5723_v19 = vpop.eup %5722 }
 0x553   :  { %645 = vrot.lane.b32.xlu1 %v5723_v19, %s6034_s24 }
 0x554   :  { %v5725_v20 = vpop.eup %5724 }
 0x555   :  { %643 = vrot.lane.b32.xlu0 %v5725_v20, %s6034_s24 }
 0x5c5   :  { %v646_v23 = vpop.permute.xlu1 %645 }
 0x5c6   :  { %v650_v24 = vmul.f32 %v5719_v0, %v646_v23 }
 0x5c7   :  { %v644_v25 = vpop.permute.xlu0 %643 }
 0x5c8   :  { %655 = vrot.lane.b32.xlu1 %v650_v24, %s6035_s25  ;;  %v649_v26 = vmul.f32 %v5721_v9, %v644_v25 }
 0x5ca   :  { %653 = vrot.lane.b32.xlu0 %v649_v26, %s6035_s25 }
 0x63a   :  { %v656_v28 = vpop.permute.xlu1 %655 }
 0x63c   :  { %v654_v27 = vpop.permute.xlu0 %653 }
 0x63d   :  { %5355 = vmatprep.mubr.msk.f32.mxu0 %vm177_vm0, %v654_v27 }
 0x63e   :  { %5356 = vmatmul.mubr.msk.f32.vlgmr.msra.gmra.mxu0 %vm177_vm0, %v656_v28 }
 0x63f   :  { %5359 = vmatpush3.msra.mxu0 %v6099_v4 }
 0x640   :  { %5360 = vmatprep.subr.mxu0 %v6103_v5 }
 0x641   :  { %5361 = vmatpush3.msra.mxu0 %v6103_v5 }
 0x6fe   :  { %v5357_v30 = vpop.f32.mrf.mxu0 }
 0x6ff   :  { %v737_v31 = vadd.f32 %v5357_v30, %v5333_v29 }
 0x700   :  { %v727_v33 = vpop.f32.mrf.mxu0 }
 0x701   :  { %5726 = vtanh.f32 %v737_v31  ;;  %v736_v34 = vadd.f32 %v727_v33, %v369_v32  ;;  %v4977_v37 = vmul.f32 -1.442695, %v737_v31 }
 0x703   :  { %5728 = vtanh.f32 %v736_v34  ;;  %v4976_v4 = vmul.f32 -1.442695, %v736_v34 }
 0x704   :  { %5730 = vpow2.f32 %v4977_v37  ;;  %v923_v37 = vld [vmem:[%s4926_s29] sm:$0xff] }
 0x705   :  { %5732 = vpow2.f32 %v4976_v4  ;;  %v922_v4 = vld [vmem:[%s4925_s3 + $0x8] sm:$0xff] }
 0x706   :  { %5372 = vmatprep.subr.mxu0 %v922_v4 }
 0x70e   :  { %v5727_v35 = vpop.eup %5726 }
 0x70f   :  { %758 = vrot.lane.b32.xlu1 %v5727_v35, %s6032_s22 }
 0x710   :  { %v5729_v36 = vpop.eup %5728 }
 0x711   :  { %756 = vrot.lane.b32.xlu0 %v5729_v36, %s6032_s22  ;;  %v5731_v38 = vpop.eup %5730  ;;  %v924_v36 = vld [vmem:[%s4926_s29 + $0x8] sm:$0xff] }
 0x712   :  { %v5733_v5 = vpop.eup %5732  ;;  %v745_v39 = vadd.f32 1.0, %v5731_v38  ;;  %5365 = vmatprep.subr.mxu1 %v924_v36  ;;  %v921_v38 = vld [vmem:[%s4925_s3] sm:$0xff] }
 0x713   :  { %v744_v40 = vadd.f32 1.0, %v5733_v5  ;;  %5366 = vmatpush3.msra.mxu1 %v924_v36 }
 0x714   :  { %5734 = vrcp.f32 %v745_v39  ;;  %5367 = vmatprep.subr.mxu1 %v923_v37 }
 0x715   :  { %5736 = vrcp.f32 %v744_v40  ;;  %5368 = vmatpush3.msra.mxu1 %v923_v37 }
 0x721   :  { %v5735_v41 = vpop.eup %5734 }
 0x722   :  { %v5737_v46 = vpop.eup %5736  ;;  %v753_v49 = vmul.f32 %v5735_v41, %v638_v15 }
 0x723   :  { %v752_v52 = vmul.f32 %v5737_v46, %v637_v18 }
 0x781   :  { %v759_v44 = vpop.permute.xlu1 %758 }
 0x782   :  { %v763_v45 = vmul.f32 %v5735_v41, %v759_v44 }
 0x783   :  { %v757_v47 = vpop.permute.xlu0 %756 }
 0x784   :  { %768 = vrot.lane.b32.xlu1 %v763_v45, %s6033_s23  ;;  %v762_v48 = vmul.f32 %v5737_v46, %v757_v47  ;;  %v1097_v47 = vld [vmem:[%s4928_s7 + $0x8] sm:$0xff] }
 0x786   :  { %766 = vrot.lane.b32.xlu0 %v762_v48, %s6033_s23  ;;  %v1096_v48 = vld [vmem:[%s4928_s7] sm:$0xff] }
 0x7f6   :  { %v769_v50 = vpop.permute.xlu1 %768 }
 0x7f7   :  { %v773_v51 = vadd.f32 %v769_v50, %v753_v49  ;;  %v6228_v49 = vld [vmem:[%s4929_s11 + $0x18] sm:$0xff] }
 0x7f8   :  { %v767_v53 = vpop.permute.xlu0 %766 }
 0x7f9   :  { %5738 = vtanh.f32 %v773_v51  ;;  %v772_v54 = vadd.f32 %v767_v53, %v752_v52  ;;  %v4986_v53 = vld [vmem:[%s4927_s15] ss:$0 sm:$0xff] }
 0x7fb   :  { %5740 = vtanh.f32 %v772_v54 }
 0x806   :  { %v5739_v55 = vpop.eup %5738 }
 0x807   :  { %780 = vrot.lane.b32.xlu1 %v5739_v55, %s6034_s24 }
 0x808   :  { %v5741_v56 = vpop.eup %5740 }
 0x809   :  { %778 = vrot.lane.b32.xlu0 %v5741_v56, %s6034_s24 }
 0x879   :  { %v781_v59 = vpop.permute.xlu1 %780 }
 0x87a   :  { %v785_v60 = vmul.f32 %v5735_v41, %v781_v59 }
 0x87b   :  { %v779_v61 = vpop.permute.xlu0 %778 }
 0x87c   :  { %790 = vrot.lane.b32.xlu1 %v785_v60, %s6035_s25  ;;  %v784_v62 = vmul.f32 %v5737_v46, %v779_v61 }
 0x87e   :  { %788 = vrot.lane.b32.xlu0 %v784_v62, %s6035_s25 }
 0x8ee   :  { %v791_v0 = vpop.permute.xlu1 %790 }
 0x8f0   :  { %v789_v63 = vpop.permute.xlu0 %788 }
 0x8f1   :  { %5362 = vmatprep.mubr.msk.f32.mxu0 %vm177_vm0, %v789_v63  ;;  %v6243_v63 = vld [vmem:[%s4929_s11 + $0x10] sm:$0xff] }
 0x8f2   :  { %5363 = vmatmul.mubr.msk.f32.vlgmr.msra.gmra.mxu0 %vm177_vm0, %v791_v0  ;;  %v6252_v0 = vld [vmem:[%s4929_s11 + $0x8] sm:$0xff] }
 0x8f3   :  { %5376 = vmatprep.mubr.msk.f32.mxu0 %vm177_vm0, %v6083_v2  ;;  %5373 = vmatpush3.msra.mxu0 %v922_v4 }
 0x8f4   :  { %5374 = vmatprep.subr.mxu0 %v921_v38 }
 0x8f5   :  { %5375 = vmatpush3.msra.mxu0 %v921_v38 }
 0x8f6   :  { %5377 = vmatmul.mubr.msk.f32.vlgmr.msra.gmra.mxu0 %vm177_vm0, %v6087_v3  ;;  %v1099_v3 = vld [vmem:[%s4928_s7 + $0x18] sm:$0xff] }
 0x8f7   :  { %5394 = vmatprep.mubr.msk.f32.mxu0 %vm177_vm0, %v6110_v7  ;;  %5379 = vmatprep.subr.mxu1 %v1099_v3  ;;  %v1098_v7 = vld [vmem:[%s4928_s7 + $0x10] sm:$0xff] }
 0x9b2   :  { %v5364_v8 = vpop.f32.mrf.mxu0 }
 0x9b3   :  { %v872_v9 = vadd.f32 %v5364_v8, %v5336_v1  ;;  %v6256_v1 = vld [vmem:[%s4929_s11] sm:$0xff] }
 0x9b4   :  { %v862_v11 = vpop.f32.mrf.mxu0  ;;  %v4987_v8 = vld [vmem:[%s4930_s21] ss:$0 sm:$0xff]  ;;  %s4942_s21 = sld [smem:[%s6755_s0 + %s6053_s16]]   ;;  %s6061_s16 = smov 28  }
 0x9b5   :  { %5742 = vtanh.f32 %v872_v9  ;;  %v871_v12 = vadd.f32 %v862_v11, %v379_v10  ;;  %v4981_v16 = vmul.f32 -1.442695, %v872_v9 }
 0x9b6   :  { %v5378_v50 = vpop.f32.mrf.mxu0 }
 0x9b7   :  { %5744 = vtanh.f32 %v871_v12  ;;  %v4980_v17 = vmul.f32 -1.442695, %v871_v12 }
 0x9b8   :  { %5746 = vpow2.f32 %v4981_v16 }
 0x9b9   :  { %5748 = vpow2.f32 %v4980_v17 }
 0x9c2   :  { %v5743_v14 = vpop.eup %5742 }
 0x9c3   :  { %893 = vrot.lane.b32.xlu1 %v5743_v14, %s6032_s22 }
 0x9c4   :  { %v5745_v15 = vpop.eup %5744 }
 0x9c5   :  { %891 = vrot.lane.b32.xlu0 %v5745_v15, %s6032_s22  ;;  %v5747_v18 = vpop.eup %5746 }
 0x9c6   :  { %v5749_v2 = vpop.eup %5748  ;;  %v880_v19 = vadd.f32 1.0, %v5747_v18 }
 0x9c7   :  { %v879_v20 = vadd.f32 1.0, %v5749_v2 }
 0x9c8   :  { %5750 = vrcp.f32 %v880_v19 }
 0x9c9   :  { %5752 = vrcp.f32 %v879_v20 }
 0x9d5   :  { %v5751_v23 = vpop.eup %5750 }
 0x9d6   :  { %v5753_v26 = vpop.eup %5752  ;;  %v888_v29 = vmul.f32 %v5751_v23, %v773_v51 }
 0x9d7   :  { %v887_v32 = vmul.f32 %v5753_v26, %v772_v54  ;;  %v1076_v54 = vpop.f32.mrf.mxu0 }
 0xa35   :  { %v894_v24 = vpop.permute.xlu1 %893 }
 0xa36   :  { %v898_v25 = vmul.f32 %v5751_v23, %v894_v24 }
 0xa37   :  { %v892_v27 = vpop.permute.xlu0 %891 }
 0xa38   :  { %903 = vrot.lane.b32.xlu1 %v898_v25, %s6033_s23  ;;  %v897_v28 = vmul.f32 %v5753_v26, %v892_v27 }
 0xa3a   :  { %901 = vrot.lane.b32.xlu0 %v897_v28, %s6033_s23 }
 0xaaa   :  { %v904_v30 = vpop.permute.xlu1 %903 }
 0xaab   :  { %v908_v31 = vadd.f32 %v904_v30, %v888_v29 }
 0xaac   :  { %v902_v33 = vpop.permute.xlu0 %901 }
 0xaad   :  { %5754 = vtanh.f32 %v908_v31  ;;  %v907_v34 = vadd.f32 %v902_v33, %v887_v32 }
 0xaaf   :  { %5756 = vtanh.f32 %v907_v34 }
 0xaba   :  { %v5755_v35 = vpop.eup %5754 }
 0xabb   :  { %915 = vrot.lane.b32.xlu1 %v5755_v35, %s6034_s24 }
 0xabc   :  { %v5757_v5 = vpop.eup %5756 }
 0xabd   :  { %913 = vrot.lane.b32.xlu0 %v5757_v5, %s6034_s24 }
 0xb2d   :  { %v916_v39 = vpop.permute.xlu1 %915 }
 0xb2e   :  { %v920_v40 = vmul.f32 %v5751_v23, %v916_v39 }
 0xb2f   :  { %v914_v41 = vpop.permute.xlu0 %913 }
 0xb30   :  { %929 = vrot.lane.b32.xlu1 %v920_v40, %s6035_s25  ;;  %v919_v44 = vmul.f32 %v5753_v26, %v914_v41 }
 0xb32   :  { %927 = vrot.lane.b32.xlu0 %v919_v44, %s6035_s25 }
 0xba2   :  { %v930_v46 = vpop.permute.xlu1 %929 }
 0xba4   :  { %v928_v45 = vpop.permute.xlu0 %927 }
 0xba5   :  { %5369 = vmatprep.mubr.msk.f32.mxu1 %vm177_vm0, %v928_v45 }
 0xba6   :  { %5370 = vmatmul.mubr.msk.f32.vlgmr.msra.gmra.mxu1 %vm177_vm0, %v930_v46 }
 0xba7   :  { %5380 = vmatpush3.msra.mxu1 %v1099_v3 }
 0xba8   :  { %5381 = vmatprep.subr.mxu1 %v1098_v7 }
 0xba9   :  { %5382 = vmatpush3.msra.mxu1 %v1098_v7 }
 0xbaa   :  { %5383 = vmatprep.subr.mxu1 %v1097_v47 }
 0xbab   :  { %5384 = vmatpush3.msra.mxu1 %v1097_v47 }
 0xbac   :  { %5385 = vmatprep.subr.mxu1 %v1096_v48 }
 0xbad   :  { %5386 = vmatpush3.msra.mxu1 %v1096_v48 }
 0xbae   :  { %5406 = vmatprep.subr.mxu1 %v6228_v49 }
 0xc66   :  { %v5371_v51 = vpop.f32.mrf.mxu1 }
 0xc67   :  { %v1082_v52 = vadd.f32 %v5378_v50, %v5371_v51 }
 0xc68   :  { %v1001_v55 = vpop.f32.mrf.mxu1 }
 0xc69   :  { %v1077_v56 = vadd.f32 %v1076_v54, %v1001_v55  ;;  %v6234_v59 = vadd.f32 %v4986_v53, %v1082_v52 }
 0xc6b   :  { %v6236_v60 = vadd.f32 %v4986_v53, %v1077_v56  ;;  %v1095_v62 = vmax.f32 %v6234_v59, 0.0 }
 0xc6d   :  { %v1094_v61 = vmax.f32 %v6236_v60, 0.0 }
 0xc6f   :  { %5387 = vmatprep.mubr.msk.f32.mxu1 %vm1111_vm1, %v1094_v61 }
 0xc70   :  { %5388 = vmatmul.mubr.msk.f32.vlgmr.msra.gmra.mxu1 %vm1111_vm1, %v1095_v62 }
 0xc71   :  { %5407 = vmatpush3.msra.mxu1 %v6228_v49  ;;  %5414 = vmatprep.mubr.f32.mxu1 %v6030_v6 }
 0xc72   :  { %5408 = vmatprep.subr.mxu1 %v6243_v63 }
 0xc73   :  { %5409 = vmatpush3.msra.mxu1 %v6243_v63 }
 0xc74   :  { %5410 = vmatprep.subr.mxu1 %v6252_v0 }
 0xc75   :  { %5411 = vmatpush3.msra.mxu1 %v6252_v0 }
 0xc76   :  { %5412 = vmatprep.subr.mxu1 %v6256_v1 }
 0xc77   :  { %5413 = vmatpush3.msra.mxu1 %v6256_v1 }
 0xc78   :  { %5415 = vmatmul.mubr.f32.vlgmr.msra.gmra.mxu1 %v6030_v6  ;;  %5428 = vmatprep.subr.mxu1 %v6228_v49 }
 0xc79   :  { %5429 = vmatpush3.msra.mxu1 %v6228_v49 }
 0xc7a   :  { %5430 = vmatprep.subr.mxu1 %v6243_v63 }
 0xc7b   :  { %5431 = vmatpush3.msra.mxu1 %v6243_v63 }
 0xc7c   :  { %5432 = vmatprep.subr.mxu1 %v6252_v0 }
 0xc7d   :  { %5433 = vmatpush3.msra.mxu1 %v6252_v0 }
 0xc7e   :  { %5434 = vmatprep.subr.mxu1 %v6256_v1 }
 0xc7f   :  { %5435 = vmatpush3.msra.mxu1 %v6256_v1 }
 0xd30   :  { %v5389_v9 = vpop.f32.mrf.mxu1 }
 0xd31   :  { %v1190_v10 = vadd.f32 %v5389_v9, %v4987_v8 }
 0xd32   :  { %v1184_v11 = vpop.f32.mrf.mxu1 }
 0xd33   :  { %v1185_v12 = vadd.f32 %v4987_v8, %v1184_v11  ;;  %5390 = vmatprep.subr.mxu0 %v1190_v10 }
 0xd34   :  { %5391 = vmatpush3.msra.mxu0 %v1190_v10 }
 0xd35   :  { %5392 = vmatprep.subr.mxu0 %v1185_v12 }
 0xd36   :  { %5393 = vmatpush3.msra.mxu0 %v1185_v12 }
 0xd37   :  { %5395 = vmatmul.mubr.msk.f32.vlgmr.msra.gmra.mxu0 %vm177_vm0, %v6124_v13  ;;  %5417 = vmatprep.subr.mxu0 %v6228_v49 }
 0xd38   :  { %5397 = vmatprep.mubr.msk.f32.mxu0 %vm177_vm0, %v6138_v42  ;;  %5418 = vmatpush3.msra.mxu0 %v6228_v49  ;;  %v5416_v13 = vpop.f32.mrf.mxu1 }
 0xd39   :  { %5419 = vmatprep.subr.mxu0 %v6243_v63 }
 0xd3a   :  { %5420 = vmatpush3.msra.mxu0 %v6243_v63 }
 0xd3b   :  { %5398 = vmatmul.mubr.msk.f32.gmra.mxu0 %vm177_vm0, %v6141_v43  ;;  %5421 = vmatprep.subr.mxu0 %v6252_v0 }
 0xd3c   :  { %5400 = vmatprep.mubr.msk.f32.mxu0 %vm177_vm0, %v6163_v21  ;;  %5422 = vmatpush3.msra.mxu0 %v6252_v0  ;;  %v1366_v21 = vpop.f32.mrf.mxu1 }
 0xd3d   :  { %5423 = vmatprep.subr.mxu0 %v6256_v1 }
 0xd3e   :  { %5424 = vmatpush3.msra.mxu0 %v6256_v1 }
 0xd3f   :  { %5401 = vmatmul.mubr.msk.f32.gmra.mxu0 %vm177_vm0, %v6166_v22  ;;  %5439 = vmatprep.subr.mxu0 %v6228_v49 }
 0xd40   :  { %5403 = vmatprep.mubr.msk.f32.mxu0 %vm177_vm0, %v6186_v57 }
 0xd43   :  { %5404 = vmatmul.mubr.msk.f32.gmra.mxu0 %vm177_vm0, %v6189_v58 }
 0xdf7   :  { %v5396_v42 = vpop.f32.mrf.mxu0 }
 0xdf8   :  { %v1376_v43 = vadd.f32 %v5416_v13, %v5396_v42 }
 0xdf9   :  { %v1259_v14 = vpop.f32.mrf.mxu0 }
 0xdfa   :  { %5758 = vtanh.f32 %v1376_v43  ;;  %v1375_v15 = vadd.f32 %v1366_v21, %v1259_v14  ;;  %v4999_v17 = vmul.f32 -1.442695, %v1376_v43 }
 0xdfb   :  { %v5399_v44 = vpop.f32.mrf.mxu0 }
 0xdfc   :  { %5760 = vtanh.f32 %v1375_v15  ;;  %v4998_v18 = vmul.f32 -1.442695, %v1375_v15 }
 0xdfd   :  { %5762 = vpow2.f32 %v4999_v17  ;;  %v1269_v45 = vpop.f32.mrf.mxu0 }
 0xdfe   :  { %5764 = vpow2.f32 %v4998_v18 }
 0xdff   :  { %v5402_v46 = vpop.f32.mrf.mxu0 }
 0xe01   :  { %v1279_v3 = vpop.f32.mrf.mxu0 }
 0xe03   :  { %v6312_v7 = vpop.f32.mrf.mxu0 }
 0xe05   :  { %v6314_v47 = vpop.f32.mrf.mxu0 }
 0xe07   :  { %v5759_v16 = vpop.eup %5758 }
 0xe08   :  { %1397 = vrot.lane.b32.xlu1 %v5759_v16, %s6042_s26 }
 0xe09   :  { %v5761_v22 = vpop.eup %5760 }
 0xe0a   :  { %1395 = vrot.lane.b32.xlu0 %v5761_v22, %s6042_s26  ;;  %v5763_v2 = vpop.eup %5762 }
 0xe0b   :  { %v5765_v19 = vpop.eup %5764  ;;  %v1384_v20 = vadd.f32 1.0, %v5763_v2 }
 0xe0c   :  { %v1383_v23 = vadd.f32 1.0, %v5765_v19 }
 0xe0d   :  { %5766 = vrcp.f32 %v1384_v20 }
 0xe0e   :  { %5768 = vrcp.f32 %v1383_v23 }
 0xe1a   :  { %v5767_v24 = vpop.eup %5766 }
 0xe1b   :  { %v5769_v27 = vpop.eup %5768  ;;  %v1392_v30 = vmul.f32 0.0, %v5767_v24 }
 0xe1c   :  { %v1391_v33 = vmul.f32 0.0, %v5769_v27 }
 0xe7a   :  { %v1398_v25 = vpop.permute.xlu1 %1397 }
 0xe7b   :  { %v1402_v26 = vmul.f32 %v5767_v24, %v1398_v25 }
 0xe7c   :  { %v1396_v28 = vpop.permute.xlu0 %1395 }
 0xe7d   :  { %1407 = vrot.lane.b32.xlu1 %v1402_v26, %s6034_s24  ;;  %v1401_v29 = vmul.f32 %v5769_v27, %v1396_v28 }
 0xe7f   :  { %1405 = vrot.lane.b32.xlu0 %v1401_v29, %s6034_s24 }
 0xeef   :  { %v1408_v31 = vpop.permute.xlu1 %1407 }
 0xef0   :  { %v1412_v32 = vadd.f32 %v1408_v31, %v1392_v30 }
 0xef1   :  { %v1406_v34 = vpop.permute.xlu0 %1405 }
 0xef2   :  { %5770 = vtanh.f32 %v1412_v32  ;;  %v1411_v35 = vadd.f32 %v1406_v34, %v1391_v33 }
 0xef4   :  { %5772 = vtanh.f32 %v1411_v35 }
 0xeff   :  { %v5771_v36 = vpop.eup %5770 }
 0xf00   :  { %1419 = vrot.lane.b32.xlu1 %v5771_v36, %s6042_s26 }
 0xf01   :  { %v5773_v37 = vpop.eup %5772 }
 0xf02   :  { %1417 = vrot.lane.b32.xlu0 %v5773_v37, %s6042_s26 }
 0xf72   :  { %v1420_v4 = vpop.permute.xlu1 %1419 }
 0xf73   :  { %v1424_v38 = vmul.f32 %v5767_v24, %v1420_v4 }
 0xf74   :  { %v1418_v5 = vpop.permute.xlu0 %1417 }
 0xf75   :  { %1429 = vrot.lane.b32.xlu1 %v1424_v38, %s6034_s24  ;;  %v1423_v39 = vmul.f32 %v5769_v27, %v1418_v5 }
 0xf77   :  { %1427 = vrot.lane.b32.xlu0 %v1423_v39, %s6034_s24 }
 0xfe7   :  { %v1430_v41 = vpop.permute.xlu1 %1429 }
 0xfe9   :  { %v1428_v40 = vpop.permute.xlu0 %1427 }
 0xfea   :  { %5425 = vmatprep.mubr.msk.f32.mxu0 %vm1111_vm1, %v1428_v40 }
 0xfeb   :  { %5426 = vmatmul.mubr.msk.f32.vlgmr.msra.gmra.mxu0 %vm1111_vm1, %v1430_v41 }
 0xfec   :  { %5440 = vmatpush3.msra.mxu0 %v6228_v49 }
 0xfed   :  { %5441 = vmatprep.subr.mxu0 %v6243_v63 }
 0xfee   :  { %5442 = vmatpush3.msra.mxu0 %v6243_v63 }
 0xfef   :  { %5443 = vmatprep.subr.mxu0 %v6252_v0 }
 0xff0   :  { %5444 = vmatpush3.msra.mxu0 %v6252_v0 }
 0xff1   :  { %5445 = vmatprep.subr.mxu0 %v6256_v1 }
 0xff2   :  { %5446 = vmatpush3.msra.mxu0 %v6256_v1 }
0x10ab   :  { %v5427_v48 = vpop.f32.mrf.mxu0 }
0x10ac   :  { %v1511_v49 = vadd.f32 %v5427_v48, %v5399_v44 }
0x10ad   :  { %v1501_v50 = vpop.f32.mrf.mxu0 }
0x10ae   :  { %5774 = vtanh.f32 %v1511_v49  ;;  %v1510_v51 = vadd.f32 %v1501_v50, %v1269_v45  ;;  %v5003_v54 = vmul.f32 -1.442695, %v1511_v49 }
0x10b0   :  { %5776 = vtanh.f32 %v1510_v51  ;;  %v5002_v55 = vmul.f32 -1.442695, %v1510_v51  ;;  %v1833_v51 = vld [vmem:[%s4931_s30 + $0x18] sm:$0xff] }
0x10b1   :  { %5778 = vpow2.f32 %v5003_v54  ;;  %5461 = vmatprep.subr.mxu0 %v1833_v51 }
0x10b2   :  { %5780 = vpow2.f32 %v5002_v55 }
0x10bb   :  { %v5775_v52 = vpop.eup %5774 }
0x10bc   :  { %1532 = vrot.lane.b32.xlu1 %v5775_v52, %s6042_s26 }
0x10bd   :  { %v5777_v53 = vpop.eup %5776 }
0x10be   :  { %1530 = vrot.lane.b32.xlu0 %v5777_v53, %s6042_s26  ;;  %v5779_v56 = vpop.eup %5778 }
0x10bf   :  { %v5781_v63 = vpop.eup %5780  ;;  %v1519_v0 = vadd.f32 1.0, %v5779_v56 }
0x10c0   :  { %v1518_v1 = vadd.f32 1.0, %v5781_v63 }
0x10c1   :  { %5782 = vrcp.f32 %v1519_v0  ;;  %v1832_v0 = vld [vmem:[%s4931_s30 + $0x10] sm:$0xff] }
0x10c2   :  { %5784 = vrcp.f32 %v1518_v1  ;;  %v1831_v1 = vld [vmem:[%s4931_s30 + $0x8] sm:$0xff] }
0x10ce   :  { %v5783_v8 = vpop.eup %5782 }
0x10cf   :  { %v5785_v11 = vpop.eup %5784  ;;  %v1527_v42 = vmul.f32 %v5783_v8, %v1412_v32 }
0x10d0   :  { %v1526_v14 = vmul.f32 %v5785_v11, %v1411_v35 }
0x112e   :  { %v1533_v9 = vpop.permute.xlu1 %1532 }
0x112f   :  { %v1537_v10 = vmul.f32 %v5783_v8, %v1533_v9 }
0x1130   :  { %v1531_v12 = vpop.permute.xlu0 %1530 }
0x1131   :  { %1542 = vrot.lane.b32.xlu1 %v1537_v10, %s6034_s24  ;;  %v1536_v13 = vmul.f32 %v5785_v11, %v1531_v12 }
0x1133   :  { %1540 = vrot.lane.b32.xlu0 %v1536_v13, %s6034_s24 }
0x11a3   :  { %v1543_v43 = vpop.permute.xlu1 %1542 }
0x11a4   :  { %v1547_v21 = vadd.f32 %v1543_v43, %v1527_v42 }
0x11a5   :  { %v1541_v15 = vpop.permute.xlu0 %1540 }
0x11a6   :  { %5786 = vtanh.f32 %v1547_v21  ;;  %v1546_v16 = vadd.f32 %v1541_v15, %v1526_v14 }
0x11a8   :  { %5788 = vtanh.f32 %v1546_v16 }
0x11b3   :  { %v5787_v22 = vpop.eup %5786 }
0x11b4   :  { %1554 = vrot.lane.b32.xlu1 %v5787_v22, %s6042_s26 }
0x11b5   :  { %v5789_v17 = vpop.eup %5788 }
0x11b6   :  { %1552 = vrot.lane.b32.xlu0 %v5789_v17, %s6042_s26 }
0x1226   :  { %v1555_v18 = vpop.permute.xlu1 %1554 }
0x1227   :  { %v1559_v2 = vmul.f32 %v5783_v8, %v1555_v18  ;;  %v1830_v8 = vld [vmem:[%s4931_s30] sm:$0xff]  ;;  %s4937_s30 = sld [smem:[%s6755_s0 + %s6048_s27]]   ;;  %s6055_s27 = smov 104  }
0x1228   :  { %v1553_v19 = vpop.permute.xlu0 %1552 }
0x1229   :  { %1564 = vrot.lane.b32.xlu1 %v1559_v2, %s6034_s24  ;;  %v1558_v20 = vmul.f32 %v5785_v11, %v1553_v19 }
0x122b   :  { %1562 = vrot.lane.b32.xlu0 %v1558_v20, %s6034_s24 }
0x129b   :  { %v1565_v24 = vpop.permute.xlu1 %1564 }
0x129d   :  { %v1563_v23 = vpop.permute.xlu0 %1562 }
0x129e   :  { %5436 = vmatprep.mubr.msk.f32.mxu1 %vm1111_vm1, %v1563_v23 }
0x129f   :  { %5437 = vmatmul.mubr.msk.f32.vlgmr.msra.gmra.mxu1 %vm1111_vm1, %v1565_v24 }
0x135f   :  { %v5438_v25 = vpop.f32.mrf.mxu1 }
0x1360   :  { %v1646_v26 = vadd.f32 %v5438_v25, %v5402_v46  ;;  %v1837_v25 = vld [vmem:[%s4932_s5 + $0x18] sm:$0xff] }
0x1361   :  { %v1636_v27 = vpop.f32.mrf.mxu1  ;;  %5450 = vmatprep.subr.mxu1 %v1837_v25 }
0x1362   :  { %5790 = vtanh.f32 %v1646_v26  ;;  %v1645_v28 = vadd.f32 %v1636_v27, %v1279_v3  ;;  %v5007_v31 = vmul.f32 -1.442695, %v1646_v26  ;;  %v1836_v26 = vld [vmem:[%s4932_s5 + $0x10] sm:$0xff]  ;;  %5451 = vmatpush3.msra.mxu1 %v1837_v25  ;;  %v1835_v27 = vld [vmem:[%s4932_s5 + $0x8] sm:$0xff] }
0x1363   :  { %5452 = vmatprep.subr.mxu1 %v1836_v26 }
0x1364   :  { %5792 = vtanh.f32 %v1645_v28  ;;  %v5006_v32 = vmul.f32 -1.442695, %v1645_v28  ;;  %5453 = vmatpush3.msra.mxu1 %v1836_v26 }
0x1365   :  { %5794 = vpow2.f32 %v5007_v31  ;;  %5454 = vmatprep.subr.mxu1 %v1835_v27 }
0x1366   :  { %5796 = vpow2.f32 %v5006_v32  ;;  %5455 = vmatpush3.msra.mxu1 %v1835_v27 }
0x136f   :  { %v5791_v29 = vpop.eup %5790 }
0x1370   :  { %1667 = vrot.lane.b32.xlu1 %v5791_v29, %s6042_s26  ;;  %v1834_v29 = vld [vmem:[%s4932_s5] sm:$0xff]  ;;  %s6050_s5 = smov 20  }
0x1371   :  { %v5793_v30 = vpop.eup %5792  ;;  %5456 = vmatprep.subr.mxu1 %v1834_v29  ;;  %s4940_s8 = sld [smem:[%s6755_s0 + %s6050_s5]]  }
0x1372   :  { %1665 = vrot.lane.b32.xlu0 %v5793_v30, %s6042_s26  ;;  %v5795_v33 = vpop.eup %5794  ;;  %5457 = vmatpush3.msra.mxu1 %v1834_v29  ;;  %s4944_s5 = sld [smem:[%s6755_s0 + %s6057_s1]]  }
0x1373   :  { %v5797_v34 = vpop.eup %5796  ;;  %v1654_v35 = vadd.f32 1.0, %v5795_v33 }
0x1374   :  { %v1653_v36 = vadd.f32 1.0, %v5797_v34 }
0x1375   :  { %5798 = vrcp.f32 %v1654_v35 }
0x1376   :  { %5800 = vrcp.f32 %v1653_v36  ;;  %v2010_v36 = vld [vmem:[%s4934_s9 + $0x8] sm:$0xff] }
0x1377   :  { %5472 = vmatprep.subr.mxu1 %v2010_v36 }
0x1382   :  { %v5799_v37 = vpop.eup %5798 }
0x1383   :  { %v5801_v5 = vpop.eup %5800  ;;  %v1662_v41 = vmul.f32 %v5799_v37, %v1547_v21 }
0x1384   :  { %v1661_v46 = vmul.f32 %v5801_v5, %v1546_v16 }
0x13e2   :  { %v1668_v4 = vpop.permute.xlu1 %1667 }
0x13e3   :  { %v1672_v38 = vmul.f32 %v5799_v37, %v1668_v4 }
0x13e4   :  { %v1666_v39 = vpop.permute.xlu0 %1665 }
0x13e5   :  { %1677 = vrot.lane.b32.xlu1 %v1672_v38, %s6034_s24  ;;  %v1671_v40 = vmul.f32 %v5801_v5, %v1666_v39  ;;  %v5016_v39 = vld [vmem:[%s4933_s13] ss:$0 sm:$0xff] }
0x13e7   :  { %1675 = vrot.lane.b32.xlu0 %v1671_v40, %s6034_s24 }
0x1457   :  { %v1678_v44 = vpop.permute.xlu1 %1677 }
0x1458   :  { %v6330_v45 = vadd.f32 %v1678_v44, %v1662_v41 }
0x1459   :  { %v1676_v3 = vpop.permute.xlu0 %1675 }
0x145a   :  { %5802 = vtanh.f32 %v6330_v45  ;;  %v6333_v48 = vadd.f32 %v1676_v3, %v1661_v46 }
0x145c   :  { %5804 = vtanh.f32 %v6333_v48 }
0x1467   :  { %v5803_v49 = vpop.eup %5802 }
0x1468   :  { %1689 = vrot.lane.b32.xlu1 %v5803_v49, %s6042_s26  ;;  %v6388_v49 = vld [vmem:[%s6097_s17] sm:$0xff] }
0x1469   :  { %v5805_v50 = vpop.eup %5804 }
0x146a   :  { %1687 = vrot.lane.b32.xlu0 %v5805_v50, %s6042_s26  ;;  %v6395_v50 = vld [vmem:[%s4935_s19 + $0x8] sm:$0xff] }
0x14da   :  { %v1690_v52 = vpop.permute.xlu1 %1689 }
0x14db   :  { %v1694_v53 = vmul.f32 %v5799_v37, %v1690_v52  ;;  %v2009_v37 = vld [vmem:[%s4934_s9] sm:$0xff]  ;;  %s6051_s9 = smov 19  }
0x14dc   :  { %v1688_v54 = vpop.permute.xlu0 %1687  ;;  %s4939_s12 = sld [smem:[%s6755_s0 + %s6051_s9]]  }
0x14dd   :  { %1699 = vrot.lane.b32.xlu1 %v1694_v53, %s6034_s24  ;;  %v1693_v55 = vmul.f32 %v5801_v5, %v1688_v54  ;;  %s4946_s9 = sld [smem:[%s6755_s0 + %s6058_s6]]  }
0x14de   :  { %s4952_s6 = sld [smem:[%s6755_s0 + %s6034_s24]]  }
0x14df   :  { %1697 = vrot.lane.b32.xlu0 %v1693_v55, %s6034_s24 }
0x154f   :  { %v1700_v63 = vpop.permute.xlu1 %1699 }
0x1551   :  { %v1698_v56 = vpop.permute.xlu0 %1697 }
0x1552   :  { %5447 = vmatprep.mubr.msk.f32.mxu0 %vm1111_vm1, %v1698_v56 }
0x1553   :  { %5448 = vmatmul.mubr.msk.f32.vlgmr.msra.gmra.mxu0 %vm1111_vm1, %v1700_v63  ;;  %v6414_v63 = vld [vmem:[%s6097_s17 + $0x8] sm:$0xff] }
0x1554   :  { %5462 = vmatpush3.msra.mxu0 %v1833_v51  ;;  %5469 = vmatprep.mubr.msk.f32.mxu0 %vm1111_vm1, %v1094_v61  ;;  %v6399_v51 = vld [vmem:[%s4935_s19] sm:$0xff] }
0x1555   :  { %5463 = vmatprep.subr.mxu0 %v1832_v0 }
0x1556   :  { %5464 = vmatpush3.msra.mxu0 %v1832_v0  ;;  %v6419_v0 = vld [vmem:[%s6097_s17 + $0x10] sm:$0xff] }
0x1557   :  { %5465 = vmatprep.subr.mxu0 %v1831_v1 }
0x1558   :  { %5466 = vmatpush3.msra.mxu0 %v1831_v1  ;;  %v6424_v1 = vld [vmem:[%s6097_s17 + $0x18] sm:$0xff] }
0x1559   :  { %5467 = vmatprep.subr.mxu0 %v1830_v8 }
0x155a   :  { %5468 = vmatpush3.msra.mxu0 %v1830_v8  ;;  %v6429_v8 = vld [vmem:[%s6097_s17 + $0x20] sm:$0xff] }
0x155b   :  { %5470 = vmatmul.mubr.msk.f32.vlgmr.msra.gmra.mxu0 %vm1111_vm1, %v1095_v62  ;;  %5495 = vmatprep.subr.mxu0 %v6395_v50 }
0x155c   :  { %5499 = vmatprep.mubr.f32.mxu0 %v6030_v6  ;;  %5496 = vmatpush3.msra.mxu0 %v6395_v50 }
0x155d   :  { %5497 = vmatprep.subr.mxu0 %v6399_v51 }
0x155e   :  { %5498 = vmatpush3.msra.mxu0 %v6399_v51 }
0x155f   :  { %5500 = vmatmul.mubr.f32.vlgmr.msra.gmra.mxu0 %v6030_v6  ;;  %5502 = vmatprep.subr.mxu0 %v6395_v50 }
0x1560   :  { %5503 = vmatpush3.msra.mxu0 %v6395_v50 }
0x1561   :  { %5504 = vmatprep.subr.mxu0 %v6399_v51 }
0x1562   :  { %5505 = vmatpush3.msra.mxu0 %v6399_v51 }
0x1563   :  { %5509 = vmatprep.subr.mxu0 %v6395_v50 }
0x1613   :  { %v5449_v9 = vpop.f32.mrf.mxu0 }
0x1614   :  { %v1781_v10 = vadd.f32 %v5449_v9, %v6312_v7  ;;  %v6434_v9 = vld [vmem:[%s6097_s17 + $0x28] sm:$0xff] }
0x1615   :  { %v1771_v60 = vpop.f32.mrf.mxu0 }
0x1616   :  { %5806 = vtanh.f32 %v1781_v10  ;;  %v1780_v61 = vadd.f32 %v1771_v60, %v6314_v47  ;;  %v5011_v13 = vmul.f32 -1.442695, %v1781_v10 }
0x1618   :  { %5808 = vtanh.f32 %v1780_v61  ;;  %v5010_v59 = vmul.f32 -1.442695, %v1780_v61 }
0x1619   :  { %5810 = vpow2.f32 %v5011_v13 }
0x161a   :  { %5812 = vpow2.f32 %v5010_v59 }
0x161b   :  { %v5471_v4 = vpop.f32.mrf.mxu0 }
0x161d   :  { %v1989_v40 = vpop.f32.mrf.mxu0 }
0x161f   :  { %v5501_v10 = vpop.f32.mrf.mxu0 }
0x1623   :  { %v5807_v11 = vpop.eup %5806 }
0x1624   :  { %1802 = vrot.lane.b32.xlu1 %v5807_v11, %s6042_s26  ;;  %v2272_v11 = vpop.f32.mrf.mxu0 }
0x1625   :  { %v5809_v12 = vpop.eup %5808 }
0x1626   :  { %1800 = vrot.lane.b32.xlu0 %v5809_v12, %s6042_s26  ;;  %v5811_v62 = vpop.eup %5810 }
0x1627   :  { %v5813_v42 = vpop.eup %5812  ;;  %v1789_v43 = vadd.f32 1.0, %v5811_v62 }
0x1628   :  { %v1788_v21 = vadd.f32 1.0, %v5813_v42 }
0x1629   :  { %5814 = vrcp.f32 %v1789_v43 }
0x162a   :  { %5816 = vrcp.f32 %v1788_v21 }
0x1636   :  { %v5815_v7 = vpop.eup %5814 }
0x1637   :  { %v5817_v15 = vpop.eup %5816  ;;  %v1797_v17 = vmul.f32 %v5815_v7, %v6330_v45 }
0x1638   :  { %v1796_v19 = vmul.f32 %v5817_v15, %v6333_v48 }
0x1696   :  { %v1803_v14 = vpop.permute.xlu1 %1802 }
0x1697   :  { %v1807_v47 = vmul.f32 %v5815_v7, %v1803_v14 }
0x1698   :  { %v1801_v16 = vpop.permute.xlu0 %1800 }
0x1699   :  { %1812 = vrot.lane.b32.xlu1 %v1807_v47, %s6034_s24  ;;  %v1806_v22 = vmul.f32 %v5817_v15, %v1801_v16 }
0x169b   :  { %1810 = vrot.lane.b32.xlu0 %v1806_v22, %s6034_s24 }
0x170b   :  { %v1813_v18 = vpop.permute.xlu1 %1812 }
0x170c   :  { %v1817_v2 = vadd.f32 %v1813_v18, %v1797_v17 }
0x170d   :  { %v1811_v20 = vpop.permute.xlu0 %1810 }
0x170e   :  { %5818 = vtanh.f32 %v1817_v2  ;;  %v1816_v23 = vadd.f32 %v1811_v20, %v1796_v19 }
0x1710   :  { %5820 = vtanh.f32 %v1816_v23 }
0x171b   :  { %v5819_v24 = vpop.eup %5818 }
0x171c   :  { %1824 = vrot.lane.b32.xlu1 %v5819_v24, %s6042_s26 }
0x171d   :  { %v5821_v28 = vpop.eup %5820 }
0x171e   :  { %1822 = vrot.lane.b32.xlu0 %v5821_v28, %s6042_s26  ;;  %s4936_s26 = sld [smem:[%s6755_s0 + %s6033_s23]]  }
0x1724   :  { %v5017_v52 = vld [vmem:[%s4936_s26] ss:$0 sm:$0xff]  ;;  %s6054_s26 = smov 112  }
0x178e   :  { %v1825_v30 = vpop.permute.xlu1 %1824 }
0x178f   :  { %v1829_v31 = vmul.f32 %v5815_v7, %v1825_v30 }
0x1790   :  { %v1823_v32 = vpop.permute.xlu0 %1822 }
0x1791   :  { %1842 = vrot.lane.b32.xlu1 %v1829_v31, %s6034_s24  ;;  %v1828_v33 = vmul.f32 %v5817_v15, %v1823_v32 }
0x1793   :  { %1840 = vrot.lane.b32.xlu0 %v1828_v33, %s6034_s24 }
0x1803   :  { %v1843_v35 = vpop.permute.xlu1 %1842 }
0x1805   :  { %v1841_v34 = vpop.permute.xlu0 %1840 }
0x1806   :  { %5458 = vmatprep.mubr.msk.f32.mxu1 %vm1111_vm1, %v1841_v34 }
0x1807   :  { %5459 = vmatmul.mubr.msk.f32.vlgmr.msra.gmra.mxu1 %vm1111_vm1, %v1843_v35 }
0x1808   :  { %5473 = vmatpush3.msra.mxu1 %v2010_v36 }
0x1809   :  { %5474 = vmatprep.subr.mxu1 %v2009_v37 }
0x180a   :  { %5475 = vmatpush3.msra.mxu1 %v2009_v37 }
0x18c7   :  { %v5460_v38 = vpop.f32.mrf.mxu1 }
0x18c8   :  { %v1995_v5 = vadd.f32 %v5471_v4, %v5460_v38 }
0x18c9   :  { %v1914_v41 = vpop.f32.mrf.mxu1 }
0x18ca   :  { %v1990_v44 = vadd.f32 %v1989_v40, %v1914_v41  ;;  %v6375_v45 = vadd.f32 %v5016_v39, %v1995_v5 }
0x18cc   :  { %v6377_v46 = vadd.f32 %v5016_v39, %v1990_v44  ;;  %v2008_v48 = vmax.f32 %v6375_v45, 0.0 }
0x18ce   :  { %v2007_v3 = vmax.f32 %v6377_v46, 0.0 }
0x18d0   :  { %5476 = vmatprep.mubr.msk.f32.mxu1 %vm177_vm0, %v2007_v3 }
0x18d1   :  { %5477 = vmatmul.mubr.msk.f32.vlgmr.msra.gmra.mxu1 %vm177_vm0, %v2008_v48 }
0x18d2   :  { %5483 = vmatprep.mubr.msk.f32.mxu1 %vm177_vm0, %v6388_v49 }
0x1991   :  { %v5478_v53 = vpop.f32.mrf.mxu1 }
0x1992   :  { %v2098_v54 = vadd.f32 %v5478_v53, %v5017_v52 }
0x1993   :  { %v2092_v55 = vpop.f32.mrf.mxu1 }
0x1994   :  { %v2093_v56 = vadd.f32 %v5017_v52, %v2092_v55  ;;  %5479 = vmatprep.subr.mxu1 %v2098_v54 }
0x1995   :  { %5480 = vmatpush3.msra.mxu1 %v2098_v54 }
0x1996   :  { %5481 = vmatprep.subr.mxu1 %v2093_v56 }
0x1997   :  { %5482 = vmatpush3.msra.mxu1 %v2093_v56 }
0x1998   :  { %5484 = vmatmul.mubr.msk.f32.vlgmr.msra.gmra.mxu1 %vm177_vm0, %v6414_v63 }
0x1999   :  { %5486 = vmatprep.mubr.msk.f32.mxu1 %vm177_vm0, %v6419_v0 }
0x199c   :  { %5487 = vmatmul.mubr.msk.f32.gmra.mxu1 %vm177_vm0, %v6424_v1 }
0x199d   :  { %5489 = vmatprep.mubr.msk.f32.mxu1 %vm177_vm0, %v6429_v8 }
0x19a0   :  { %5490 = vmatmul.mubr.msk.f32.gmra.mxu1 %vm177_vm0, %v6434_v9 }
0x19a1   :  { %5492 = vmatprep.mubr.msk.f32.mxu1 %vm177_vm0, %v6186_v57 }
0x19a4   :  { %5493 = vmatmul.mubr.msk.f32.gmra.mxu1 %vm177_vm0, %v6189_v58 }
0x1a58   :  { %v5485_v60 = vpop.f32.mrf.mxu1 }
0x1a59   :  { %v2282_v61 = vadd.f32 %v5501_v10, %v5485_v60 }
0x1a5a   :  { %v2167_v12 = vpop.f32.mrf.mxu1 }
0x1a5b   :  { %5822 = vtanh.f32 %v2282_v61  ;;  %v2281_v13 = vadd.f32 %v2272_v11, %v2167_v12  ;;  %v5029_v42 = vmul.f32 -1.442695, %v2282_v61 }
0x1a5c   :  { %v5488_v33 = vpop.f32.mrf.mxu1 }
0x1a5d   :  { %5824 = vtanh.f32 %v2281_v13  ;;  %v5028_v43 = vmul.f32 -1.442695, %v2281_v13 }
0x1a5e   :  { %5826 = vpow2.f32 %v5029_v42  ;;  %v2177_v36 = vpop.f32.mrf.mxu1 }
0x1a5f   :  { %5828 = vpow2.f32 %v5028_v43 }
0x1a68   :  { %v5823_v59 = vpop.eup %5822 }
0x1a69   :  { %2303 = vrot.lane.b32.xlu1 %v5823_v59, %s6032_s22 }
0x1a6a   :  { %v5825_v62 = vpop.eup %5824 }
0x1a6b   :  { %2301 = vrot.lane.b32.xlu0 %v5825_v62, %s6032_s22  ;;  %v5827_v57 = vpop.eup %5826 }
0x1a6c   :  { %v5829_v58 = vpop.eup %5828  ;;  %v2290_v21 = vadd.f32 1.0, %v5827_v57 }
0x1a6d   :  { %v2289_v7 = vadd.f32 1.0, %v5829_v58 }
0x1a6e   :  { %5830 = vrcp.f32 %v2290_v21 }
0x1a6f   :  { %5832 = vrcp.f32 %v2289_v7 }
0x1a7b   :  { %v5831_v14 = vpop.eup %5830 }
0x1a7c   :  { %v5833_v16 = vpop.eup %5832  ;;  %v2298_v18 = vmul.f32 0.0, %v5831_v14 }
0x1a7d   :  { %v2297_v20 = vmul.f32 0.0, %v5833_v16 }
0x1adb   :  { %v2304_v47 = vpop.permute.xlu1 %2303 }
0x1adc   :  { %v2308_v15 = vmul.f32 %v5831_v14, %v2304_v47 }
0x1add   :  { %v2302_v22 = vpop.permute.xlu0 %2301 }
0x1ade   :  { %2313 = vrot.lane.b32.xlu1 %v2308_v15, %s6033_s23  ;;  %v2307_v17 = vmul.f32 %v5833_v16, %v2302_v22 }
0x1ae0   :  { %2311 = vrot.lane.b32.xlu0 %v2307_v17, %s6033_s23 }
0x1b50   :  { %v2314_v2 = vpop.permute.xlu1 %2313 }
0x1b51   :  { %v2318_v19 = vadd.f32 %v2314_v2, %v2298_v18 }
0x1b52   :  { %v2312_v23 = vpop.permute.xlu0 %2311 }
0x1b53   :  { %5834 = vtanh.f32 %v2318_v19  ;;  %v2317_v24 = vadd.f32 %v2312_v23, %v2297_v20 }
0x1b55   :  { %5836 = vtanh.f32 %v2317_v24 }
0x1b60   :  { %v5835_v25 = vpop.eup %5834 }
0x1b61   :  { %2325 = vrot.lane.b32.xlu1 %v5835_v25, %s6034_s24 }
0x1b62   :  { %v5837_v26 = vpop.eup %5836 }
0x1b63   :  { %2323 = vrot.lane.b32.xlu0 %v5837_v26, %s6034_s24 }
0x1bd3   :  { %v2326_v27 = vpop.permute.xlu1 %2325 }
0x1bd4   :  { %v2330_v28 = vmul.f32 %v5831_v14, %v2326_v27 }
0x1bd5   :  { %v2324_v29 = vpop.permute.xlu0 %2323 }
0x1bd6   :  { %2335 = vrot.lane.b32.xlu1 %v2330_v28, %s6035_s25  ;;  %v2329_v30 = vmul.f32 %v5833_v16, %v2324_v29  ;;  %v5491_v16 = vpop.f32.mrf.mxu1 }
0x1bd8   :  { %2333 = vrot.lane.b32.xlu0 %v2329_v30, %s6035_s25  ;;  %v2187_v18 = vpop.f32.mrf.mxu1 }
0x1c48   :  { %v2336_v32 = vpop.permute.xlu1 %2335 }
0x1c4a   :  { %v2334_v31 = vpop.permute.xlu0 %2333 }
0x1c4b   :  { %5506 = vmatprep.mubr.msk.f32.mxu0 %vm177_vm0, %v2334_v31 }
0x1c4c   :  { %5507 = vmatmul.mubr.msk.f32.vlgmr.msra.gmra.mxu0 %vm177_vm0, %v2336_v32 }
0x1c4d   :  { %5510 = vmatpush3.msra.mxu0 %v6395_v50 }
0x1c4e   :  { %5511 = vmatprep.subr.mxu0 %v6399_v51 }
0x1c4f   :  { %5512 = vmatpush3.msra.mxu0 %v6399_v51 }
0x1c50   :  { %5516 = vmatprep.subr.mxu0 %v6395_v50 }
0x1d0c   :  { %v5508_v34 = vpop.f32.mrf.mxu0 }
0x1d0d   :  { %v2417_v35 = vadd.f32 %v5508_v34, %v5488_v33 }
0x1d0e   :  { %v2407_v37 = vpop.f32.mrf.mxu0 }
0x1d0f   :  { %5838 = vtanh.f32 %v2417_v35  ;;  %v2416_v4 = vadd.f32 %v2407_v37, %v2177_v36  ;;  %v5033_v39 = vmul.f32 -1.442695, %v2417_v35 }
0x1d11   :  { %5840 = vtanh.f32 %v2416_v4  ;;  %v5032_v40 = vmul.f32 -1.442695, %v2416_v4 }
0x1d12   :  { %5842 = vpow2.f32 %v5033_v39 }
0x1d13   :  { %5844 = vpow2.f32 %v5032_v40  ;;  %v2737_v40 = vld [vmem:[%s4937_s30 + $0x8] sm:$0xff] }
0x1d1c   :  { %v5839_v38 = vpop.eup %5838 }
0x1d1d   :  { %2438 = vrot.lane.b32.xlu1 %v5839_v38, %s6032_s22 }
0x1d1e   :  { %v5841_v5 = vpop.eup %5840 }
0x1d1f   :  { %2436 = vrot.lane.b32.xlu0 %v5841_v5, %s6032_s22  ;;  %v5843_v41 = vpop.eup %5842 }
0x1d20   :  { %v5845_v44 = vpop.eup %5844  ;;  %v2425_v52 = vadd.f32 1.0, %v5843_v41 }
0x1d21   :  { %v2424_v53 = vadd.f32 1.0, %v5845_v44 }
0x1d22   :  { %5846 = vrcp.f32 %v2425_v52 }
0x1d23   :  { %5848 = vrcp.f32 %v2424_v53 }
0x1d2f   :  { %v5847_v54 = vpop.eup %5846 }
0x1d30   :  { %v5849_v10 = vpop.eup %5848  ;;  %v2433_v11 = vmul.f32 %v5847_v54, %v2318_v19 }
0x1d31   :  { %v2432_v59 = vmul.f32 %v5849_v10, %v2317_v24 }
0x1d8f   :  { %v2439_v55 = vpop.permute.xlu1 %2438 }
0x1d90   :  { %v2443_v56 = vmul.f32 %v5847_v54, %v2439_v55 }
0x1d91   :  { %v2437_v60 = vpop.permute.xlu0 %2436 }
0x1d92   :  { %2448 = vrot.lane.b32.xlu1 %v2443_v56, %s6033_s23  ;;  %v2442_v61 = vmul.f32 %v5849_v10, %v2437_v60  ;;  %v2736_v56 = vld [vmem:[%s4937_s30] sm:$0xff] }
0x1d94   :  { %2446 = vrot.lane.b32.xlu0 %v2442_v61, %s6033_s23 }
0x1e04   :  { %v2449_v12 = vpop.permute.xlu1 %2448 }
0x1e05   :  { %v2453_v13 = vadd.f32 %v2449_v12, %v2433_v11 }
0x1e06   :  { %v2447_v62 = vpop.permute.xlu0 %2446 }
0x1e07   :  { %5850 = vtanh.f32 %v2453_v13  ;;  %v2452_v42 = vadd.f32 %v2447_v62, %v2432_v59 }
0x1e09   :  { %5852 = vtanh.f32 %v2452_v42 }
0x1e14   :  { %v5851_v43 = vpop.eup %5850 }
0x1e15   :  { %2460 = vrot.lane.b32.xlu1 %v5851_v43, %s6034_s24 }
0x1e16   :  { %v5853_v57 = vpop.eup %5852 }
0x1e17   :  { %2458 = vrot.lane.b32.xlu0 %v5853_v57, %s6034_s24 }
0x1e87   :  { %v2461_v58 = vpop.permute.xlu1 %2460 }
0x1e88   :  { %v2465_v21 = vmul.f32 %v5847_v54, %v2461_v58 }
0x1e89   :  { %v2459_v7 = vpop.permute.xlu0 %2458 }
0x1e8a   :  { %2470 = vrot.lane.b32.xlu1 %v2465_v21, %s6035_s25  ;;  %v2464_v14 = vmul.f32 %v5849_v10, %v2459_v7  ;;  %v5494_v10 = vpop.f32.mrf.mxu1 }
0x1e8c   :  { %2468 = vrot.lane.b32.xlu0 %v2464_v14, %s6035_s25  ;;  %v2197_v11 = vpop.f32.mrf.mxu1 }
0x1efc   :  { %v2471_v15 = vpop.permute.xlu1 %2470 }
0x1efe   :  { %v2469_v47 = vpop.permute.xlu0 %2468 }
0x1eff   :  { %5513 = vmatprep.mubr.msk.f32.mxu0 %vm177_vm0, %v2469_v47 }
0x1f00   :  { %5514 = vmatmul.mubr.msk.f32.vlgmr.msra.gmra.mxu0 %vm177_vm0, %v2471_v15 }
0x1f01   :  { %5517 = vmatpush3.msra.mxu0 %v6395_v50 }
0x1f02   :  { %5518 = vmatprep.subr.mxu0 %v6399_v51 }
0x1f03   :  { %5519 = vmatpush3.msra.mxu0 %v6399_v51 }
0x1f04   :  { %5530 = vmatprep.subr.mxu0 %v2737_v40 }
0x1fc0   :  { %v5515_v22 = vpop.f32.mrf.mxu0 }
0x1fc1   :  { %v2552_v17 = vadd.f32 %v5515_v22, %v5491_v16 }
0x1fc2   :  { %v2542_v2 = vpop.f32.mrf.mxu0 }
0x1fc3   :  { %5854 = vtanh.f32 %v2552_v17  ;;  %v2551_v19 = vadd.f32 %v2542_v2, %v2187_v18  ;;  %v5037_v24 = vmul.f32 -1.442695, %v2552_v17 }
0x1fc5   :  { %5856 = vtanh.f32 %v2551_v19  ;;  %v5036_v50 = vmul.f32 -1.442695, %v2551_v19 }
0x1fc6   :  { %5858 = vpow2.f32 %v5037_v24 }
0x1fc7   :  { %5860 = vpow2.f32 %v5036_v50 }
0x1fd0   :  { %v5855_v20 = vpop.eup %5854 }
0x1fd1   :  { %2573 = vrot.lane.b32.xlu1 %v5855_v20, %s6032_s22 }
0x1fd2   :  { %v5857_v23 = vpop.eup %5856 }
0x1fd3   :  { %2571 = vrot.lane.b32.xlu0 %v5857_v23, %s6032_s22  ;;  %v5859_v25 = vpop.eup %5858 }
0x1fd4   :  { %v5861_v51 = vpop.eup %5860  ;;  %v2560_v26 = vadd.f32 1.0, %v5859_v25 }
0x1fd5   :  { %v2559_v27 = vadd.f32 1.0, %v5861_v51 }
0x1fd6   :  { %5862 = vrcp.f32 %v2560_v26 }
0x1fd7   :  { %5864 = vrcp.f32 %v2559_v27 }
0x1fe3   :  { %v5863_v28 = vpop.eup %5862 }
0x1fe4   :  { %v5865_v31 = vpop.eup %5864  ;;  %v2568_v34 = vmul.f32 %v5863_v28, %v2453_v13 }
0x1fe5   :  { %v2567_v37 = vmul.f32 %v5865_v31, %v2452_v42 }
0x2043   :  { %v2574_v29 = vpop.permute.xlu1 %2573 }
0x2044   :  { %v2578_v30 = vmul.f32 %v5863_v28, %v2574_v29  ;;  %v2911_v29 = vld [vmem:[%s4940_s8] sm:$0xff] }
0x2045   :  { %v2572_v32 = vpop.permute.xlu0 %2571 }
0x2046   :  { %2583 = vrot.lane.b32.xlu1 %v2578_v30, %s6033_s23  ;;  %v2577_v33 = vmul.f32 %v5865_v31, %v2572_v32 }
0x2048   :  { %2581 = vrot.lane.b32.xlu0 %v2577_v33, %s6033_s23  ;;  %v5046_v33 = vld [vmem:[%s4939_s12] ss:$0 sm:$0xff] }
0x20b8   :  { %v2584_v35 = vpop.permute.xlu1 %2583 }
0x20b9   :  { %v2588_v36 = vadd.f32 %v2584_v35, %v2568_v34 }
0x20ba   :  { %v2582_v4 = vpop.permute.xlu0 %2581 }
0x20bb   :  { %5866 = vtanh.f32 %v2588_v36  ;;  %v2587_v38 = vadd.f32 %v2582_v4, %v2567_v37 }
0x20bd   :  { %5868 = vtanh.f32 %v2587_v38 }
0x20c8   :  { %v5867_v5 = vpop.eup %5866 }
0x20c9   :  { %2595 = vrot.lane.b32.xlu1 %v5867_v5, %s6034_s24 }
0x20ca   :  { %v5869_v39 = vpop.eup %5868 }
0x20cb   :  { %2593 = vrot.lane.b32.xlu0 %v5869_v39, %s6034_s24 }
0x213b   :  { %v2596_v41 = vpop.permute.xlu1 %2595 }
0x213c   :  { %v2600_v44 = vmul.f32 %v5863_v28, %v2596_v41 }
0x213d   :  { %v2594_v52 = vpop.permute.xlu0 %2593 }
0x213e   :  { %2605 = vrot.lane.b32.xlu1 %v2600_v44, %s6035_s25  ;;  %v2599_v53 = vmul.f32 %v5865_v31, %v2594_v52 }
0x2140   :  { %2603 = vrot.lane.b32.xlu0 %v2599_v53, %s6035_s25 }
0x21b0   :  { %v2606_v55 = vpop.permute.xlu1 %2605 }
0x21b2   :  { %v2604_v54 = vpop.permute.xlu0 %2603 }
0x21b3   :  { %5520 = vmatprep.mubr.msk.f32.mxu0 %vm177_vm0, %v2604_v54  ;;  %v6547_v54 = vld [vmem:[%s6097_s17 + $0x30] sm:$0xff] }
0x21b4   :  { %5521 = vmatmul.mubr.msk.f32.vlgmr.msra.gmra.mxu0 %vm177_vm0, %v2606_v55  ;;  %v6552_v55 = vld [vmem:[%s6097_s17 + $0x38] sm:$0xff] }
0x21b5   :  { %5531 = vmatpush3.msra.mxu0 %v2737_v40  ;;  %5534 = vmatprep.mubr.msk.f32.mxu0 %vm177_vm0, %v2007_v3  ;;  %v5047_v40 = vld [vmem:[%s4942_s21] ss:$0 sm:$0xff]  ;;  %s4948_s21 = sld [smem:[%s6755_s0 + %s6061_s16]]  }
0x21b6   :  { %5532 = vmatprep.subr.mxu0 %v2736_v56 }
0x21b7   :  { %5533 = vmatpush3.msra.mxu0 %v2736_v56 }
0x21b8   :  { %5535 = vmatmul.mubr.msk.f32.vlgmr.msra.gmra.mxu0 %vm177_vm0, %v2008_v48 }
0x21b9   :  { %5546 = vmatprep.mubr.msk.f32.mxu0 %vm177_vm0, %v6388_v49 }
0x2274   :  { %v5522_v60 = vpop.f32.mrf.mxu0 }
0x2275   :  { %v2687_v61 = vadd.f32 %v5522_v60, %v5494_v10 }
0x2276   :  { %v2677_v12 = vpop.f32.mrf.mxu0 }
0x2277   :  { %5870 = vtanh.f32 %v2687_v61  ;;  %v2686_v13 = vadd.f32 %v2677_v12, %v2197_v11  ;;  %v5041_v45 = vmul.f32 -1.442695, %v2687_v61 }
0x2278   :  { %v5536_v30 = vpop.f32.mrf.mxu0 }
0x2279   :  { %5872 = vtanh.f32 %v2686_v13  ;;  %v5040_v59 = vmul.f32 -1.442695, %v2686_v13 }
0x227a   :  { %5874 = vpow2.f32 %v5041_v45  ;;  %v2891_v34 = vpop.f32.mrf.mxu0 }
0x227b   :  { %5876 = vpow2.f32 %v5040_v59 }
0x2284   :  { %v5871_v46 = vpop.eup %5870 }
0x2285   :  { %2708 = vrot.lane.b32.xlu1 %v5871_v46, %s6032_s22 }
0x2286   :  { %v5873_v3 = vpop.eup %5872 }
0x2287   :  { %2706 = vrot.lane.b32.xlu0 %v5873_v3, %s6032_s22  ;;  %v5875_v48 = vpop.eup %5874  ;;  %s6049_s22 = smov 18  }
0x2288   :  { %v5877_v62 = vpop.eup %5876  ;;  %v2695_v42 = vadd.f32 1.0, %v5875_v48  ;;  %s4938_s3 = sld [smem:[%s6755_s0 + %s6049_s22]]  }
0x2289   :  { %v2694_v43 = vadd.f32 1.0, %v5877_v62  ;;  %s4943_s22 = sld [smem:[%s6755_s0 + %s6056_s28]]  }
0x228a   :  { %5878 = vrcp.f32 %v2695_v42 }
0x228b   :  { %5880 = vrcp.f32 %v2694_v43 }
0x228e   :  { %v2739_v20 = vld [vmem:[%s4938_s3 + $0x8] sm:$0xff]  ;;  %v2738_v23 = vld [vmem:[%s4938_s3] sm:$0xff] }
0x228f   :  { %5523 = vmatprep.subr.mxu1 %v2739_v20 }
0x2290   :  { %5524 = vmatpush3.msra.mxu1 %v2739_v20 }
0x2291   :  { %5525 = vmatprep.subr.mxu1 %v2738_v23 }
0x2292   :  { %5526 = vmatpush3.msra.mxu1 %v2738_v23 }
0x2293   :  { %5537 = vmatprep.subr.mxu1 %v2911_v29 }
0x2297   :  { %v5879_v57 = vpop.eup %5878 }
0x2298   :  { %v5881_v7 = vpop.eup %5880  ;;  %v2703_v15 = vmul.f32 %v5879_v57, %v2588_v36 }
0x2299   :  { %v2702_v17 = vmul.f32 %v5881_v7, %v2587_v38 }
0x22f7   :  { %v2709_v58 = vpop.permute.xlu1 %2708 }
0x22f8   :  { %v2713_v21 = vmul.f32 %v5879_v57, %v2709_v58 }
0x22f9   :  { %v2707_v14 = vpop.permute.xlu0 %2706 }
0x22fa   :  { %2718 = vrot.lane.b32.xlu1 %v2713_v21, %s6033_s23  ;;  %v2712_v47 = vmul.f32 %v5881_v7, %v2707_v14 }
0x22fc   :  { %2716 = vrot.lane.b32.xlu0 %v2712_v47, %s6033_s23 }
0x236c   :  { %v2719_v16 = vpop.permute.xlu1 %2718 }
0x236d   :  { %v2723_v22 = vadd.f32 %v2719_v16, %v2703_v15 }
0x236e   :  { %v2717_v18 = vpop.permute.xlu0 %2716 }
0x236f   :  { %5882 = vtanh.f32 %v2723_v22  ;;  %v2722_v2 = vadd.f32 %v2717_v18, %v2702_v17 }
0x2371   :  { %5884 = vtanh.f32 %v2722_v2 }
0x237c   :  { %v5883_v19 = vpop.eup %5882 }
0x237d   :  { %2730 = vrot.lane.b32.xlu1 %v5883_v19, %s6034_s24 }
0x237e   :  { %v5885_v24 = vpop.eup %5884 }
0x237f   :  { %2728 = vrot.lane.b32.xlu0 %v5885_v24, %s6034_s24 }
0x23ef   :  { %v2731_v50 = vpop.permute.xlu1 %2730 }
0x23f0   :  { %v2735_v25 = vmul.f32 %v5879_v57, %v2731_v50 }
0x23f1   :  { %v2729_v51 = vpop.permute.xlu0 %2728 }
0x23f2   :  { %2744 = vrot.lane.b32.xlu1 %v2735_v25, %s6035_s25  ;;  %v2734_v26 = vmul.f32 %v5881_v7, %v2729_v51 }
0x23f4   :  { %2742 = vrot.lane.b32.xlu0 %v2734_v26, %s6035_s25  ;;  %s6052_s25 = smov 21  }
0x23f5   :  { %s4941_s15 = sld [smem:[%s6755_s0 + %s6052_s25]]   ;;  %s6060_s25 = smov 27  }
0x23fb   :  { %v6525_v39 = vld [vmem:[%s4941_s15] sm:$0xff]  ;;  %s4947_s15 = sld [smem:[%s6755_s0 + %s6060_s25]]  }
0x2464   :  { %v2745_v28 = vpop.permute.xlu1 %2744 }
0x2466   :  { %v2743_v27 = vpop.permute.xlu0 %2742 }
0x2467   :  { %5527 = vmatprep.mubr.msk.f32.mxu1 %vm177_vm0, %v2743_v27 }
0x2468   :  { %5528 = vmatmul.mubr.msk.f32.vlgmr.msra.gmra.mxu1 %vm177_vm0, %v2745_v28 }
0x2469   :  { %5538 = vmatpush3.msra.mxu1 %v2911_v29 }
0x246a   :  { %5558 = vmatprep.subr.mxu1 %v6525_v39 }
0x2528   :  { %v5529_v31 = vpop.f32.mrf.mxu1 }
0x2529   :  { %v2897_v32 = vadd.f32 %v5536_v30, %v5529_v31 }
0x252a   :  { %v2816_v35 = vpop.f32.mrf.mxu1 }
0x252b   :  { %v2892_v36 = vadd.f32 %v2891_v34, %v2816_v35  ;;  %v6509_v37 = vadd.f32 %v5046_v33, %v2897_v32 }
0x252d   :  { %v6511_v4 = vadd.f32 %v5046_v33, %v2892_v36  ;;  %v2910_v5 = vmax.f32 %v6509_v37, 0.0 }
0x252f   :  { %v2909_v38 = vmax.f32 %v6511_v4, 0.0 }
0x2531   :  { %5539 = vmatprep.mubr.msk.f32.mxu1 %vm2920_vm2, %v2909_v38 }
0x2532   :  { %5540 = vmatmul.mubr.msk.f32.vlgmr.msra.gmra.mxu1 %vm2920_vm2, %v2910_v5 }
0x2533   :  { %5560 = vmatprep.mubr.f32.mxu1 %v6030_v6  ;;  %5559 = vmatpush3.msra.mxu1 %v6525_v39 }
0x2534   :  { %5563 = vmatprep.subr.mxu1 %v6525_v39 }
0x2536   :  { %5561 = vmatmul.mubr.f32.vlgmr.msra.gmra.mxu1 %v6030_v6 }
0x2537   :  { %5564 = vmatpush3.msra.mxu1 %v6525_v39 }
0x2538   :  { %5568 = vmatprep.subr.mxu1 %v6525_v39 }
0x25f2   :  { %v5541_v41 = vpop.f32.mrf.mxu1 }
0x25f3   :  { %v2999_v44 = vadd.f32 %v5541_v41, %v5047_v40 }
0x25f4   :  { %v2993_v52 = vpop.f32.mrf.mxu1 }
0x25f5   :  { %v2994_v53 = vadd.f32 %v5047_v40, %v2993_v52  ;;  %5542 = vmatprep.subr.mxu0 %v2999_v44 }
0x25f6   :  { %5543 = vmatpush3.msra.mxu0 %v2999_v44 }
0x25f7   :  { %5544 = vmatprep.subr.mxu0 %v2994_v53 }
0x25f8   :  { %5545 = vmatpush3.msra.mxu0 %v2994_v53 }
0x25f9   :  { %5547 = vmatmul.mubr.msk.f32.vlgmr.msra.gmra.mxu0 %vm177_vm0, %v6414_v63  ;;  %v5562_v63 = vpop.f32.mrf.mxu1 }
0x25fa   :  { %5549 = vmatprep.mubr.msk.f32.mxu0 %vm177_vm0, %v6419_v0 }
0x25fd   :  { %5550 = vmatmul.mubr.msk.f32.gmra.mxu0 %vm177_vm0, %v6424_v1  ;;  %v3175_v1 = vpop.f32.mrf.mxu1 }
0x25fe   :  { %5552 = vmatprep.mubr.msk.f32.mxu0 %vm177_vm0, %v6429_v8 }
0x2601   :  { %5553 = vmatmul.mubr.msk.f32.gmra.mxu0 %vm177_vm0, %v6434_v9 }
0x2602   :  { %5555 = vmatprep.mubr.msk.f32.mxu0 %vm177_vm0, %v6547_v54 }
0x2605   :  { %5556 = vmatmul.mubr.msk.f32.gmra.mxu0 %vm177_vm0, %v6552_v55 }
0x26b9   :  { %v5548_v0 = vpop.f32.mrf.mxu0 }
0x26ba   :  { %v3185_v56 = vadd.f32 %v5562_v63, %v5548_v0 }
0x26bb   :  { %v3068_v10 = vpop.f32.mrf.mxu0 }
0x26bc   :  { %5886 = vtanh.f32 %v3185_v56  ;;  %v3184_v8 = vadd.f32 %v3175_v1, %v3068_v10  ;;  %v5059_v61 = vmul.f32 -1.442695, %v3185_v56 }
0x26bd   :  { %v5551_v23 = vpop.f32.mrf.mxu0 }
0x26be   :  { %5888 = vtanh.f32 %v3184_v8  ;;  %v5058_v11 = vmul.f32 -1.442695, %v3184_v8 }
0x26bf   :  { %5890 = vpow2.f32 %v5059_v61  ;;  %v3078_v25 = vpop.f32.mrf.mxu0 }
0x26c0   :  { %5892 = vpow2.f32 %v5058_v11 }
0x26c9   :  { %v5887_v60 = vpop.eup %5886 }
0x26ca   :  { %3206 = vrot.lane.b32.xlu1 %v5887_v60, %s6054_s26 }
0x26cb   :  { %v5889_v9 = vpop.eup %5888 }
0x26cc   :  { %3204 = vrot.lane.b32.xlu0 %v5889_v9, %s6054_s26  ;;  %v5891_v12 = vpop.eup %5890 }
0x26cd   :  { %v5893_v13 = vpop.eup %5892  ;;  %v3193_v46 = vadd.f32 1.0, %v5891_v12 }
0x26ce   :  { %v3192_v3 = vadd.f32 1.0, %v5893_v13 }
0x26cf   :  { %5894 = vrcp.f32 %v3193_v46 }
0x26d0   :  { %5896 = vrcp.f32 %v3192_v3  ;;  %v5554_v3 = vpop.f32.mrf.mxu0 }
0x26dc   :  { %v5895_v45 = vpop.eup %5894 }
0x26dd   :  { %v5897_v62 = vpop.eup %5896  ;;  %v3201_v57 = vmul.f32 0.0, %v5895_v45 }
0x26de   :  { %v3200_v7 = vmul.f32 0.0, %v5897_v62 }
0x273c   :  { %v3207_v59 = vpop.permute.xlu1 %3206 }
0x273d   :  { %v3211_v48 = vmul.f32 %v5895_v45, %v3207_v59 }
0x273e   :  { %v3205_v42 = vpop.permute.xlu0 %3204 }
0x273f   :  { %3216 = vrot.lane.b32.xlu1 %v3211_v48, %s6038_s4  ;;  %v3210_v43 = vmul.f32 %v5897_v62, %v3205_v42  ;;  %v3088_v48 = vpop.f32.mrf.mxu0 }
0x2741   :  { %3214 = vrot.lane.b32.xlu0 %v3210_v43, %s6038_s4 }
0x27b1   :  { %v3217_v58 = vpop.permute.xlu1 %3216 }
0x27b2   :  { %v3221_v21 = vadd.f32 %v3217_v58, %v3201_v57 }
0x27b3   :  { %v3215_v14 = vpop.permute.xlu0 %3214 }
0x27b4   :  { %5898 = vtanh.f32 %v3221_v21  ;;  %v3220_v47 = vadd.f32 %v3215_v14, %v3200_v7 }
0x27b6   :  { %5900 = vtanh.f32 %v3220_v47 }
0x27c1   :  { %v5899_v15 = vpop.eup %5898 }
0x27c2   :  { %3228 = vrot.lane.b32.xlu1 %v5899_v15, %s6033_s23 }
0x27c3   :  { %v5901_v16 = vpop.eup %5900 }
0x27c4   :  { %3226 = vrot.lane.b32.xlu0 %v5901_v16, %s6033_s23 }
0x2834   :  { %v3229_v22 = vpop.permute.xlu1 %3228 }
0x2835   :  { %v3233_v17 = vmul.f32 %v5895_v45, %v3229_v22 }
0x2836   :  { %v3227_v18 = vpop.permute.xlu0 %3226 }
0x2837   :  { %3238 = vrot.lane.b32.xlu1 %v3233_v17, %s6055_s27  ;;  %v3232_v2 = vmul.f32 %v5897_v62, %v3227_v18 }
0x2839   :  { %3236 = vrot.lane.b32.xlu0 %v3232_v2, %s6055_s27 }
0x28a9   :  { %v3239_v20 = vpop.permute.xlu1 %3238 }
0x28ab   :  { %v3237_v19 = vpop.permute.xlu0 %3236 }
0x28ac   :  { %5565 = vmatprep.mubr.msk.f32.mxu1 %vm2920_vm2, %v3237_v19 }
0x28ad   :  { %5566 = vmatmul.mubr.msk.f32.vlgmr.msra.gmra.mxu1 %vm2920_vm2, %v3239_v20 }
0x28ae   :  { %5569 = vmatpush3.msra.mxu1 %v6525_v39 }
0x28af   :  { %5573 = vmatprep.subr.mxu1 %v6525_v39 }
0x296d   :  { %v5567_v24 = vpop.f32.mrf.mxu1 }
0x296e   :  { %v3320_v50 = vadd.f32 %v5567_v24, %v5551_v23 }
0x296f   :  { %v3310_v51 = vpop.f32.mrf.mxu1 }
0x2970   :  { %5902 = vtanh.f32 %v3320_v50  ;;  %v3319_v26 = vadd.f32 %v3310_v51, %v3078_v25  ;;  %v5063_v29 = vmul.f32 -1.442695, %v3320_v50 }
0x2972   :  { %5904 = vtanh.f32 %v3319_v26  ;;  %v5062_v30 = vmul.f32 -1.442695, %v3319_v26 }
0x2973   :  { %5906 = vpow2.f32 %v5063_v29 }
0x2974   :  { %5908 = vpow2.f32 %v5062_v30 }
0x297d   :  { %v5903_v27 = vpop.eup %5902 }
0x297e   :  { %3341 = vrot.lane.b32.xlu1 %v5903_v27, %s6054_s26  ;;  %v3639_v27 = vld [vmem:[%s4943_s22] sm:$0xff]  ;;  %s6065_s22 = smov 30  }
0x297f   :  { %v5905_v28 = vpop.eup %5904  ;;  %s4950_s3 = sld [smem:[%s6755_s0 + %s6065_s22]]  }
0x2980   :  { %3339 = vrot.lane.b32.xlu0 %v5905_v28, %s6054_s26  ;;  %v5907_v31 = vpop.eup %5906 }
0x2981   :  { %v5909_v32 = vpop.eup %5908  ;;  %v3328_v33 = vadd.f32 1.0, %v5907_v31 }
0x2982   :  { %v3327_v34 = vadd.f32 1.0, %v5909_v32 }
0x2983   :  { %5910 = vrcp.f32 %v3328_v33 }
0x2984   :  { %5912 = vrcp.f32 %v3327_v34  ;;  %v5557_v34 = vpop.f32.mrf.mxu0 }
0x2990   :  { %v5911_v35 = vpop.eup %5910 }
0x2991   :  { %v5913_v41 = vpop.eup %5912  ;;  %v3336_v53 = vmul.f32 %v5911_v35, %v3221_v21 }
0x2992   :  { %v3335_v56 = vmul.f32 %v5913_v41, %v3220_v47 }
0x29f0   :  { %v3342_v36 = vpop.permute.xlu1 %3341 }
0x29f1   :  { %v3346_v40 = vmul.f32 %v5911_v35, %v3342_v36 }
0x29f2   :  { %v3340_v44 = vpop.permute.xlu0 %3339 }
0x29f3   :  { %3351 = vrot.lane.b32.xlu1 %v3346_v40, %s6038_s4  ;;  %v3345_v52 = vmul.f32 %v5913_v41, %v3340_v44  ;;  %v3098_v40 = vpop.f32.mrf.mxu0 }
0x29f5   :  { %3349 = vrot.lane.b32.xlu0 %v3345_v52, %s6038_s4 }
0x2a65   :  { %v3352_v63 = vpop.permute.xlu1 %3351 }
0x2a66   :  { %v3356_v0 = vadd.f32 %v3352_v63, %v3336_v53 }
0x2a67   :  { %v3350_v1 = vpop.permute.xlu0 %3349 }
0x2a68   :  { %5914 = vtanh.f32 %v3356_v0  ;;  %v3355_v10 = vadd.f32 %v3350_v1, %v3335_v56 }
0x2a6a   :  { %5916 = vtanh.f32 %v3355_v10 }
0x2a75   :  { %v5915_v8 = vpop.eup %5914 }
0x2a76   :  { %3363 = vrot.lane.b32.xlu1 %v5915_v8, %s6033_s23 }
0x2a77   :  { %v5917_v60 = vpop.eup %5916 }
0x2a78   :  { %3361 = vrot.lane.b32.xlu0 %v5917_v60, %s6033_s23 }
0x2ae8   :  { %v3364_v9 = vpop.permute.xlu1 %3363 }
0x2ae9   :  { %v3368_v61 = vmul.f32 %v5911_v35, %v3364_v9 }
0x2aea   :  { %v3362_v11 = vpop.permute.xlu0 %3361 }
0x2aeb   :  { %3373 = vrot.lane.b32.xlu1 %v3368_v61, %s6055_s27  ;;  %v3367_v12 = vmul.f32 %v5913_v41, %v3362_v11 }
0x2aed   :  { %3371 = vrot.lane.b32.xlu0 %v3367_v12, %s6055_s27 }
0x2b5d   :  { %v3374_v46 = vpop.permute.xlu1 %3373 }
0x2b5f   :  { %v3372_v13 = vpop.permute.xlu0 %3371 }
0x2b60   :  { %5570 = vmatprep.mubr.msk.f32.mxu1 %vm2920_vm2, %v3372_v13 }
0x2b61   :  { %5571 = vmatmul.mubr.msk.f32.vlgmr.msra.gmra.mxu1 %vm2920_vm2, %v3374_v46 }
0x2b62   :  { %5574 = vmatpush3.msra.mxu1 %v6525_v39 }
0x2b63   :  { %5583 = vmatprep.subr.mxu1 %v3639_v27 }
0x2c21   :  { %v5572_v45 = vpop.f32.mrf.mxu1 }
0x2c22   :  { %v3455_v59 = vadd.f32 %v5572_v45, %v5554_v3  ;;  %v3640_v45 = vld [vmem:[%s4944_s5] sm:$0xff] }
0x2c23   :  { %v3445_v62 = vpop.f32.mrf.mxu1  ;;  %5578 = vmatprep.subr.mxu0 %v3640_v45 }
0x2c24   :  { %5918 = vtanh.f32 %v3455_v59  ;;  %v3454_v42 = vadd.f32 %v3445_v62, %v3088_v48  ;;  %v5067_v58 = vmul.f32 -1.442695, %v3455_v59  ;;  %5579 = vmatpush3.msra.mxu0 %v3640_v45 }
0x2c26   :  { %5920 = vtanh.f32 %v3454_v42  ;;  %v5066_v21 = vmul.f32 -1.442695, %v3454_v42 }
0x2c27   :  { %5922 = vpow2.f32 %v5067_v58 }
0x2c28   :  { %5924 = vpow2.f32 %v5066_v21  ;;  %v3812_v21 = vld [vmem:[%s4946_s9] sm:$0xf] }
0x2c29   :  { %5588 = vmatprep.subr.msk.mxu0 %vm3828_vm3, %v3812_v21 }
0x2c31   :  { %v5919_v43 = vpop.eup %5918 }
0x2c32   :  { %3476 = vrot.lane.b32.xlu1 %v5919_v43, %s6054_s26 }
0x2c33   :  { %v5921_v57 = vpop.eup %5920 }
0x2c34   :  { %3474 = vrot.lane.b32.xlu0 %v5921_v57, %s6054_s26  ;;  %v5923_v7 = vpop.eup %5922 }
0x2c35   :  { %v5925_v39 = vpop.eup %5924  ;;  %v3463_v14 = vadd.f32 1.0, %v5923_v7 }
0x2c36   :  { %v3462_v47 = vadd.f32 1.0, %v5925_v39 }
0x2c37   :  { %5926 = vrcp.f32 %v3463_v14 }
0x2c38   :  { %5928 = vrcp.f32 %v3462_v47 }
0x2c44   :  { %v5927_v15 = vpop.eup %5926 }
0x2c45   :  { %v5929_v17 = vpop.eup %5928  ;;  %v3471_v19 = vmul.f32 %v5927_v15, %v3356_v0 }
0x2c46   :  { %v3470_v24 = vmul.f32 %v5929_v17, %v3355_v10 }
0x2ca4   :  { %v3477_v16 = vpop.permute.xlu1 %3476 }
0x2ca5   :  { %v3481_v22 = vmul.f32 %v5927_v15, %v3477_v16 }
0x2ca6   :  { %v3475_v18 = vpop.permute.xlu0 %3474 }
0x2ca7   :  { %3486 = vrot.lane.b32.xlu1 %v3481_v22, %s6038_s4  ;;  %v3480_v2 = vmul.f32 %v5929_v17, %v3475_v18 }
0x2ca9   :  { %3484 = vrot.lane.b32.xlu0 %v3480_v2, %s6038_s4 }
0x2d19   :  { %v3487_v20 = vpop.permute.xlu1 %3486 }
0x2d1a   :  { %v3491_v23 = vadd.f32 %v3487_v20, %v3471_v19  ;;  %v6637_v20 = vld [vmem:[%s4947_s15] sm:$0xf]  ;;  %s6070_s15 = smov 35  }
0x2d1b   :  { %v3485_v50 = vpop.permute.xlu0 %3484  ;;  %s4955_s20 = sld [smem:[%s6755_s0 + %s6070_s15]]  }
0x2d1c   :  { %5930 = vtanh.f32 %v3491_v23  ;;  %v3490_v25 = vadd.f32 %v3485_v50, %v3470_v24 }
0x2d1e   :  { %5932 = vtanh.f32 %v3490_v25 }
0x2d29   :  { %v5931_v51 = vpop.eup %5930 }
0x2d2a   :  { %3498 = vrot.lane.b32.xlu1 %v5931_v51, %s6033_s23 }
0x2d2b   :  { %v5933_v26 = vpop.eup %5932 }
0x2d2c   :  { %3496 = vrot.lane.b32.xlu0 %v5933_v26, %s6033_s23  ;;  %v6022_v26 = vld [vmem:[%s6097_s17 + $0x8] sm:$0xff] }
0x2d9c   :  { %v3499_v28 = vpop.permute.xlu1 %3498 }
0x2d9d   :  { %v3503_v29 = vmul.f32 %v5927_v15, %v3499_v28  ;;  %v6024_v28 = vld [vmem:[%s6097_s17 + $0x18] sm:$0xff] }
0x2d9e   :  { %v3497_v30 = vpop.permute.xlu0 %3496 }
0x2d9f   :  { %3508 = vrot.lane.b32.xlu1 %v3503_v29, %s6055_s27  ;;  %v3502_v31 = vmul.f32 %v5929_v17, %v3497_v30  ;;  %v6025_v29 = vld [vmem:[%s6097_s17 + $0x20] sm:$0xff]  ;;  %v6026_v30 = vld [vmem:[%s6097_s17 + $0x28] sm:$0xff] }
0x2da1   :  { %3506 = vrot.lane.b32.xlu0 %v3502_v31, %s6055_s27 }
0x2e11   :  { %v3509_v33 = vpop.permute.xlu1 %3508 }
0x2e13   :  { %v3507_v32 = vpop.permute.xlu0 %3506 }
0x2e14   :  { %5575 = vmatprep.mubr.msk.f32.mxu1 %vm2920_vm2, %v3507_v32 }
0x2e15   :  { %5576 = vmatmul.mubr.msk.f32.vlgmr.msra.gmra.mxu1 %vm2920_vm2, %v3509_v33 }
0x2e16   :  { %5585 = vmatprep.mubr.msk.f32.mxu1 %vm2920_vm2, %v2909_v38  ;;  %5584 = vmatpush3.msra.mxu1 %v3639_v27  ;;  %v6023_v27 = vld [vmem:[%s6097_s17 + $0x10] sm:$0xff]  ;;  %s6063_s17 = smov 116  }
0x2e19   :  { %5586 = vmatmul.mubr.msk.f32.vlgmr.msra.gmra.mxu1 %vm2920_vm2, %v2910_v5 }
0x2e1a   :  { %5597 = vmatprep.mubr.msk.f32.mxu1 %vm177_vm0, %v6388_v49 }
0x2ed5   :  { %v5577_v35 = vpop.f32.mrf.mxu1 }
0x2ed6   :  { %v3590_v36 = vadd.f32 %v5577_v35, %v5557_v34 }
0x2ed7   :  { %v3580_v41 = vpop.f32.mrf.mxu1 }
0x2ed8   :  { %5934 = vtanh.f32 %v3590_v36  ;;  %v3589_v44 = vadd.f32 %v3580_v41, %v3098_v40  ;;  %v5071_v37 = vmul.f32 -1.442695, %v3590_v36 }
0x2ed9   :  { %v5587_v7 = vpop.f32.mrf.mxu1 }
0x2eda   :  { %5936 = vtanh.f32 %v3589_v44  ;;  %v5070_v38 = vmul.f32 -1.442695, %v3589_v44 }
0x2edb   :  { %5938 = vpow2.f32 %v5071_v37  ;;  %v3792_v15 = vpop.f32.mrf.mxu1 }
0x2edc   :  { %5940 = vpow2.f32 %v5070_v38 }
0x2ee5   :  { %v5935_v52 = vpop.eup %5934 }
0x2ee6   :  { %3611 = vrot.lane.b32.xlu1 %v5935_v52, %s6054_s26 }
0x2ee7   :  { %v5937_v4 = vpop.eup %5936 }
0x2ee8   :  { %3609 = vrot.lane.b32.xlu0 %v5937_v4, %s6054_s26  ;;  %v5939_v5 = vpop.eup %5938  ;;  %s6062_s26 = smov 120  }
0x2ee9   :  { %v5941_v49 = vpop.eup %5940  ;;  %v3598_v53 = vadd.f32 1.0, %v5939_v5 }
0x2eea   :  { %v3597_v63 = vadd.f32 1.0, %v5941_v49 }
0x2eeb   :  { %5942 = vrcp.f32 %v3598_v53 }
0x2eec   :  { %5944 = vrcp.f32 %v3597_v63 }
0x2ef8   :  { %v5943_v0 = vpop.eup %5942 }
0x2ef9   :  { %v5945_v10 = vpop.eup %5944  ;;  %v3606_v9 = vmul.f32 %v5943_v0, %v3491_v23  ;;  %v5077_v23 = vld [vmem:[%s4948_s21] ss:$0 sm:$0xff]  ;;  %s6071_s21 = smov 36  }
0x2efa   :  { %v3605_v12 = vmul.f32 %v5945_v10, %v3490_v25 }
0x2f58   :  { %v3612_v56 = vpop.permute.xlu1 %3611 }
0x2f59   :  { %v3616_v1 = vmul.f32 %v5943_v0, %v3612_v56 }
0x2f5a   :  { %v3610_v8 = vpop.permute.xlu0 %3609 }
0x2f5b   :  { %3621 = vrot.lane.b32.xlu1 %v3616_v1, %s6038_s4  ;;  %v3615_v60 = vmul.f32 %v5945_v10, %v3610_v8 }
0x2f5d   :  { %3619 = vrot.lane.b32.xlu0 %v3615_v60, %s6038_s4 }
0x2fcd   :  { %v3622_v61 = vpop.permute.xlu1 %3621 }
0x2fce   :  { %v3626_v11 = vadd.f32 %v3622_v61, %v3606_v9 }
0x2fcf   :  { %v3620_v13 = vpop.permute.xlu0 %3619 }
0x2fd0   :  { %5946 = vtanh.f32 %v3626_v11  ;;  %v3625_v46 = vadd.f32 %v3620_v13, %v3605_v12 }
0x2fd2   :  { %5948 = vtanh.f32 %v3625_v46 }
0x2fdd   :  { %v5947_v3 = vpop.eup %5946 }
0x2fde   :  { %3633 = vrot.lane.b32.xlu1 %v5947_v3, %s6033_s23 }
0x2fdf   :  { %v5949_v59 = vpop.eup %5948 }
0x2fe0   :  { %3631 = vrot.lane.b32.xlu0 %v5949_v59, %s6033_s23  ;;  %s6059_s23 = smov 25  }
0x2fe1   :  { %s4945_s12 = sld [smem:[%s6755_s0 + %s6059_s23]]   ;;  %s6068_s23 = smov 31  }
0x2fe2   :  { %s4951_s24 = sld [smem:[%s6755_s0 + %s6068_s23]]  }
0x2fe7   :  { %v5076_v47 = vld [vmem:[%s4945_s12] ss:$0 sm:$0xff]  ;;  %s6069_s12 = smov 34  }
0x2fe8   :  { %s4954_s14 = sld [smem:[%s6755_s0 + %s6069_s12]]  }
0x3050   :  { %v3634_v48 = vpop.permute.xlu1 %3633 }
0x3051   :  { %v3638_v62 = vmul.f32 %v5943_v0, %v3634_v48 }
0x3052   :  { %v3632_v42 = vpop.permute.xlu0 %3631 }
0x3053   :  { %3645 = vrot.lane.b32.xlu1 %v3638_v62, %s6055_s27  ;;  %v3637_v43 = vmul.f32 %v5945_v10, %v3632_v42 }
0x3055   :  { %3643 = vrot.lane.b32.xlu0 %v3637_v43, %s6055_s27  ;;  %s6064_s27 = smov 29  }
0x3056   :  { %s4949_s30 = sld [smem:[%s6755_s0 + %s6064_s27]]  }
0x3057   :  { %s4956_s27 = sld [smem:[%s6755_s0 + %s6071_s21]]  }
0x30c5   :  { %v3646_v58 = vpop.permute.xlu1 %3645 }
0x30c7   :  { %v3644_v57 = vpop.permute.xlu0 %3643 }
0x30c8   :  { %5580 = vmatprep.mubr.msk.f32.mxu0 %vm2920_vm2, %v3644_v57 }
0x30c9   :  { %5581 = vmatmul.mubr.msk.f32.vlgmr.msra.gmra.mxu0 %vm2920_vm2, %v3646_v58 }
0x30ca   :  { %5589 = vmatpush3.msk.msra.mxu0 %vm3828_vm3, %v3812_v21 }
0x30cb   :  { %5609 = vmatprep.subr.msk.mxu0 %vm3828_vm3, %v6637_v20 }
0x3189   :  { %v5582_v39 = vpop.f32.mrf.mxu0 }
0x318a   :  { %v3798_v14 = vadd.f32 %v5587_v7, %v5582_v39 }
0x318b   :  { %v3717_v16 = vpop.f32.mrf.mxu0 }
0x318c   :  { %v3793_v22 = vadd.f32 %v3792_v15, %v3717_v16  ;;  %v6621_v17 = vadd.f32 %v5076_v47, %v3798_v14 }
0x318e   :  { %v6623_v18 = vadd.f32 %v5076_v47, %v3793_v22  ;;  %v3811_v19 = vmax.f32 %v6621_v17, 0.0 }
0x3190   :  { %v3810_v2 = vmax.f32 %v6623_v18, 0.0 }
0x3192   :  { %5590 = vmatprep.mubr.msk.f32.mxu0 %vm3821_vm4, %v3810_v2 }
0x3193   :  { %5591 = vmatmul.mubr.msk.f32.vlgmr.msra.gmra.mxu0 %vm3821_vm4, %v3811_v19 }
0x3194   :  { %5611 = vmatprep.mubr.f32.mxu0 %v6030_v6  ;;  %5610 = vmatpush3.msk.msra.mxu0 %vm3828_vm3, %v6637_v20 }
0x3195   :  { %5614 = vmatprep.subr.msk.mxu0 %vm3828_vm3, %v6637_v20 }
0x3197   :  { %5612 = vmatmul.mubr.f32.vlgmr.msra.gmra.mxu0 %v6030_v6 }
0x3198   :  { %5615 = vmatpush3.msk.msra.mxu0 %vm3828_vm3, %v6637_v20 }
0x3199   :  { %5619 = vmatprep.subr.msk.mxu0 %vm3828_vm3, %v6637_v20 }
0x3253   :  { %v5592_v24 = vpop.f32.mrf.mxu0 }
0x3254   :  { %v3904_v50 = vadd.f32 %v5592_v24, %v5077_v23 }
0x3255   :  { %v3898_v25 = vpop.f32.mrf.mxu0 }
0x3256   :  { %v3899_v51 = vadd.f32 %v5077_v23, %v3898_v25  ;;  %5593 = vmatprep.subr.mxu1 %v3904_v50 }
0x3257   :  { %5594 = vmatpush3.msra.mxu1 %v3904_v50  ;;  %v5613_v31 = vpop.f32.mrf.mxu0 }
0x3258   :  { %5595 = vmatprep.subr.mxu1 %v3899_v51 }
0x3259   :  { %5596 = vmatpush3.msra.mxu1 %v3899_v51  ;;  %v4083_v34 = vpop.f32.mrf.mxu0 }
0x325a   :  { %5598 = vmatmul.mubr.msk.f32.vlgmr.msra.gmra.mxu1 %vm177_vm0, %v6022_v26 }
0x325b   :  { %5600 = vmatprep.mubr.msk.f32.mxu1 %vm177_vm0, %v6023_v27 }
0x325e   :  { %5601 = vmatmul.mubr.msk.f32.gmra.mxu1 %vm177_vm0, %v6024_v28 }
0x325f   :  { %5603 = vmatprep.mubr.msk.f32.mxu1 %vm177_vm0, %v6025_v29 }
0x3262   :  { %5604 = vmatmul.mubr.msk.f32.gmra.mxu1 %vm177_vm0, %v6026_v30 }
0x3263   :  { %5606 = vmatprep.mubr.msk.f32.mxu1 %vm177_vm0, %v6547_v54 }
0x3266   :  { %5607 = vmatmul.mubr.msk.f32.gmra.mxu1 %vm177_vm0, %v6552_v55 }
0x331a   :  { %v5599_v32 = vpop.f32.mrf.mxu1 }
0x331b   :  { %v4093_v33 = vadd.f32 %v5613_v31, %v5599_v32 }
0x331c   :  { %v3973_v35 = vpop.f32.mrf.mxu1 }
0x331d   :  { %5950 = vtanh.f32 %v4093_v33  ;;  %v4092_v36 = vadd.f32 %v4083_v34, %v3973_v35  ;;  %v5091_v44 = vmul.f32 -1.442695, %v4093_v33 }
0x331e   :  { %v5602_v48 = vpop.f32.mrf.mxu1 }
0x331f   :  { %5952 = vtanh.f32 %v4092_v36  ;;  %v5090_v54 = vmul.f32 -1.442695, %v4092_v36 }
0x3320   :  { %5954 = vpow2.f32 %v5091_v44  ;;  %v3983_v43 = vpop.f32.mrf.mxu1 }
0x3321   :  { %5956 = vpow2.f32 %v5090_v54 }
0x332a   :  { %v5951_v40 = vpop.eup %5950 }
0x332b   :  { %4114 = vrot.lane.b32.xlu1 %v5951_v40, %s6062_s26 }
0x332c   :  { %v5953_v41 = vpop.eup %5952 }
0x332d   :  { %4112 = vrot.lane.b32.xlu0 %v5953_v41, %s6062_s26  ;;  %v5955_v55 = vpop.eup %5954 }
0x332e   :  { %v5957_v52 = vpop.eup %5956  ;;  %v4101_v4 = vadd.f32 1.0, %v5955_v55  ;;  %v5605_v55 = vpop.f32.mrf.mxu1 }
0x332f   :  { %v4100_v37 = vadd.f32 1.0, %v5957_v52 }
0x3330   :  { %5958 = vrcp.f32 %v4101_v4 }
0x3331   :  { %5960 = vrcp.f32 %v4100_v37  ;;  %v3993_v37 = vpop.f32.mrf.mxu1 }
0x333d   :  { %v5959_v38 = vpop.eup %5958 }
0x333e   :  { %v5961_v53 = vpop.eup %5960  ;;  %v4109_v56 = vmul.f32 0.0, %v5959_v38 }
0x333f   :  { %v4108_v8 = vmul.f32 0.0, %v5961_v53 }
0x339d   :  { %v4115_v5 = vpop.permute.xlu1 %4114 }
0x339e   :  { %v4119_v49 = vmul.f32 %v5959_v38, %v4115_v5 }
0x339f   :  { %v4113_v63 = vpop.permute.xlu0 %4112 }
0x33a0   :  { %4124 = vrot.lane.b32.xlu1 %v4119_v49, %s6031_s18  ;;  %v4118_v0 = vmul.f32 %v5961_v53, %v4113_v63 }
0x33a2   :  { %4122 = vrot.lane.b32.xlu0 %v4118_v0, %s6031_s18 }
0x3412   :  { %v4125_v1 = vpop.permute.xlu1 %4124 }
0x3413   :  { %v4129_v10 = vadd.f32 %v4125_v1, %v4109_v56 }
0x3414   :  { %v4123_v60 = vpop.permute.xlu0 %4122 }
0x3415   :  { %5962 = vtanh.f32 %v4129_v10  ;;  %v4128_v9 = vadd.f32 %v4123_v60, %v4108_v8 }
0x3417   :  { %5964 = vtanh.f32 %v4128_v9 }
0x3422   :  { %v5963_v61 = vpop.eup %5962 }
0x3423   :  { %4136 = vrot.lane.b32.xlu1 %v5963_v61, %s6038_s4 }
0x3424   :  { %v5965_v11 = vpop.eup %5964 }
0x3425   :  { %4134 = vrot.lane.b32.xlu0 %v5965_v11, %s6038_s4 }
0x3495   :  { %v4137_v12 = vpop.permute.xlu1 %4136 }
0x3496   :  { %v4141_v13 = vmul.f32 %v5959_v38, %v4137_v12 }
0x3497   :  { %v4135_v46 = vpop.permute.xlu0 %4134 }
0x3498   :  { %4146 = vrot.lane.b32.xlu1 %v4141_v13, %s6063_s17  ;;  %v4140_v3 = vmul.f32 %v5961_v53, %v4135_v46 }
0x349a   :  { %4144 = vrot.lane.b32.xlu0 %v4140_v3, %s6063_s17 }
0x350a   :  { %v4147_v59 = vpop.permute.xlu1 %4146 }
0x350c   :  { %v4145_v45 = vpop.permute.xlu0 %4144 }
0x350d   :  { %5616 = vmatprep.mubr.msk.f32.mxu0 %vm3821_vm4, %v4145_v45 }
0x350e   :  { %5617 = vmatmul.mubr.msk.f32.vlgmr.msra.gmra.mxu0 %vm3821_vm4, %v4147_v59 }
0x350f   :  { %5620 = vmatpush3.msk.msra.mxu0 %vm3828_vm3, %v6637_v20 }
0x3510   :  { %5624 = vmatprep.subr.msk.mxu0 %vm3828_vm3, %v6637_v20 }
0x35ce   :  { %v5618_v62 = vpop.f32.mrf.mxu0 }
0x35cf   :  { %v4228_v42 = vadd.f32 %v5618_v62, %v5602_v48 }
0x35d0   :  { %v4218_v57 = vpop.f32.mrf.mxu0 }
0x35d1   :  { %5966 = vtanh.f32 %v4228_v42  ;;  %v4227_v58 = vadd.f32 %v4218_v57, %v3983_v43  ;;  %v5096_v39 = vmul.f32 -1.442695, %v4228_v42  ;;  %v4547_v43 = vld [vmem:[%s4949_s30] sm:$0xf] }
0x35d3   :  { %5968 = vtanh.f32 %v4227_v58  ;;  %v5095_v14 = vmul.f32 -1.442695, %v4227_v58 }
0x35d4   :  { %5970 = vpow2.f32 %v5096_v39 }
0x35d5   :  { %5972 = vpow2.f32 %v5095_v14 }
0x35de   :  { %v5967_v21 = vpop.eup %5966 }
0x35df   :  { %4249 = vrot.lane.b32.xlu1 %v5967_v21, %s6062_s26 }
0x35e0   :  { %v5969_v7 = vpop.eup %5968 }
0x35e1   :  { %4247 = vrot.lane.b32.xlu0 %v5969_v7, %s6062_s26  ;;  %v5971_v47 = vpop.eup %5970 }
0x35e2   :  { %v5973_v15 = vpop.eup %5972  ;;  %v4236_v16 = vadd.f32 1.0, %v5971_v47  ;;  %v5608_v47 = vpop.f32.mrf.mxu1 }
0x35e3   :  { %v4235_v22 = vadd.f32 1.0, %v5973_v15 }
0x35e4   :  { %5974 = vrcp.f32 %v4236_v16 }
0x35e5   :  { %5976 = vrcp.f32 %v4235_v22  ;;  %v4003_v22 = vpop.f32.mrf.mxu1 }
0x35f1   :  { %v5975_v23 = vpop.eup %5974 }
0x35f2   :  { %v5977_v25 = vpop.eup %5976  ;;  %v4244_v27 = vmul.f32 %v5975_v23, %v4129_v10 }
0x35f3   :  { %v4243_v30 = vmul.f32 %v5977_v25, %v4128_v9 }
0x3651   :  { %v4250_v24 = vpop.permute.xlu1 %4249 }
0x3652   :  { %v4254_v50 = vmul.f32 %v5975_v23, %v4250_v24 }
0x3653   :  { %v4248_v51 = vpop.permute.xlu0 %4247 }
0x3654   :  { %4259 = vrot.lane.b32.xlu1 %v4254_v50, %s6031_s18  ;;  %v4253_v26 = vmul.f32 %v5977_v25, %v4248_v51 }
0x3656   :  { %4257 = vrot.lane.b32.xlu0 %v4253_v26, %s6031_s18 }
0x36c6   :  { %v4260_v28 = vpop.permute.xlu1 %4259 }
0x36c7   :  { %v4264_v29 = vadd.f32 %v4260_v28, %v4244_v27 }
0x36c8   :  { %v4258_v31 = vpop.permute.xlu0 %4257 }
0x36c9   :  { %5978 = vtanh.f32 %v4264_v29  ;;  %v4263_v32 = vadd.f32 %v4258_v31, %v4243_v30 }
0x36cb   :  { %5980 = vtanh.f32 %v4263_v32 }
0x36d6   :  { %v5979_v33 = vpop.eup %5978 }
0x36d7   :  { %4271 = vrot.lane.b32.xlu1 %v5979_v33, %s6038_s4 }
0x36d8   :  { %v5981_v34 = vpop.eup %5980 }
0x36d9   :  { %4269 = vrot.lane.b32.xlu0 %v5981_v34, %s6038_s4 }
0x3749   :  { %v4272_v35 = vpop.permute.xlu1 %4271 }
0x374a   :  { %v4276_v36 = vmul.f32 %v5975_v23, %v4272_v35 }
0x374b   :  { %v4270_v40 = vpop.permute.xlu0 %4269 }
0x374c   :  { %4281 = vrot.lane.b32.xlu1 %v4276_v36, %s6063_s17  ;;  %v4275_v41 = vmul.f32 %v5977_v25, %v4270_v40 }
0x374e   :  { %4279 = vrot.lane.b32.xlu0 %v4275_v41, %s6063_s17 }
0x37be   :  { %v4282_v54 = vpop.permute.xlu1 %4281 }
0x37c0   :  { %v4280_v44 = vpop.permute.xlu0 %4279 }
0x37c1   :  { %5621 = vmatprep.mubr.msk.f32.mxu0 %vm3821_vm4, %v4280_v44 }
0x37c2   :  { %5622 = vmatmul.mubr.msk.f32.vlgmr.msra.gmra.mxu0 %vm3821_vm4, %v4282_v54  ;;  %v4548_v54 = vld [vmem:[%s4950_s3] sm:$0xf] }
0x37c3   :  { %5625 = vmatpush3.msk.msra.mxu0 %vm3828_vm3, %v6637_v20  ;;  %5629 = vmatprep.subr.msk.mxu1 %vm3828_vm3, %v4548_v54 }
0x37c4   :  { %5634 = vmatprep.subr.msk.mxu0 %vm3828_vm3, %v4547_v43  ;;  %5630 = vmatpush3.msk.msra.mxu1 %vm3828_vm3, %v4548_v54 }
0x37c5   :  { %5639 = vmatprep.subr.mxu1 %v6030_v6 }
0x3882   :  { %v5623_v52 = vpop.f32.mrf.mxu0 }
0x3883   :  { %v4363_v4 = vadd.f32 %v5623_v52, %v5605_v55 }
0x3884   :  { %v4353_v38 = vpop.f32.mrf.mxu0 }
0x3885   :  { %5982 = vtanh.f32 %v4363_v4  ;;  %v4362_v5 = vadd.f32 %v4353_v38, %v3993_v37  ;;  %v5101_v63 = vmul.f32 -1.442695, %v4363_v4 }
0x3887   :  { %5984 = vtanh.f32 %v4362_v5  ;;  %v5100_v0 = vmul.f32 -1.442695, %v4362_v5 }
0x3888   :  { %5986 = vpow2.f32 %v5101_v63 }
0x3889   :  { %5988 = vpow2.f32 %v5100_v0 }
0x3892   :  { %v5983_v49 = vpop.eup %5982 }
0x3893   :  { %4384 = vrot.lane.b32.xlu1 %v5983_v49, %s6062_s26 }
0x3894   :  { %v5985_v53 = vpop.eup %5984 }
0x3895   :  { %4382 = vrot.lane.b32.xlu0 %v5985_v53, %s6062_s26  ;;  %v5987_v56 = vpop.eup %5986  ;;  %v4743_v53 = vld [vmem:[%s4952_s6] sm:$0x3] }
0x3896   :  { %v5989_v20 = vpop.eup %5988  ;;  %v4371_v1 = vadd.f32 1.0, %v5987_v56 }
0x3897   :  { %v4370_v10 = vadd.f32 1.0, %v5989_v20  ;;  %v5113_v20 = vld [vmem:[%s4951_s24] ss:$0 sm:$0xff] }
0x3898   :  { %5990 = vrcp.f32 %v4371_v1 }
0x3899   :  { %5992 = vrcp.f32 %v4370_v10 }
0x38a5   :  { %v5991_v8 = vpop.eup %5990 }
0x38a6   :  { %v5993_v61 = vpop.eup %5992  ;;  %v4379_v13 = vmul.f32 %v5991_v8, %v4264_v29 }
0x38a7   :  { %v4378_v45 = vmul.f32 %v5993_v61, %v4263_v32 }
0x3905   :  { %v4385_v60 = vpop.permute.xlu1 %4384 }
0x3906   :  { %v4389_v9 = vmul.f32 %v5991_v8, %v4385_v60 }
0x3907   :  { %v4383_v11 = vpop.permute.xlu0 %4382 }
0x3908   :  { %4394 = vrot.lane.b32.xlu1 %v4389_v9, %s6031_s18  ;;  %v4388_v12 = vmul.f32 %v5993_v61, %v4383_v11 }
0x390a   :  { %4392 = vrot.lane.b32.xlu0 %v4388_v12, %s6031_s18 }
0x397a   :  { %v4395_v46 = vpop.permute.xlu1 %4394 }
0x397b   :  { %v4399_v3 = vadd.f32 %v4395_v46, %v4379_v13 }
0x397c   :  { %v4393_v59 = vpop.permute.xlu0 %4392 }
0x397d   :  { %5994 = vtanh.f32 %v4399_v3  ;;  %v4398_v48 = vadd.f32 %v4393_v59, %v4378_v45 }
0x397f   :  { %5996 = vtanh.f32 %v4398_v48 }
0x398a   :  { %v5995_v62 = vpop.eup %5994 }
0x398b   :  { %4406 = vrot.lane.b32.xlu1 %v5995_v62, %s6038_s4 }
0x398c   :  { %v5997_v42 = vpop.eup %5996 }
0x398d   :  { %4404 = vrot.lane.b32.xlu0 %v5997_v42, %s6038_s4 }
0x39fd   :  { %v4407_v57 = vpop.permute.xlu1 %4406 }
0x39fe   :  { %v4411_v58 = vmul.f32 %v5991_v8, %v4407_v57 }
0x39ff   :  { %v4405_v21 = vpop.permute.xlu0 %4404 }
0x3a00   :  { %4416 = vrot.lane.b32.xlu1 %v4411_v58, %s6063_s17  ;;  %v4410_v7 = vmul.f32 %v5993_v61, %v4405_v21 }
0x3a02   :  { %4414 = vrot.lane.b32.xlu0 %v4410_v7, %s6063_s17 }
0x3a72   :  { %v4417_v14 = vpop.permute.xlu1 %4416 }
0x3a74   :  { %v4415_v39 = vpop.permute.xlu0 %4414 }
0x3a75   :  { %5626 = vmatprep.mubr.msk.f32.mxu0 %vm3821_vm4, %v4415_v39 }
0x3a76   :  { %5627 = vmatmul.mubr.msk.f32.vlgmr.msra.gmra.mxu0 %vm3821_vm4, %v4417_v14  ;;  %v80_v14 = vstv %s4954_s14 }
0x3a77   :  { %5636 = vmatprep.mubr.msk.f32.mxu0 %vm3821_vm4, %v3810_v2  ;;  %5635 = vmatpush3.msk.msra.mxu0 %vm3828_vm3, %v4547_v43  ;;  %81 = vst [vmem:[#allocation3] sm:$0x1] %v80_v14 }
0x3a78   :  { %5644 = vmatprep.subr.mxu0 %v6030_v6 }
0x3a7a   :  { %5637 = vmatmul.mubr.msk.f32.vlgmr.msra.gmra.mxu0 %vm3821_vm4, %v3811_v19 }
0x3a7b   :  { %5646 = vmatprep.mubr.msk.f32.mxu0 %vm6066_vm6, %v6030_v6 }
0x3b36   :  { %v5628_v15 = vpop.f32.mrf.mxu0 }
0x3b37   :  { %v4498_v16 = vadd.f32 %v5628_v15, %v5608_v47  ;;  %v4829_v47 = vld [vmem:[#allocation3] sm:$0x1]  ;;  %v82_v15 = vstv %s4955_s20 }
0x3b38   :  { %v4488_v23 = vpop.f32.mrf.mxu0  ;;  %5645 = vmatpush3.msk.msra.mxu0 %vm4741_vm8, %v4829_v47  ;;  %83 = vst [vmem:[#allocation4] sm:$0x1] %v82_v15 }
0x3b39   :  { %5998 = vtanh.f32 %v4498_v16  ;;  %v4497_v24 = vadd.f32 %v4488_v23, %v4003_v22  ;;  %v5106_v2 = vmul.f32 -1.442695, %v4498_v16 }
0x3b3a   :  { %v5638_v0 = vpop.f32.mrf.mxu0 }
0x3b3b   :  { %6000 = vtanh.f32 %v4497_v24  ;;  %v5105_v25 = vmul.f32 -1.442695, %v4497_v24 }
0x3b3c   :  { %6002 = vpow2.f32 %v5106_v2  ;;  %v4706_v10 = vpop.f32.mrf.mxu0 }
0x3b3d   :  { %6004 = vpow2.f32 %v5105_v25 }
0x3b46   :  { %v5999_v50 = vpop.eup %5998 }
0x3b47   :  { %4519 = vrot.lane.b32.xlu1 %v5999_v50, %s6062_s26 }
0x3b48   :  { %v6001_v18 = vpop.eup %6000 }
0x3b49   :  { %4517 = vrot.lane.b32.xlu0 %v6001_v18, %s6062_s26  ;;  %v6003_v17 = vpop.eup %6002  ;;  %v5117_v18 = vld [vmem:[#allocation4] ss:$0 sm:$0xff] }
0x3b4a   :  { %v6005_v19 = vpop.eup %6004  ;;  %v4506_v51 = vadd.f32 1.0, %v6003_v17 }
0x3b4b   :  { %v4505_v26 = vadd.f32 1.0, %v6005_v19 }
0x3b4c   :  { %6006 = vrcp.f32 %v4506_v51 }
0x3b4d   :  { %6008 = vrcp.f32 %v4505_v26 }
0x3b59   :  { %v6007_v27 = vpop.eup %6006 }
0x3b5a   :  { %v6009_v30 = vpop.eup %6008  ;;  %v4514_v33 = vmul.f32 %v6007_v27, %v4399_v3 }
0x3b5b   :  { %v4513_v36 = vmul.f32 %v6009_v30, %v4398_v48 }
0x3bb9   :  { %v4520_v28 = vpop.permute.xlu1 %4519 }
0x3bba   :  { %v4524_v29 = vmul.f32 %v6007_v27, %v4520_v28 }
0x3bbb   :  { %v4518_v31 = vpop.permute.xlu0 %4517 }
0x3bbc   :  { %4529 = vrot.lane.b32.xlu1 %v4524_v29, %s6031_s18  ;;  %v4523_v32 = vmul.f32 %v6009_v30, %v4518_v31 }
0x3bbe   :  { %4527 = vrot.lane.b32.xlu0 %v4523_v32, %s6031_s18 }
0x3c2e   :  { %v4530_v34 = vpop.permute.xlu1 %4529 }
0x3c2f   :  { %v4534_v35 = vadd.f32 %v4530_v34, %v4514_v33 }
0x3c30   :  { %v4528_v40 = vpop.permute.xlu0 %4527 }
0x3c31   :  { %6010 = vtanh.f32 %v4534_v35  ;;  %v4533_v41 = vadd.f32 %v4528_v40, %v4513_v36 }
0x3c33   :  { %6012 = vtanh.f32 %v4533_v41 }
0x3c3e   :  { %v6011_v44 = vpop.eup %6010 }
0x3c3f   :  { %4541 = vrot.lane.b32.xlu1 %v6011_v44, %s6038_s4 }
0x3c40   :  { %v6013_v55 = vpop.eup %6012 }
0x3c41   :  { %4539 = vrot.lane.b32.xlu0 %v6013_v55, %s6038_s4  ;;  %s6067_s4 = smov 33  }
0x3c42   :  { %s4953_s9 = sld [smem:[%s6755_s0 + %s6067_s4]]  }
0x3c48   :  { %v78_v63 = vstv %s4953_s9 }
0x3c49   :  { %79 = vst [vmem:[#allocation2] sm:$0x1] %v78_v63 }
0x3c50   :  { %v5114_v16 = vld [vmem:[#allocation2] ss:$0 sm:$0xff] }
0x3cb1   :  { %v4542_v52 = vpop.permute.xlu1 %4541 }
0x3cb2   :  { %v4546_v4 = vmul.f32 %v6007_v27, %v4542_v52 }
0x3cb3   :  { %v4540_v37 = vpop.permute.xlu0 %4539 }
0x3cb4   :  { %4553 = vrot.lane.b32.xlu1 %v4546_v4, %s6063_s17  ;;  %v4545_v38 = vmul.f32 %v6009_v30, %v4540_v37 }
0x3cb6   :  { %4551 = vrot.lane.b32.xlu0 %v4545_v38, %s6063_s17 }
0x3d26   :  { %v4554_v49 = vpop.permute.xlu1 %4553 }
0x3d28   :  { %v4552_v5 = vpop.permute.xlu0 %4551 }
0x3d29   :  { %5631 = vmatprep.mubr.msk.f32.mxu1 %vm3821_vm4, %v4552_v5 }
0x3d2a   :  { %5632 = vmatmul.mubr.msk.f32.vlgmr.msra.gmra.mxu1 %vm3821_vm4, %v4554_v49 }
0x3d2b   :  { %5641 = vmatprep.mubr.msk.f32.mxu1 %vm6066_vm6, %v6030_v6  ;;  %5640 = vmatpush3.msk.msra.mxu1 %vm4754_vm5, %v4743_v53 }
0x3dea   :  { %v5633_v56 = vpop.f32.mrf.mxu1 }
0x3deb   :  { %v4712_v1 = vadd.f32 %v5638_v0, %v5633_v56 }
0x3dec   :  { %v4628_v8 = vpop.f32.mrf.mxu1 }
0x3ded   :  { %v4723_v6 = vadd.f32 %v5113_v20, %v4712_v1  ;;  %v4707_v60 = vadd.f32 %v4706_v10, %v4628_v8 }
0x3def   :  { %v4725_v9 = vmax.f32 %v4723_v6, 0.0  ;;  %v4722_v61 = vadd.f32 %v5113_v20, %v4707_v60 }
0x3df1   :  { %v4734_v11 = vsel %vm4726_vm7, %v4725_v9, -inf  ;;  %v4724_v12 = vmax.f32 %v4722_v61, 0.0 }
0x3df2   :  { %v4735_v13 = vrot.slane %v4734_v11, 4 }
0x3df3   :  { %v4727_v46 = vsel %vm4726_vm7, %v4724_v12, -inf }
0x3df4   :  { %v4736_v3 = vmax.f32 %v4734_v11, %v4735_v13  ;;  %v4728_v45 = vrot.slane %v4727_v46, 4 }
0x3df6   :  { %v4737_v59 = vrot.slane %v4736_v3, 2  ;;  %v4729_v48 = vmax.f32 %v4727_v46, %v4728_v45 }
0x3df8   :  { %v4738_v62 = vmax.f32 %v4736_v3, %v4737_v59  ;;  %v4730_v42 = vrot.slane %v4729_v48, 2 }
0x3dfa   :  { %v4739_v43 = vrot.slane %v4738_v62, 1  ;;  %v4731_v57 = vmax.f32 %v4729_v48, %v4730_v42 }
0x3dfc   :  { %v4732_v58 = vrot.slane %v4731_v57, 1  ;;  %v4740_v21 = vmax.f32 %v4738_v62, %v4739_v43 }
0x3dfe   :  { %v4733_v7 = vmax.f32 %v4731_v57, %v4732_v58 }
0x3e00   :  { %v4742_v39 = vsel %vm4741_vm8, %v4733_v7, %v4740_v21 }
0x3e01   :  { %5642 = vmatmul.mubr.msk.f32.vlgmr.msra.gmra.mxu1 %vm4726_vm7, %v4742_v39 }
0x3ec1   :  { %v4824_v22 = vpop.f32.mrf.mxu1 }
0x3ec2   :  { %v4825_v23 = vadd.f32 %v5114_v16, %v4824_v22 }
0x3ec3   :  { %v5643_v24 = vpop.f32.mrf.mxu1 }
0x3ec4   :  { %v4828_v50 = vmax.f32 %v4825_v23, 0.0 }
0x3ec6   :  { %5647 = vmatmul.mubr.msk.f32.vlgmr.msra.gmra.mxu0 %vm4837_vm9, %v4828_v50 }
0x3f86   :  { %v4910_v2 = vpop.f32.mrf.mxu0 }
0x3f87   :  { %v4911_v25 = vadd.f32 %v5117_v18, %v4910_v2 }
0x3f88   :  { %v5648_v17 = vpop.f32.mrf.mxu0 }
0x3f89   :  { %v4914_v19 = vmax.f32 %v4911_v25, 0.0 }
0x3f8b   :  { %4916 = vst.msk [vmem:[%s4956_s27] sm:$0x3] %vm4915_vm10, %v4914_v19 }

</bundles_post_ra>
